<compile_context>
chip_gen: v6e
topology: v6e:2x2x1
jax: 0.10.0
libtpu: 0.0.40
codegen_flags: <defaults>
</compile_context>

<pallas_src>
import jax
import jax.numpy as jnp
import numpy as np
from jax import lax
from jax.experimental import pallas as pl
from jax.experimental.pallas import tpu as pltpu

LATENT_DIM = 64
CHANNELS = 3
IMG_SIZE = 32
EPS = 1e-5
MXU_DTYPE = jnp.bfloat16        # MXU operand dtype (accumulation is f32)
N_PAD = 128                     # lane-dense padding of the final Cout=3


# ---------------------------- Pallas kernels ----------------------------

def _bmm_relu_kernel(x_ref, w_ref, o_ref):
    # One (phase, row-tile) grid step: [tm, K] @ [K, N] on the MXU, fused ReLU.
    acc = jnp.dot(x_ref[0], w_ref[0], preferred_element_type=jnp.float32)
    o_ref[0] = jnp.maximum(acc, 0.0)


def _bmm_bias_tanh_kernel(x_ref, w_ref, b_ref, o_ref):
    # Final layer: matmul + bias + tanh (output channels zero-padded to N=128).
    acc = jnp.dot(x_ref[0], w_ref[0], preferred_element_type=jnp.float32)
    o_ref[0] = jnp.tanh(acc + b_ref[0])


def _pick_tm(m, cap=512):
    """Largest row tile <= cap; prefer an exact divisor of M so grids are exact."""
    if m <= cap:
        return m
    for t in (512, 256, 128, 64, 8):
        if t <= cap and m % t == 0:
            return t
    return cap   # ragged edge block is masked by Pallas (grid uses pl.cdiv)


def _phase_matmul(kernel, x, w, extra=(), extra_specs=()):
    """Batched matmul over stacked phases.  x: (P,M,K) bf16, w: (P,K,N) bf16
    -> (P,M,N) float32."""
    P, M, K = x.shape
    N = w.shape[-1]
    tm = _pick_tm(M)
    grid = (P, pl.cdiv(M, tm))
    return pl.pallas_call(
        kernel,
        out_shape=jax.ShapeDtypeStruct((P, M, N), jnp.float32),
        grid=grid,
        in_specs=[pl.BlockSpec((1, tm, K), lambda p, i: (p, i, 0)),
                  pl.BlockSpec((1, K, N), lambda p, i: (p, 0, 0)),
                  *extra_specs],
        out_specs=pl.BlockSpec((1, tm, N), lambda p, i: (p, i, 0)),
        compiler_params=pltpu.CompilerParams(
            dimension_semantics=("parallel", "parallel"),
            vmem_limit_bytes=32 * 1024 * 1024),
    )(x, w, *extra)


def phase_matmul_relu(x, w):
    return _phase_matmul(_bmm_relu_kernel, x, w)


def phase_matmul_bias_tanh(x, w, b):
    N = w.shape[-1]
    bias_spec = pl.BlockSpec((1, 1, N), lambda p, i: (0, 0, 0))
    return _phase_matmul(_bmm_bias_tanh_kernel, x, w,
                         extra=(b.reshape(1, 1, N).astype(jnp.float32),),
                         extra_specs=(bias_spec,))


# ------------------- sub-pixel (phase) decomposition glue -------------------
# ConvTranspose2d(k=4, stride=2, padding=1): output index oy = 2*iy - 1 + ky, so
# per spatial dim, output row 2m+p receives exactly two taps:
#   p=0: input row m-1 with kernel tap 3,  input row m   with kernel tap 1
#   p=1: input row m   with kernel tap 2,  input row m+1 with kernel tap 0
_PHASE_TAPS = (((-1, 3), (0, 1)),       # output parity 0: (input offset, kernel idx)
               ((0, 2), (1, 0)))        # output parity 1


def phase_weights(w):
    """PyTorch ConvTranspose2d weight (Cin, Cout, 4, 4) -> (4, 4*Cin, Cout):
    one (4*Cin, Cout) matmul matrix per output phase, order (py,px) = 00,01,10,11."""
    ci, co = w.shape[0], w.shape[1]
    mats = []
    for py in (0, 1):
        for px in (0, 1):
            taps = [w[:, :, ky, kx]                       # (Cin, Cout)
                    for (_, ky) in _PHASE_TAPS[py]
                    for (_, kx) in _PHASE_TAPS[px]]
            mats.append(jnp.stack(taps, axis=0).reshape(4 * ci, co))
    return jnp.stack(mats, axis=0)                        # (4, 4*Cin, Cout)


def phase_patches(a):
    """a: (B, H, W, Cin) NHWC -> (4, B*H*W, 4*Cin) im2col patches per output phase.
    Only the 4 kernel taps that hit non-dilated input are gathered (K = 4*Cin)."""
    b, h, w, c = a.shape
    ap = jnp.pad(a, ((0, 0), (1, 1), (1, 1), (0, 0)))
    cols = []
    for py in (0, 1):
        for px in (0, 1):
            taps = [ap[:, 1 + dy:1 + dy + h, 1 + dx:1 + dx + w, :]
                    for (dy, _) in _PHASE_TAPS[py]
                    for (dx, _) in _PHASE_TAPS[px]]
            cols.append(jnp.stack(taps, axis=3).reshape(b * h * w, 4 * c))
    return jnp.stack(cols, axis=0)                        # (4, B*H*W, 4*Cin)


def merge_phases(y, b, h, w):
    """y: (4, B*H*W, C) phase-stacked outputs -> (B, 2H, 2W, C) NHWC."""
    c = y.shape[-1]
    y = y.reshape(2, 2, b, h, w, c)                       # (py, px, b, m, n, c)
    y = jnp.transpose(y, (2, 3, 0, 4, 1, 5))              # (b, m, py, n, px, c)
    return y.reshape(b, 2 * h, 2 * w, c)


def batchnorm_affine(h, gamma, beta, axes):
    """Training-mode BatchNorm2d (biased batch variance, eps=1e-5) expressed as a
    per-channel affine.  The tiny per-channel reduction runs in XLA; the affine is
    an elementwise op that fuses into the next layer's patch construction."""
    mean = jnp.mean(h, axis=axes)
    var = jnp.var(h, axis=axes)
    scale = gamma * lax.rsqrt(var + EPS)
    return h * scale + (beta - mean * scale)


# ------------------------------ forward pass ------------------------------

def init_params(key):
    ks = jax.random.split(key, 5)
    s = 0.05
    return {
        "w1": jax.random.normal(ks[0], (LATENT_DIM, 256, 4, 4), jnp.float32) * s,
        "g1": jnp.ones((256,), jnp.float32), "b1": jnp.zeros((256,), jnp.float32),
        "w2": jax.random.normal(ks[1], (256, 128, 4, 4), jnp.float32) * s,
        "g2": jnp.ones((128,), jnp.float32), "b2": jnp.zeros((128,), jnp.float32),
        "w3": jax.random.normal(ks[2], (128, 64, 4, 4), jnp.float32) * s,
        "g3": jnp.ones((64,), jnp.float32), "b3": jnp.zeros((64,), jnp.float32),
        "w4": jax.random.normal(ks[3], (64, CHANNELS, 4, 4), jnp.float32) * s,
        "bias4": jax.random.normal(ks[4], (CHANNELS,), jnp.float32) * s,
    }


def generator_forward(params, z):
    """z: (B, latent_dim, 1, 1) NCHW -> img: (B, CHANNELS, 32, 32) NCHW."""
    batch = z.shape[0]

    # Layer 1: ConvTranspose2d(latent,256,4,1,0) on a 1x1 input is exactly
    # z(B,64) @ W(64, 4*4*256) reshaped to (B,4,4,256) NHWC.  Fused ReLU in Pallas.
    w1m = jnp.transpose(params["w1"], (0, 2, 3, 1)).reshape(LATENT_DIM, 16 * 256)
    h1 = phase_matmul_relu(z.reshape(batch, LATENT_DIM).astype(MXU_DTYPE)[None],
                           w1m.astype(MXU_DTYPE)[None])[0]          # (B, 4096) f32
    h1 = h1.reshape(batch, 4, 4, 256)
    a1 = batchnorm_affine(h1, params["g1"], params["b1"], axes=(0, 1, 2))

    # Layers 2-3: phase-decomposed stride-2 ConvTranspose2d + ReLU (Pallas), then BN.
    def convt_relu(a_nhwc, w):
        _, sh, sw, _ = a_nhwc.shape
        x = phase_patches(a_nhwc.astype(MXU_DTYPE))      # (4, B*H*W, 4*Cin) bf16
        wm = phase_weights(w).astype(MXU_DTYPE)          # (4, 4*Cin, Cout)   bf16
        return phase_matmul_relu(x, wm), (sh, sw)        # (4, B*H*W, Cout)   f32

    y2, (sh, sw) = convt_relu(a1, params["w2"])                         # 4 -> 8
    a2 = merge_phases(batchnorm_affine(y2, params["g2"], params["b2"], axes=(0, 1)),
                      batch, sh, sw)                                    # (B,8,8,128)

    y3, (sh, sw) = convt_relu(a2, params["w3"])                         # 8 -> 16
    a3 = merge_phases(batchnorm_affine(y3, params["g3"], params["b3"], axes=(0, 1)),
                      batch, sh, sw)                                    # (B,16,16,64)

    # Layer 4: phase-decomposed ConvTranspose2d(64, C, 4, 2, 1) + bias + tanh.
    # Output channels zero-padded 3 -> 128 for lane-dense stores, sliced off after.
    x4 = phase_patches(a3.astype(MXU_DTYPE))                            # (4, B*256, 256)
    w4m = jnp.pad(phase_weights(params["w4"]),
                  ((0, 0), (0, 0), (0, N_PAD - CHANNELS)))
    bias4 = jnp.pad(params["bias4"], (0, N_PAD - CHANNELS))
    y4 = phase_matmul_bias_tanh(x4, w4m.astype(MXU_DTYPE), bias4)       # (4, B*256, 128)
    img = merge_phases(y4[:, :, :CHANNELS], batch, 16, 16)              # (B,32,32,C)

    # matches `img.view(z.size(0), channels, img_size, img_size)` in PyTorch (NCHW)
    return jnp.transpose(img, (0, 3, 1, 2))


# Reference built from lax.conv_general_dilated.  The conv operands use the same
# bf16 quantization as the Pallas MXU path (accumulation in f32), so the comparison
# isolates layout / phase-decomposition / BN correctness; a pure-f32 reference would
# only differ by the documented bf16 operand rounding (~1e-2 through 4 layers).
def _ref_forward(params, z):
    def convt(x, w, stride, padding, bias=None):
        k = w.shape[2]
        rhs = jnp.transpose(jnp.flip(w, (2, 3)), (1, 0, 2, 3))      # (Co, Ci, k, k)
        pad = k - 1 - padding
        out = lax.conv_general_dilated(
            x.astype(MXU_DTYPE), rhs.astype(MXU_DTYPE),
            window_strides=(1, 1), padding=[(pad, pad), (pad, pad)],
            lhs_dilation=(stride, stride),
            dimension_numbers=("NCHW", "OIHW", "NCHW"),
            preferred_element_type=jnp.float32)
        if bias is not None:
            out = out + bias.reshape(1, -1, 1, 1)
        return out

    def bn(x, g, b):
        mean = jnp.mean(x, axis=(0, 2, 3), keepdims=True)
        var = jnp.var(x, axis=(0, 2, 3), keepdims=True)
        return ((x - mean) * lax.rsqrt(var + EPS) * g.reshape(1, -1, 1, 1)
                + b.reshape(1, -1, 1, 1))

    x = bn(jnp.maximum(convt(z, params["w1"], 1, 0), 0.0), params["g1"], params["b1"])
    x = bn(jnp.maximum(convt(x, params["w2"], 2, 1), 0.0), params["g2"], params["b2"])
    x = bn(jnp.maximum(convt(x, params["w3"], 2, 1), 0.0), params["g3"], params["b3"])
    return jnp.tanh(convt(x, params["w4"], 2, 1, params["bias4"]))


if __name__ == "__main__":
    key = jax.random.PRNGKey(0)
    pkey, zkey = jax.random.split(key)
    params = init_params(pkey)
    z = jax.random.normal(zkey, (2, LATENT_DIM, 1, 1), jnp.float32)

    img = jax.block_until_ready(jax.jit(generator_forward)(params, z))
    assert img.shape == (2, CHANNELS, IMG_SIZE, IMG_SIZE), img.shape

    ref = jax.block_until_ready(jax.jit(_ref_forward)(params, z))
    np.testing.assert_allclose(np.asarray(img), np.asarray(ref), atol=2e-3, rtol=2e-3)
    print("KERNEL_OK")
</pallas_src>

<mosaic_0001>
module attributes {stable_mosaic.version = 11 : i64} {
  func.func @_bmm_relu_kernel(%arg0: i32, %arg1: i32, %arg2: memref<1x2x64xbf16, #tpu.memory_space<vmem>>, %arg3: memref<1x64x4096xbf16, #tpu.memory_space<vmem>>, %arg4: memref<1x2x4096xf32, #tpu.memory_space<vmem>>) attributes {dimension_semantics = [#tpu.dimension_semantics<parallel>, #tpu.dimension_semantics<parallel>], iteration_bounds = array<i64: 1, 1>, scalar_prefetch = 0 : i64, scratch_operands = 0 : i64, tpu.core_type = #tpu.core_type<tc>, window_params = [{transform_indices = @transform_0, window_bounds = array<i64: 1, 2, 64>}, {transform_indices = @transform_1, window_bounds = array<i64: 1, 64, 4096>}, {transform_indices = @transform_2, window_bounds = array<i64: 1, 2, 4096>}]} {
    %c0 = arith.constant 0 : index
    %c0_0 = arith.constant 0 : index
    %c0_1 = arith.constant 0 : index
    %0 = vector.load %arg2[%c0, %c0_0, %c0_1] : memref<1x2x64xbf16, #tpu.memory_space<vmem>>, vector<1x2x64xbf16>
    %1 = vector.shape_cast %0 : vector<1x2x64xbf16> to vector<2x64xbf16>
    %c0_2 = arith.constant 0 : index
    %c0_3 = arith.constant 0 : index
    %c0_4 = arith.constant 0 : index
    %2 = vector.load %arg3[%c0_2, %c0_3, %c0_4] : memref<1x64x4096xbf16, #tpu.memory_space<vmem>>, vector<1x64x4096xbf16>
    %3 = vector.shape_cast %2 : vector<1x64x4096xbf16> to vector<64x4096xbf16>
    %cst = arith.constant dense<0.000000e+00> : vector<2x4096xf32>
    %4 = tpu.matmul %1, %3, %cst {dimension_numbers = #tpu.dot_dimension_numbers<[1], [0], [0], [1], [0, 0, 1, 1], [], []>} : vector<2x64xbf16>, vector<64x4096xbf16>, vector<2x4096xf32> -> vector<2x4096xf32>
    %cst_5 = arith.constant 0.000000e+00 : f32
    %5 = vector.broadcast %cst_5 : f32 to vector<2x4096xf32>
    %6 = arith.maximumf %4, %5 : vector<2x4096xf32>
    %c0_6 = arith.constant 0 : index
    %c0_7 = arith.constant 0 : index
    %c0_8 = arith.constant 0 : index
    %7 = vector.load %arg4[%c0_6, %c0_7, %c0_8] : memref<1x2x4096xf32, #tpu.memory_space<vmem>>, vector<1x2x4096xf32>
    %8 = vector.shape_cast %7 : vector<1x2x4096xf32> to vector<2x4096xf32>
    %9 = vector.shape_cast %6 : vector<2x4096xf32> to vector<1x2x4096xf32>
    tpu.vector_store %arg4[%c0_6, %c0_7, %c0_8], %9 {strides = array<i32>} : memref<1x2x4096xf32, #tpu.memory_space<vmem>>, vector<1x2x4096xf32>,
    return
  }
  func.func @transform_0(%arg0: i32, %arg1: i32) -> (i32, i32, i32) {
    %c0_i32 = arith.constant 0 : i32
    %c0_i32_0 = arith.constant 0 : i32
    return %arg0, %arg1, %c0_i32 : i32, i32, i32
  }
  func.func @transform_1(%arg0: i32, %arg1: i32) -> (i32, i32, i32) {
    %c0_i32 = arith.constant 0 : i32
    %c0_i32_0 = arith.constant 0 : i32
    %c0_i32_1 = arith.constant 0 : i32
    return %arg0, %c0_i32, %c0_i32_0 : i32, i32, i32
  }
  func.func @transform_2(%arg0: i32, %arg1: i32) -> (i32, i32, i32) {
    %c0_i32 = arith.constant 0 : i32
    %c0_i32_0 = arith.constant 0 : i32
    return %arg0, %arg1, %c0_i32 : i32, i32, i32
  }
}

module attributes {stable_mosaic.version = 11 : i64} {
  func.func @_bmm_relu_kernel(%arg0: i32, %arg1: i32, %arg2: memref<1x32x1024xbf16, #tpu.memory_space<vmem>>, %arg3: memref<1x1024x128xbf16, #tpu.memory_space<vmem>>, %arg4: memref<1x32x128xf32, #tpu.memory_space<vmem>>) attributes {dimension_semantics = [#tpu.dimension_semantics<parallel>, #tpu.dimension_semantics<parallel>], iteration_bounds = array<i64: 4, 1>, scalar_prefetch = 0 : i64, scratch_operands = 0 : i64, tpu.core_type = #tpu.core_type<tc>, window_params = [{transform_indices = @transform_0, window_bounds = array<i64: 1, 32, 1024>}, {transform_indices = @transform_1, window_bounds = array<i64: 1, 1024, 128>}, {transform_indices = @transform_2, window_bounds = array<i64: 1, 32, 128>}]} {
    %c0 = arith.constant 0 : index
    %c0_0 = arith.constant 0 : index
    %c0_1 = arith.constant 0 : index
    %0 = vector.load %arg2[%c0, %c0_0, %c0_1] : memref<1x32x1024xbf16, #tpu.memory_space<vmem>>, vector<1x32x1024xbf16>
    %1 = vector.shape_cast %0 : vector<1x32x1024xbf16> to vector<32x1024xbf16>
    %c0_2 = arith.constant 0 : index
    %c0_3 = arith.constant 0 : index
    %c0_4 = arith.constant 0 : index
    %2 = vector.load %arg3[%c0_2, %c0_3, %c0_4] : memref<1x1024x128xbf16, #tpu.memory_space<vmem>>, vector<1x1024x128xbf16>
    %3 = vector.shape_cast %2 : vector<1x1024x128xbf16> to vector<1024x128xbf16>
    %cst = arith.constant dense<0.000000e+00> : vector<32x128xf32>
    %4 = tpu.matmul %1, %3, %cst {dimension_numbers = #tpu.dot_dimension_numbers<[1], [0], [0], [1], [0, 0, 1, 1], [], []>} : vector<32x1024xbf16>, vector<1024x128xbf16>, vector<32x128xf32> -> vector<32x128xf32>
    %cst_5 = arith.constant 0.000000e+00 : f32
    %5 = vector.broadcast %cst_5 : f32 to vector<32x128xf32>
    %6 = arith.maximumf %4, %5 : vector<32x128xf32>
    %c0_6 = arith.constant 0 : index
    %c0_7 = arith.constant 0 : index
    %c0_8 = arith.constant 0 : index
    %7 = vector.load %arg4[%c0_6, %c0_7, %c0_8] : memref<1x32x128xf32, #tpu.memory_space<vmem>>, vector<1x32x128xf32>
    %8 = vector.shape_cast %7 : vector<1x32x128xf32> to vector<32x128xf32>
    %9 = vector.shape_cast %6 : vector<32x128xf32> to vector<1x32x128xf32>
    tpu.vector_store %arg4[%c0_6, %c0_7, %c0_8], %9 {strides = array<i32>} : memref<1x32x128xf32, #tpu.memory_space<vmem>>, vector<1x32x128xf32>,
    return
  }
  func.func @transform_0(%arg0: i32, %arg1: i32) -> (i32, i32, i32) {
    %c0_i32 = arith.constant 0 : i32
    %c0_i32_0 = arith.constant 0 : i32
    return %arg0, %arg1, %c0_i32 : i32, i32, i32
  }
  func.func @transform_1(%arg0: i32, %arg1: i32) -> (i32, i32, i32) {
    %c0_i32 = arith.constant 0 : i32
    %c0_i32_0 = arith.constant 0 : i32
    %c0_i32_1 = arith.constant 0 : i32
    return %arg0, %c0_i32, %c0_i32_0 : i32, i32, i32
  }
  func.func @transform_2(%arg0: i32, %arg1: i32) -> (i32, i32, i32) {
    %c0_i32 = arith.constant 0 : i32
    %c0_i32_0 = arith.constant 0 : i32
    return %arg0, %arg1, %c0_i32 : i32, i32, i32
  }
}

module attributes {stable_mosaic.version = 11 : i64} {
  func.func @_bmm_relu_kernel(%arg0: i32, %arg1: i32, %arg2: memref<1x128x512xbf16, #tpu.memory_space<vmem>>, %arg3: memref<1x512x64xbf16, #tpu.memory_space<vmem>>, %arg4: memref<1x128x64xf32, #tpu.memory_space<vmem>>) attributes {dimension_semantics = [#tpu.dimension_semantics<parallel>, #tpu.dimension_semantics<parallel>], iteration_bounds = array<i64: 4, 1>, scalar_prefetch = 0 : i64, scratch_operands = 0 : i64, tpu.core_type = #tpu.core_type<tc>, window_params = [{transform_indices = @transform_0, window_bounds = array<i64: 1, 128, 512>}, {transform_indices = @transform_1, window_bounds = array<i64: 1, 512, 64>}, {transform_indices = @transform_2, window_bounds = array<i64: 1, 128, 64>}]} {
    %c0 = arith.constant 0 : index
    %c0_0 = arith.constant 0 : index
    %c0_1 = arith.constant 0 : index
    %0 = vector.load %arg2[%c0, %c0_0, %c0_1] : memref<1x128x512xbf16, #tpu.memory_space<vmem>>, vector<1x128x512xbf16>
    %1 = vector.shape_cast %0 : vector<1x128x512xbf16> to vector<128x512xbf16>
    %c0_2 = arith.constant 0 : index
    %c0_3 = arith.constant 0 : index
    %c0_4 = arith.constant 0 : index
    %2 = vector.load %arg3[%c0_2, %c0_3, %c0_4] : memref<1x512x64xbf16, #tpu.memory_space<vmem>>, vector<1x512x64xbf16>
    %3 = vector.shape_cast %2 : vector<1x512x64xbf16> to vector<512x64xbf16>
    %cst = arith.constant dense<0.000000e+00> : vector<128x64xf32>
    %4 = tpu.matmul %1, %3, %cst {dimension_numbers = #tpu.dot_dimension_numbers<[1], [0], [0], [1], [0, 0, 1, 1], [], []>} : vector<128x512xbf16>, vector<512x64xbf16>, vector<128x64xf32> -> vector<128x64xf32>
    %cst_5 = arith.constant 0.000000e+00 : f32
    %5 = vector.broadcast %cst_5 : f32 to vector<128x64xf32>
    %6 = arith.maximumf %4, %5 : vector<128x64xf32>
    %c0_6 = arith.constant 0 : index
    %c0_7 = arith.constant 0 : index
    %c0_8 = arith.constant 0 : index
    %7 = vector.load %arg4[%c0_6, %c0_7, %c0_8] : memref<1x128x64xf32, #tpu.memory_space<vmem>>, vector<1x128x64xf32>
    %8 = vector.shape_cast %7 : vector<1x128x64xf32> to vector<128x64xf32>
    %9 = vector.shape_cast %6 : vector<128x64xf32> to vector<1x128x64xf32>
    tpu.vector_store %arg4[%c0_6, %c0_7, %c0_8], %9 {strides = array<i32>} : memref<1x128x64xf32, #tpu.memory_space<vmem>>, vector<1x128x64xf32>,
    return
  }
  func.func @transform_0(%arg0: i32, %arg1: i32) -> (i32, i32, i32) {
    %c0_i32 = arith.constant 0 : i32
    %c0_i32_0 = arith.constant 0 : i32
    return %arg0, %arg1, %c0_i32 : i32, i32, i32
  }
  func.func @transform_1(%arg0: i32, %arg1: i32) -> (i32, i32, i32) {
    %c0_i32 = arith.constant 0 : i32
    %c0_i32_0 = arith.constant 0 : i32
    %c0_i32_1 = arith.constant 0 : i32
    return %arg0, %c0_i32, %c0_i32_0 : i32, i32, i32
  }
  func.func @transform_2(%arg0: i32, %arg1: i32) -> (i32, i32, i32) {
    %c0_i32 = arith.constant 0 : i32
    %c0_i32_0 = arith.constant 0 : i32
    return %arg0, %arg1, %c0_i32 : i32, i32, i32
  }
}

module attributes {stable_mosaic.version = 11 : i64} {
  func.func @_bmm_bias_tanh_kernel(%arg0: i32, %arg1: i32, %arg2: memref<1x512x256xbf16, #tpu.memory_space<vmem>>, %arg3: memref<1x256x128xbf16, #tpu.memory_space<vmem>>, %arg4: memref<1x1x128xf32, #tpu.memory_space<vmem>>, %arg5: memref<1x512x128xf32, #tpu.memory_space<vmem>>) attributes {dimension_semantics = [#tpu.dimension_semantics<parallel>, #tpu.dimension_semantics<parallel>], iteration_bounds = array<i64: 4, 1>, scalar_prefetch = 0 : i64, scratch_operands = 0 : i64, tpu.core_type = #tpu.core_type<tc>, window_params = [{transform_indices = @transform_0, window_bounds = array<i64: 1, 512, 256>}, {transform_indices = @transform_1, window_bounds = array<i64: 1, 256, 128>}, {pipeline_mode = #tpu.pipeline_mode<synchronous>, transform_indices = @transform_2, window_bounds = array<i64: 1, 1, 128>}, {transform_indices = @transform_3, window_bounds = array<i64: 1, 512, 128>}]} {
    %c0 = arith.constant 0 : index
    %c0_0 = arith.constant 0 : index
    %c0_1 = arith.constant 0 : index
    %0 = vector.load %arg2[%c0, %c0_0, %c0_1] : memref<1x512x256xbf16, #tpu.memory_space<vmem>>, vector<1x512x256xbf16>
    %1 = vector.shape_cast %0 : vector<1x512x256xbf16> to vector<512x256xbf16>
    %c0_2 = arith.constant 0 : index
    %c0_3 = arith.constant 0 : index
    %c0_4 = arith.constant 0 : index
    %2 = vector.load %arg3[%c0_2, %c0_3, %c0_4] : memref<1x256x128xbf16, #tpu.memory_space<vmem>>, vector<1x256x128xbf16>
    %3 = vector.shape_cast %2 : vector<1x256x128xbf16> to vector<256x128xbf16>
    %cst = arith.constant dense<0.000000e+00> : vector<512x128xf32>
    %4 = tpu.matmul %1, %3, %cst {dimension_numbers = #tpu.dot_dimension_numbers<[1], [0], [0], [1], [0, 0, 1, 1], [], []>} : vector<512x256xbf16>, vector<256x128xbf16>, vector<512x128xf32> -> vector<512x128xf32>
    %c0_5 = arith.constant 0 : index
    %c0_6 = arith.constant 0 : index
    %c0_7 = arith.constant 0 : index
    %5 = vector.load %arg4[%c0_5, %c0_6, %c0_7] : memref<1x1x128xf32, #tpu.memory_space<vmem>>, vector<1x1x128xf32>
    %6 = vector.shape_cast %5 : vector<1x1x128xf32> to vector<1x128xf32>
    %7 = vector.broadcast %6 : vector<1x128xf32> to vector<512x128xf32>
    %8 = arith.addf %4, %7 : vector<512x128xf32>
    %9 = math.tanh %8 : vector<512x128xf32>
    %c0_8 = arith.constant 0 : index
    %c0_9 = arith.constant 0 : index
    %c0_10 = arith.constant 0 : index
    %10 = vector.load %arg5[%c0_8, %c0_9, %c0_10] : memref<1x512x128xf32, #tpu.memory_space<vmem>>, vector<1x512x128xf32>
    %11 = vector.shape_cast %10 : vector<1x512x128xf32> to vector<512x128xf32>
    %12 = vector.shape_cast %9 : vector<512x128xf32> to vector<1x512x128xf32>
    tpu.vector_store %arg5[%c0_8, %c0_9, %c0_10], %12 {strides = array<i32>} : memref<1x512x128xf32, #tpu.memory_space<vmem>>, vector<1x512x128xf32>,
    return
  }
  func.func @transform_0(%arg0: i32, %arg1: i32) -> (i32, i32, i32) {
    %c0_i32 = arith.constant 0 : i32
    %c0_i32_0 = arith.constant 0 : i32
    return %arg0, %arg1, %c0_i32 : i32, i32, i32
  }
  func.func @transform_1(%arg0: i32, %arg1: i32) -> (i32, i32, i32) {
    %c0_i32 = arith.constant 0 : i32
    %c0_i32_0 = arith.constant 0 : i32
    %c0_i32_1 = arith.constant 0 : i32
    return %arg0, %c0_i32, %c0_i32_0 : i32, i32, i32
  }
  func.func @transform_2(%arg0: i32, %arg1: i32) -> (i32, i32, i32) {
    %c0_i32 = arith.constant 0 : i32
    %c0_i32_0 = arith.constant 0 : i32
    %c0_i32_1 = arith.constant 0 : i32
    %c0_i32_2 = arith.constant 0 : i32
    return %c0_i32, %c0_i32_0, %c0_i32_1 : i32, i32, i32
  }
  func.func @transform_3(%arg0: i32, %arg1: i32) -> (i32, i32, i32) {
    %c0_i32 = arith.constant 0 : i32
    %c0_i32_0 = arith.constant 0 : i32
    return %arg0, %arg1, %c0_i32 : i32, i32, i32
  }
}

</mosaic_0001>

<bundles_post_ra>
// kernel: squeeze.49
= control target key start
LH: loop header
LB: loop body
LE: loop exit
PB: predicated region body
PF: predicated region fallthrough
CT: control target
= control target key end

     0   :  { %s707_s0 = inlined_call_operand.vmem [shape: f32[1,2,4096], index: 0, kind: input, shape index: {}]   ;;  %s708_s1 = inlined_call_operand.vmem [shape: f32[2,4,4,256], index: 1, kind: output, shape index: {}]  }
   0x1   :  { %v507_v0 = vld [vmem:[%s707_s0 + $0x3e] sm:$0x3]  ;;  %v508_v1 = vld [vmem:[%s707_s0 + $0x3c] sm:$0x3]  ;;  %v509_v2 = vld [vmem:[%s707_s0 + $0x3a] sm:$0x3] }
   0x2   :  { %9 = vst [vmem:[#allocation1 + $0x48] sm:$0x3] %v507_v0  ;;  %14 = vst [vmem:[#allocation1 + $0xf8] sm:$0x3] %v508_v1  ;;  %v510_v3 = vld [vmem:[%s707_s0 + $0x38] sm:$0x3] }
   0x3   :  { %19 = vst [vmem:[#allocation1 + $0x20] sm:$0x3] %v509_v2  ;;  %v511_v4 = vld [vmem:[%s707_s0 + $0x36] sm:$0x3]  ;;  %v512_v5 = vld [vmem:[%s707_s0 + $0x34] sm:$0x3] }
   0x4   :  { %24 = vst [vmem:[#allocation1 + $0xe0] sm:$0x3] %v510_v3  ;;  %29 = vst [vmem:[#allocation1 + $0xa8] sm:$0x3] %v511_v4  ;;  %v513_v6 = vld [vmem:[%s707_s0 + $0x32] sm:$0x3] }
   0x5   :  { %34 = vst [vmem:[#allocation1 + $0x90] sm:$0x3] %v512_v5  ;;  %v514_v7 = vld [vmem:[%s707_s0 + $0x30] sm:$0x3]  ;;  %v515_v8 = vld [vmem:[%s707_s0 + $0x2e] sm:$0x3] }
   0x6   :  { %39 = vst [vmem:[#allocation1 + $0xc8] sm:$0x3] %v513_v6  ;;  %44 = vst [vmem:[#allocation1 + $0xb0] sm:$0x3] %v514_v7  ;;  %v516_v9 = vld [vmem:[%s707_s0 + $0x2c] sm:$0x3] }
   0x7   :  { %49 = vst [vmem:[#allocation1 + $0x78] sm:$0x3] %v515_v8  ;;  %v517_v10 = vld [vmem:[%s707_s0 + $0x2a] sm:$0x3]  ;;  %v518_v11 = vld [vmem:[%s707_s0 + $0x28] sm:$0x3] }
   0x8   :  { %54 = vst [vmem:[#allocation1 + $0x70] sm:$0x3] %v516_v9  ;;  %59 = vst [vmem:[#allocation1 + $0x10] sm:$0x3] %v517_v10  ;;  %v519_v12 = vld [vmem:[%s707_s0 + $0x26] sm:$0x3] }
   0x9   :  { %64 = vst [vmem:[#allocation1 + $0x40] sm:$0x3] %v518_v11  ;;  %v520_v13 = vld [vmem:[%s707_s0 + $0x24] sm:$0x3]  ;;  %v521_v14 = vld [vmem:[%s707_s0 + $0x22] sm:$0x3] }
   0xa   :  { %69 = vst [vmem:[#allocation1 + $0x98] sm:$0x3] %v519_v12  ;;  %74 = vst [vmem:[#allocation1 + $0x8] sm:$0x3] %v520_v13  ;;  %v522_v15 = vld [vmem:[%s707_s0 + $0x20] sm:$0x3] }
   0xb   :  { %79 = vst [vmem:[#allocation1 + $0xf0] sm:$0x3] %v521_v14  ;;  %v523_v16 = vld [vmem:[%s707_s0 + $0x1e] sm:$0x3]  ;;  %v524_v17 = vld [vmem:[%s707_s0 + $0x1c] sm:$0x3] }
   0xc   :  { %84 = vst [vmem:[#allocation1 + $0x80] sm:$0x3] %v522_v15  ;;  %89 = vst [vmem:[#allocation1 + $0xc0] sm:$0x3] %v523_v16  ;;  %v525_v18 = vld [vmem:[%s707_s0 + $0x1a] sm:$0x3] }
   0xd   :  { %94 = vst [vmem:[#allocation1 + $0xa0] sm:$0x3] %v524_v17  ;;  %v526_v19 = vld [vmem:[%s707_s0 + $0x18] sm:$0x3]  ;;  %v527_v20 = vld [vmem:[%s707_s0 + $0x16] sm:$0x3] }
   0xe   :  { %99 = vst [vmem:[#allocation1 + $0xb8] sm:$0x3] %v525_v18  ;;  %104 = vst [vmem:[#allocation1 + $0x30] sm:$0x3] %v526_v19  ;;  %v528_v21 = vld [vmem:[%s707_s0 + $0x14] sm:$0x3] }
   0xf   :  { %109 = vst [vmem:[#allocation1 + $0x18] sm:$0x3] %v527_v20  ;;  %v529_v22 = vld [vmem:[%s707_s0 + $0x12] sm:$0x3]  ;;  %v530_v23 = vld [vmem:[%s707_s0 + $0x10] sm:$0x3] }
  0x10   :  { %114 = vst [vmem:[#allocation1 + $0x68] sm:$0x3] %v528_v21  ;;  %119 = vst [vmem:[#allocation1 + $0x88] sm:$0x3] %v529_v22  ;;  %v531_v24 = vld [vmem:[%s707_s0 + $0xe] sm:$0x3] }
  0x11   :  { %124 = vst [vmem:[#allocation1 + $0x38] sm:$0x3] %v530_v23  ;;  %v532_v25 = vld [vmem:[%s707_s0 + $0xc] sm:$0x3]  ;;  %v533_v26 = vld [vmem:[%s707_s0 + $0xa] sm:$0x3] }
  0x12   :  { %129 = vst [vmem:[#allocation1 + $0x50] sm:$0x3] %v531_v24  ;;  %134 = vst [vmem:[#allocation1 + $0x28] sm:$0x3] %v532_v25  ;;  %v534_v27 = vld [vmem:[%s707_s0 + $0x8] sm:$0x3] }
  0x13   :  { %139 = vst [vmem:[#allocation1 + $0xe8] sm:$0x3] %v533_v26  ;;  %v535_v28 = vld [vmem:[%s707_s0 + $0x6] sm:$0x3]  ;;  %v536_v29 = vld [vmem:[%s707_s0 + $0x4] sm:$0x3] }
  0x14   :  { %144 = vst [vmem:[#allocation1 + $0xd0] sm:$0x3] %v534_v27  ;;  %149 = vst [vmem:[#allocation1 + $0x58] sm:$0x3] %v535_v28  ;;  %v537_v30 = vld [vmem:[%s707_s0 + $0x2] sm:$0x3] }
  0x15   :  { %154 = vst [vmem:[#allocation1] sm:$0x3] %v536_v29  ;;  %v159_v31 = vld [vmem:[%s707_s0] sm:$0x3]  ;;  %v298_v32 = vld [vmem:[#allocation1 + $0x78] sm:$0x3]  }
  0x16   :  { %158 = vst [vmem:[#allocation1 + $0xd8] sm:$0x3] %v537_v30  ;;  %160 = vst [vmem:[#allocation1 + $0x60] sm:$0x3] %v159_v31  ;;  %v280_v33 = vld [vmem:[#allocation1 + $0x40] sm:$0x3]  }
  0x17   :  { %v286_v34 = vld [vmem:[#allocation1 + $0x10] sm:$0x3]   ;;  %300 = vst [vmem:[#allocation0 + $0x2b] sm:$0x1] %v298_v32   ;;  %302 = vst [vmem:[#allocation0 + $0x6a] sm:$0x2] %v298_v32  }
  0x18   :  { %v292_v35 = vld [vmem:[#allocation1 + $0x70] sm:$0x3]   ;;  %v268_v37 = vld [vmem:[#allocation1 + $0x8] sm:$0x3]   ;;  %v274_v38 = vld [vmem:[#allocation1 + $0x98] sm:$0x3]  }
  0x19   :  { %v262_v36 = vld [vmem:[#allocation1 + $0xf0] sm:$0x3]   ;;  %282 = vst [vmem:[#allocation0 + $0x22] sm:$0x1] %v280_v33   ;;  %284 = vst [vmem:[#allocation0 + $0x61] sm:$0x2] %v280_v33  }
  0x1a   :  { %288 = vst [vmem:[#allocation0 + $0x2a] sm:$0x1] %v286_v34   ;;  %290 = vst [vmem:[#allocation0 + $0x69] sm:$0x2] %v286_v34   ;;  %v244_v39 = vld [vmem:[#allocation1 + $0xa0] sm:$0x3]  }
  0x1b   :  { %294 = vst [vmem:[#allocation0 + $0x23] sm:$0x1] %v292_v35   ;;  %296 = vst [vmem:[#allocation0 + $0x62] sm:$0x2] %v292_v35   ;;  %v250_v40 = vld [vmem:[#allocation1 + $0xc0] sm:$0x3]  }
  0x1c   :  { %v256_v41 = vld [vmem:[#allocation1 + $0x80] sm:$0x3]   ;;  %264 = vst [vmem:[#allocation0 + $0x28] sm:$0x1] %v262_v36   ;;  %266 = vst [vmem:[#allocation0 + $0x67] sm:$0x2] %v262_v36  }
  0x1d   :  { %270 = vst [vmem:[#allocation0 + $0x21] sm:$0x1] %v268_v37   ;;  %272 = vst [vmem:[#allocation0 + $0x60] sm:$0x2] %v268_v37   ;;  %v226_v42 = vld [vmem:[#allocation1 + $0x18] sm:$0x3]  }
  0x1e   :  { %276 = vst [vmem:[#allocation0 + $0x29] sm:$0x1] %v274_v38   ;;  %278 = vst [vmem:[#allocation0 + $0x68] sm:$0x2] %v274_v38   ;;  %v232_v43 = vld [vmem:[#allocation1 + $0x30] sm:$0x3]  }
  0x1f   :  { %v238_v44 = vld [vmem:[#allocation1 + $0xb8] sm:$0x3]   ;;  %246 = vst [vmem:[#allocation0 + $0x13] sm:$0x1] %v244_v39   ;;  %248 = vst [vmem:[#allocation0 + $0x52] sm:$0x2] %v244_v39  }
  0x20   :  { %252 = vst [vmem:[#allocation0 + $0x1b] sm:$0x1] %v250_v40   ;;  %254 = vst [vmem:[#allocation0 + $0x5a] sm:$0x2] %v250_v40   ;;  %v208_v45 = vld [vmem:[#allocation1 + $0x38] sm:$0x3]  }
  0x21   :  { %258 = vst [vmem:[#allocation0 + $0x20] sm:$0x1] %v256_v41   ;;  %260 = vst [vmem:[#allocation0 + $0x5f] sm:$0x2] %v256_v41   ;;  %v214_v46 = vld [vmem:[#allocation1 + $0x88] sm:$0x3]  }
  0x22   :  { %v220_v47 = vld [vmem:[#allocation1 + $0x68] sm:$0x3]   ;;  %228 = vst [vmem:[#allocation0 + $0x19] sm:$0x1] %v226_v42   ;;  %230 = vst [vmem:[#allocation0 + $0x58] sm:$0x2] %v226_v42  }
  0x23   :  { %234 = vst [vmem:[#allocation0 + $0x12] sm:$0x1] %v232_v43   ;;  %236 = vst [vmem:[#allocation0 + $0x51] sm:$0x2] %v232_v43   ;;  %v190_v48 = vld [vmem:[#allocation1 + $0xe8] sm:$0x3]  }
  0x24   :  { %240 = vst [vmem:[#allocation0 + $0x1a] sm:$0x1] %v238_v44   ;;  %242 = vst [vmem:[#allocation0 + $0x59] sm:$0x2] %v238_v44   ;;  %v196_v49 = vld [vmem:[#allocation1 + $0x28] sm:$0x3]  }
  0x25   :  { %v202_v50 = vld [vmem:[#allocation1 + $0x50] sm:$0x3]   ;;  %210 = vst [vmem:[#allocation0 + $0x10] sm:$0x1] %v208_v45   ;;  %212 = vst [vmem:[#allocation0 + $0x4f] sm:$0x2] %v208_v45  }
  0x26   :  { %216 = vst [vmem:[#allocation0 + $0x18] sm:$0x1] %v214_v46   ;;  %218 = vst [vmem:[#allocation0 + $0x57] sm:$0x2] %v214_v46   ;;  %v172_v51 = vld [vmem:[#allocation1] sm:$0x3]  }
  0x27   :  { %222 = vst [vmem:[#allocation0 + $0x11] sm:$0x1] %v220_v47   ;;  %224 = vst [vmem:[#allocation0 + $0x50] sm:$0x2] %v220_v47   ;;  %v178_v52 = vld [vmem:[#allocation1 + $0x58] sm:$0x3]  }
  0x28   :  { %v184_v53 = vld [vmem:[#allocation1 + $0xd0] sm:$0x3]   ;;  %192 = vst [vmem:[#allocation0 + $0xa] sm:$0x1] %v190_v48   ;;  %194 = vst [vmem:[#allocation0 + $0x49] sm:$0x2] %v190_v48  }
  0x29   :  { %198 = vst [vmem:[#allocation0 + $0x3] sm:$0x1] %v196_v49   ;;  %200 = vst [vmem:[#allocation0 + $0x42] sm:$0x2] %v196_v49   ;;  %v161_v54 = vld [vmem:[#allocation1 + $0x60] sm:$0x3]  }
  0x2a   :  { %204 = vst [vmem:[#allocation0 + $0xb] sm:$0x1] %v202_v50   ;;  %206 = vst [vmem:[#allocation0 + $0x4a] sm:$0x2] %v202_v50   ;;  %v166_v55 = vld [vmem:[#allocation1 + $0xd8] sm:$0x3]  }
  0x2b   :  { %174 = vst [vmem:[#allocation0 + $0x1] sm:$0x1] %v172_v51   ;;  %176 = vst [vmem:[#allocation0 + $0x40] sm:$0x2] %v172_v51   ;;  %v304_v56 = vld [vmem:[#allocation1 + $0xb0] sm:$0x3]  }
  0x2c   :  { %180 = vst [vmem:[#allocation0 + $0x9] sm:$0x1] %v178_v52   ;;  %182 = vst [vmem:[#allocation0 + $0x48] sm:$0x2] %v178_v52   ;;  %v310_v57 = vld [vmem:[#allocation1 + $0xc8] sm:$0x3]  }
  0x2d   :  { %186 = vst [vmem:[#allocation0 + $0x2] sm:$0x1] %v184_v53   ;;  %188 = vst [vmem:[#allocation0 + $0x41] sm:$0x2] %v184_v53   ;;  %v316_v58 = vld [vmem:[#allocation1 + $0x90] sm:$0x3]  }
  0x2e   :  { %162 = vst [vmem:[#allocation0] sm:$0x1] %v161_v54   ;;  %164 = vst [vmem:[#allocation0 + $0x3f] sm:$0x2] %v161_v54   ;;  %v322_v59 = vld [vmem:[#allocation1 + $0xa8] sm:$0x3]  }
  0x2f   :  { %168 = vst [vmem:[#allocation0 + $0x8] sm:$0x1] %v166_v55   ;;  %170 = vst [vmem:[#allocation0 + $0x47] sm:$0x2] %v166_v55   ;;  %v328_v60 = vld [vmem:[#allocation1 + $0xe0] sm:$0x3]  }
  0x30   :  { %306 = vst [vmem:[#allocation0 + $0x30] sm:$0x1] %v304_v56   ;;  %308 = vst [vmem:[#allocation0 + $0x6f] sm:$0x2] %v304_v56   ;;  %v334_v61 = vld [vmem:[#allocation1 + $0x20] sm:$0x3]  }
  0x31   :  { %312 = vst [vmem:[#allocation0 + $0x38] sm:$0x1] %v310_v57   ;;  %314 = vst [vmem:[#allocation0 + $0x77] sm:$0x2] %v310_v57   ;;  %v340_v62 = vld [vmem:[#allocation1 + $0xf8] sm:$0x3]  }
  0x32   :  { %318 = vst [vmem:[#allocation0 + $0x31] sm:$0x1] %v316_v58   ;;  %320 = vst [vmem:[#allocation0 + $0x70] sm:$0x2] %v316_v58   ;;  %v346_v63 = vld [vmem:[#allocation1 + $0x48] sm:$0x3]  }
  0x33   :  { %324 = vst [vmem:[#allocation0 + $0x39] sm:$0x1] %v322_v59   ;;  %326 = vst [vmem:[#allocation0 + $0x78] sm:$0x2] %v322_v59   ;;  %v380_v0 = vld [vmem:[#allocation0 + $0x20] sm:$0xf] }
  0x34   :  { %330 = vst [vmem:[#allocation0 + $0x32] sm:$0x1] %v328_v60   ;;  %332 = vst [vmem:[#allocation0 + $0x71] sm:$0x2] %v328_v60   ;;  %v387_v1 = vld [vmem:[#allocation0 + $0x28] sm:$0xf] }
  0x35   :  { %336 = vst [vmem:[#allocation0 + $0x3a] sm:$0x1] %v334_v61   ;;  %338 = vst [vmem:[#allocation0 + $0x79] sm:$0x2] %v334_v61   ;;  %v436_v2 = vld [vmem:[#allocation0 + $0x60] sm:$0xf] }
  0x36   :  { %342 = vst [vmem:[#allocation0 + $0x33] sm:$0x1] %v340_v62   ;;  %344 = vst [vmem:[#allocation0 + $0x72] sm:$0x2] %v340_v62   ;;  %v443_v3 = vld [vmem:[#allocation0 + $0x68] sm:$0xf] }
  0x37   :  { %348 = vst [vmem:[#allocation0 + $0x3b] sm:$0x1] %v346_v63   ;;  %350 = vst [vmem:[#allocation0 + $0x7a] sm:$0x2] %v346_v63   ;;  %v366_v4 = vld [vmem:[#allocation0 + $0x10] sm:$0xf] }
  0x38   :  { %541 = vst [vmem:[%s708_s1 + $0x10] sm:$0xf] %v380_v0  ;;  %542 = vst [vmem:[%s708_s1 + $0x14] sm:$0xf] %v387_v1  ;;  %v373_v5 = vld [vmem:[#allocation0 + $0x18] sm:$0xf] }
  0x39   :  { %v422_v6 = vld [vmem:[#allocation0 + $0x50] sm:$0xf]  ;;  %549 = vst [vmem:[%s708_s1 + $0x30] sm:$0xf] %v436_v2  ;;  %550 = vst [vmem:[%s708_s1 + $0x34] sm:$0xf] %v443_v3 }
  0x3a   :  { %539 = vst [vmem:[%s708_s1 + $0x8] sm:$0xf] %v366_v4  ;;  %540 = vst [vmem:[%s708_s1 + $0xc] sm:$0xf] %v373_v5  ;;  %v429_v7 = vld [vmem:[#allocation0 + $0x58] sm:$0xf] }
  0x3b   :  { %547 = vst [vmem:[%s708_s1 + $0x28] sm:$0xf] %v422_v6  ;;  %548 = vst [vmem:[%s708_s1 + $0x2c] sm:$0xf] %v429_v7  ;;  %v355_v8 = vld [vmem:[#allocation0] sm:$0xf] }
  0x3c   :  { %v360_v9 = vld [vmem:[#allocation0 + $0x8] sm:$0xf]  ;;  %v408_v10 = vld [vmem:[#allocation0 + $0x40] sm:$0xf]  ;;  %358 = vst [vmem:[%s708_s1] sm:$0xf] %v355_v8 }
  0x3d   :  { %538 = vst [vmem:[%s708_s1 + $0x4] sm:$0xf] %v360_v9  ;;  %545 = vst [vmem:[%s708_s1 + $0x20] sm:$0xf] %v408_v10  ;;  %v415_v11 = vld [vmem:[#allocation0 + $0x48] sm:$0xf] }
  0x3e   :  { %v394_v12 = vld [vmem:[#allocation0 + $0x30] sm:$0xf]  ;;  %546 = vst [vmem:[%s708_s1 + $0x24] sm:$0xf] %v415_v11  ;;  %v401_v14 = vld [vmem:[#allocation0 + $0x38] sm:$0xf] }
  0x3f   :  { %v450_v13 = vld [vmem:[#allocation0 + $0x70] sm:$0xf]  ;;  %543 = vst [vmem:[%s708_s1 + $0x18] sm:$0xf] %v394_v12  ;;  %v457_v15 = vld [vmem:[#allocation0 + $0x78] sm:$0xf] }
  0x40   :  { %551 = vst [vmem:[%s708_s1 + $0x38] sm:$0xf] %v450_v13  ;;  %544 = vst [vmem:[%s708_s1 + $0x1c] sm:$0xf] %v401_v14 }
  0x41   :  { %552 = vst [vmem:[%s708_s1 + $0x3c] sm:$0xf] %v457_v15 }

// kernel: generator_forward.4
= control target key start
LH: loop header
LB: loop body
LE: loop exit
PB: predicated region body
PF: predicated region fallthrough
CT: control target
= control target key end

     0   :  { %v1807_v3 = vmov 0   ;;  %vm781_vm0 = vcmask 523264   ;;  %s2303_s1 = inlined_call_operand.vmem [shape: bf16[1,64,4096], index: 1, kind: input, shape index: {}]   ;;  %s2304_s0 = inlined_call_operand.vmem [shape: bf16[1,2,64], index: 0, kind: input, shape index: {}]   ;;  %s2305_s2 = inlined_call_operand.vmem [shape: f32[1,2,4096], index: 2, kind: output, shape index: {}]  }
   0x1   :  { %v109_v0 = vld [vmem:[%s2303_s1 + $0x300] sm:$0xff]  ;;  %v110_v2 = vld [vmem:[%s2303_s1 + $0x308] sm:$0xff]  ;;  %817 = vmatprep.mubr.bf16.mxu0 %v1807_v3  ;;  %858 = vmatprep.mubr.bf16.mxu1 %v1807_v3  ;;  %v111_v31 = vld [vmem:[%s2303_s1 + $0x310] sm:$0xff] }
   0x2   :  { %v125_v1 = vld [vmem:[%s2303_s1 + $0x380] sm:$0xff]  ;;  %v126_v5 = vld [vmem:[%s2303_s1 + $0x388] sm:$0xff]  ;;  %v127_v32 = vld [vmem:[%s2303_s1 + $0x390] sm:$0xff] }
   0x3   :  { %v1758_v4 = vcombine.high %v109_v0, %v125_v1  ;;  %v1757_v6 = vcombine.low %v109_v0, %v125_v1  ;;  %v77_v7 = vld [vmem:[%s2303_s1 + $0x200] sm:$0xff]  ;;  %v1760_v9 = vcombine.high %v110_v2, %v126_v5  ;;  %v1759_v10 = vcombine.low %v110_v2, %v126_v5  ;;  %v78_v12 = vld [vmem:[%s2303_s1 + $0x208] sm:$0xff]  ;;  %v112_v33 = vld [vmem:[%s2303_s1 + $0x318] sm:$0xff] }
   0x4   :  { %v93_v8 = vld [vmem:[%s2303_s1 + $0x280] sm:$0xff]  ;;  %v94_v13 = vld [vmem:[%s2303_s1 + $0x288] sm:$0xff]  ;;  %v128_v34 = vld [vmem:[%s2303_s1 + $0x398] sm:$0xff]  ;;  %v1762_v37 = vcombine.high %v111_v31, %v127_v32  ;;  %v1761_v44 = vcombine.low %v111_v31, %v127_v32 }
   0x5   :  { %v1726_v11 = vcombine.high %v77_v7, %v93_v8  ;;  %v45_v14 = vld [vmem:[%s2303_s1 + $0x100] sm:$0xff]  ;;  %793 = vmatprep.subr.bf16.mxu0 %v1758_v4  ;;  %v1728_v15 = vcombine.high %v78_v12, %v94_v13  ;;  %v46_v17 = vld [vmem:[%s2303_s1 + $0x108] sm:$0xff]  ;;  %834 = vmatprep.subr.bf16.mxu1 %v1760_v9  ;;  %v1725_v19 = vcombine.low %v77_v7, %v93_v8  ;;  %v79_v39 = vld [vmem:[%s2303_s1 + $0x210] sm:$0xff] }
   0x6   :  { %v61_v16 = vld [vmem:[%s2303_s1 + $0x180] sm:$0xff]  ;;  %v62_v18 = vld [vmem:[%s2303_s1 + $0x188] sm:$0xff]  ;;  %794 = vmatpush1.bf16.msra.mxu0 %v1757_v6  ;;  %835 = vmatpush1.bf16.msra.mxu1 %v1759_v10  ;;  %v1727_v20 = vcombine.low %v78_v12, %v94_v13  ;;  %v1764_v38 = vcombine.high %v112_v33, %v128_v34  ;;  %v95_v40 = vld [vmem:[%s2303_s1 + $0x290] sm:$0xff]  ;;  %v1763_v45 = vcombine.low %v112_v33, %v128_v34 }
   0x7   :  { %795 = vmatprep.subr.bf16.mxu0 %v1726_v11  ;;  %v1694_v21 = vcombine.high %v45_v14, %v61_v16  ;;  %836 = vmatprep.subr.bf16.mxu1 %v1728_v15  ;;  %v1696_v22 = vcombine.high %v46_v17, %v62_v18  ;;  %v13_v23 = vld [vmem:[%s2303_s1] sm:$0xff]  ;;  %v14_v25 = vld [vmem:[%s2303_s1 + $0x8] sm:$0xff]  ;;  %v1693_v27 = vcombine.low %v45_v14, %v61_v16  ;;  %v80_v41 = vld [vmem:[%s2303_s1 + $0x218] sm:$0xff] }
   0x8   :  { %v29_v24 = vld [vmem:[%s2303_s1 + $0x80] sm:$0xff]  ;;  %v30_v26 = vld [vmem:[%s2303_s1 + $0x88] sm:$0xff]  ;;  %v1695_v28 = vcombine.low %v46_v17, %v62_v18  ;;  %v96_v42 = vld [vmem:[%s2303_s1 + $0x298] sm:$0xff]  ;;  %v1730_v46 = vcombine.high %v79_v39, %v95_v40  ;;  %v1729_v52 = vcombine.low %v79_v39, %v95_v40 }
   0x9   :  { %v1662_v29 = vcombine.high %v13_v23, %v29_v24  ;;  %v1664_v30 = vcombine.high %v14_v25, %v30_v26  ;;  %v1661_v35 = vcombine.low %v13_v23, %v29_v24  ;;  %v1663_v36 = vcombine.low %v14_v25, %v30_v26  ;;  %v1901_v43 = vld [vmem:[%s2304_s0] sm:$0x1]  ;;  %v47_v48 = vld [vmem:[%s2303_s1 + $0x110] sm:$0xff]  ;;  %v48_v50 = vld [vmem:[%s2303_s1 + $0x118] sm:$0xff] }
   0xa   :  { %796 = vmatpush1.bf16.msra.mxu0 %v1725_v19  ;;  %837 = vmatpush1.bf16.msra.mxu1 %v1727_v20  ;;  %v1732_v47 = vcombine.high %v80_v41, %v96_v42  ;;  %v63_v49 = vld [vmem:[%s2303_s1 + $0x190] sm:$0xff]  ;;  %v64_v51 = vld [vmem:[%s2303_s1 + $0x198] sm:$0xff]  ;;  %v1731_v53 = vcombine.low %v80_v41, %v96_v42  ;;  %v113_v0 = vld [vmem:[%s2303_s1 + $0x320] sm:$0xff] }
   0xb   :  { %797 = vmatprep.subr.bf16.mxu0 %v1694_v21  ;;  %838 = vmatprep.subr.bf16.mxu1 %v1696_v22  ;;  %v1698_v54 = vcombine.high %v47_v48, %v63_v49  ;;  %v1700_v55 = vcombine.high %v48_v50, %v64_v51  ;;  %v15_v56 = vld [vmem:[%s2303_s1 + $0x10] sm:$0xff]  ;;  %v16_v58 = vld [vmem:[%s2303_s1 + $0x18] sm:$0xff]  ;;  %v1697_v60 = vcombine.low %v47_v48, %v63_v49  ;;  %v129_v1 = vld [vmem:[%s2303_s1 + $0x3a0] sm:$0xff] }
   0xc   :  { %v31_v57 = vld [vmem:[%s2303_s1 + $0x90] sm:$0xff]  ;;  %v32_v59 = vld [vmem:[%s2303_s1 + $0x98] sm:$0xff]  ;;  %v1699_v61 = vcombine.low %v48_v50, %v64_v51  ;;  %v114_v2 = vld [vmem:[%s2303_s1 + $0x328] sm:$0xff]  ;;  %v1766_v7 = vcombine.high %v113_v0, %v129_v1  ;;  %v1765_v13 = vcombine.low %v113_v0, %v129_v1 }
   0xd   :  { %v1666_v62 = vcombine.high %v15_v56, %v31_v57  ;;  %v1668_v63 = vcombine.high %v16_v58, %v32_v59  ;;  %v130_v4 = vld [vmem:[%s2303_s1 + $0x3a8] sm:$0xff]  ;;  %v1665_v5 = vcombine.low %v15_v56, %v31_v57  ;;  %v1667_v6 = vcombine.low %v16_v58, %v32_v59  ;;  %v81_v9 = vld [vmem:[%s2303_s1 + $0x220] sm:$0xff]  ;;  %v115_v33 = vld [vmem:[%s2303_s1 + $0x330] sm:$0xff] }
   0xe   :  { %798 = vmatpush1.bf16.msra.mxu0 %v1693_v27  ;;  %839 = vmatpush1.bf16.msra.mxu1 %v1695_v28  ;;  %v1768_v8 = vcombine.high %v114_v2, %v130_v4  ;;  %v97_v10 = vld [vmem:[%s2303_s1 + $0x2a0] sm:$0xff]  ;;  %v82_v11 = vld [vmem:[%s2303_s1 + $0x228] sm:$0xff]  ;;  %v1767_v14 = vcombine.low %v114_v2, %v130_v4  ;;  %v131_v34 = vld [vmem:[%s2303_s1 + $0x3b0] sm:$0xff] }
   0xf   :  { %799 = vmatprep.subr.bf16.mxu0 %v1662_v29  ;;  %840 = vmatprep.subr.bf16.mxu1 %v1664_v30  ;;  %v98_v12 = vld [vmem:[%s2303_s1 + $0x2a8] sm:$0xff]  ;;  %v1734_v15 = vcombine.high %v81_v9, %v97_v10  ;;  %v49_v17 = vld [vmem:[%s2303_s1 + $0x120] sm:$0xff]  ;;  %v1733_v21 = vcombine.low %v81_v9, %v97_v10  ;;  %v1770_v39 = vcombine.high %v115_v33, %v131_v34  ;;  %v83_v41 = vld [vmem:[%s2303_s1 + $0x230] sm:$0xff] }
  0x10   :  { %v1736_v16 = vcombine.high %v82_v11, %v98_v12  ;;  %v65_v18 = vld [vmem:[%s2303_s1 + $0x1a0] sm:$0xff]  ;;  %v50_v19 = vld [vmem:[%s2303_s1 + $0x128] sm:$0xff]  ;;  %v1735_v22 = vcombine.low %v82_v11, %v98_v12  ;;  %v99_v42 = vld [vmem:[%s2303_s1 + $0x2b0] sm:$0xff] }
  0x11   :  { %v66_v20 = vld [vmem:[%s2303_s1 + $0x1a8] sm:$0xff]  ;;  %v1702_v23 = vcombine.high %v49_v17, %v65_v18  ;;  %v17_v25 = vld [vmem:[%s2303_s1 + $0x20] sm:$0xff]  ;;  %v1701_v29 = vcombine.low %v49_v17, %v65_v18  ;;  %v1738_v48 = vcombine.high %v83_v41, %v99_v42  ;;  %v51_v50 = vld [vmem:[%s2303_s1 + $0x130] sm:$0xff] }
  0x12   :  { %800 = vmatpush1.bf16.msra.mxu0 %v1661_v35  ;;  %841 = vmatpush1.bf16.msra.mxu1 %v1663_v36  ;;  %v1704_v24 = vcombine.high %v50_v19, %v66_v20  ;;  %v33_v26 = vld [vmem:[%s2303_s1 + $0xa0] sm:$0xff]  ;;  %v18_v27 = vld [vmem:[%s2303_s1 + $0x28] sm:$0xff]  ;;  %v1703_v30 = vcombine.low %v50_v19, %v66_v20  ;;  %v116_v35 = vld [vmem:[%s2303_s1 + $0x338] sm:$0xff] }
  0x13   :  { %875 = vmatprep.subr.bf16.mxu0 %v1762_v37  ;;  %916 = vmatprep.subr.bf16.mxu1 %v1764_v38  ;;  %v34_v28 = vld [vmem:[%s2303_s1 + $0xa8] sm:$0xff]  ;;  %v1670_v31 = vcombine.high %v17_v25, %v33_v26  ;;  %v132_v36 = vld [vmem:[%s2303_s1 + $0x3b8] sm:$0xff]  ;;  %v1669_v37 = vcombine.low %v17_v25, %v33_v26  ;;  %v67_v51 = vld [vmem:[%s2303_s1 + $0x1b0] sm:$0xff] }
  0x14   :  { %v1672_v32 = vcombine.high %v18_v27, %v34_v28  ;;  %v1671_v38 = vcombine.low %v18_v27, %v34_v28  ;;  %v1772_v40 = vcombine.high %v116_v35, %v132_v36  ;;  %v1706_v56 = vcombine.high %v51_v50, %v67_v51  ;;  %v19_v58 = vld [vmem:[%s2303_s1 + $0x30] sm:$0xff]  ;;  %v117_v2 = vld [vmem:[%s2303_s1 + $0x340] sm:$0xff] }
  0x15   :  { %1789 = vmatmul.mubr.msk.bf16.vlgmr.msra.gmra.mxu0 %vm781_vm0, %v1901_v43  ;;  %1790 = vmatmul.mubr.msk.bf16.vlgmr.msra.gmra.mxu1 %vm781_vm0, %v1901_v43  ;;  %v35_v59 = vld [vmem:[%s2303_s1 + $0xb0] sm:$0xff]  ;;  %v133_v4 = vld [vmem:[%s2303_s1 + $0x3c0] sm:$0xff] }
  0x16   :  { %876 = vmatpush1.bf16.msra.mxu0 %v1761_v44  ;;  %917 = vmatpush1.bf16.msra.mxu1 %v1763_v45  ;;  %v84_v44 = vld [vmem:[%s2303_s1 + $0x238] sm:$0xff]  ;;  %v1674_v0 = vcombine.high %v19_v58, %v35_v59  ;;  %v1774_v9 = vcombine.high %v117_v2, %v133_v4  ;;  %v85_v11 = vld [vmem:[%s2303_s1 + $0x240] sm:$0xff] }
  0x17   :  { %877 = vmatprep.subr.bf16.mxu0 %v1730_v46  ;;  %918 = vmatprep.subr.bf16.mxu1 %v1732_v47  ;;  %v100_v45 = vld [vmem:[%s2303_s1 + $0x2b8] sm:$0xff]  ;;  %v1769_v46 = vcombine.low %v115_v33, %v131_v34  ;;  %v1771_v47 = vcombine.low %v116_v35, %v132_v36  ;;  %v101_v12 = vld [vmem:[%s2303_s1 + $0x2c0] sm:$0xff]  ;;  %v119_v35 = vld [vmem:[%s2303_s1 + $0x350] sm:$0xff] }
  0x18   :  { %899 = vmatprep.mubr.bf16.mxu0 %v1807_v3  ;;  %940 = vmatprep.mubr.bf16.mxu1 %v1807_v3  ;;  %v1740_v49 = vcombine.high %v84_v44, %v100_v45  ;;  %v1742_v17 = vcombine.high %v85_v11, %v101_v12  ;;  %v53_v19 = vld [vmem:[%s2303_s1 + $0x140] sm:$0xff]  ;;  %v135_v36 = vld [vmem:[%s2303_s1 + $0x3d0] sm:$0xff] }
  0x19   :  { %v69_v20 = vld [vmem:[%s2303_s1 + $0x1c0] sm:$0xff] }
  0x1a   :  { %878 = vmatpush1.bf16.msra.mxu0 %v1729_v52  ;;  %919 = vmatpush1.bf16.msra.mxu1 %v1731_v53  ;;  %v52_v52 = vld [vmem:[%s2303_s1 + $0x138] sm:$0xff]  ;;  %v1710_v25 = vcombine.high %v53_v19, %v69_v20  ;;  %v21_v27 = vld [vmem:[%s2303_s1 + $0x40] sm:$0xff] }
  0x1b   :  { %879 = vmatprep.subr.bf16.mxu0 %v1698_v54  ;;  %920 = vmatprep.subr.bf16.mxu1 %v1700_v55  ;;  %v68_v53 = vld [vmem:[%s2303_s1 + $0x1b8] sm:$0xff]  ;;  %v1737_v54 = vcombine.low %v83_v41, %v99_v42  ;;  %v1739_v55 = vcombine.low %v84_v44, %v100_v45  ;;  %v37_v28 = vld [vmem:[%s2303_s1 + $0xc0] sm:$0xff]  ;;  %v1778_v41 = vcombine.high %v119_v35, %v135_v36  ;;  %v87_v44 = vld [vmem:[%s2303_s1 + $0x250] sm:$0xff] }
  0x1c   :  { %v1708_v57 = vcombine.high %v52_v52, %v68_v53  ;;  %v1678_v33 = vcombine.high %v21_v27, %v37_v28  ;;  %v103_v45 = vld [vmem:[%s2303_s1 + $0x2d0] sm:$0xff] }
  0x1e   :  { %880 = vmatpush1.bf16.msra.mxu0 %v1697_v60  ;;  %921 = vmatpush1.bf16.msra.mxu1 %v1699_v61  ;;  %v20_v60 = vld [vmem:[%s2303_s1 + $0x38] sm:$0xff] }
  0x1f   :  { %881 = vmatprep.subr.bf16.mxu0 %v1666_v62  ;;  %922 = vmatprep.subr.bf16.mxu1 %v1668_v63  ;;  %v36_v61 = vld [vmem:[%s2303_s1 + $0xb8] sm:$0xff]  ;;  %v1705_v62 = vcombine.low %v51_v50, %v67_v51  ;;  %v1707_v63 = vcombine.low %v52_v52, %v68_v53  ;;  %v1746_v50 = vcombine.high %v87_v44, %v103_v45  ;;  %v55_v52 = vld [vmem:[%s2303_s1 + $0x150] sm:$0xff] }
  0x20   :  { %v1676_v1 = vcombine.high %v20_v60, %v36_v61  ;;  %v71_v53 = vld [vmem:[%s2303_s1 + $0x1d0] sm:$0xff] }
  0x22   :  { %882 = vmatpush1.bf16.msra.mxu0 %v1665_v5  ;;  %923 = vmatpush1.bf16.msra.mxu1 %v1667_v6  ;;  %v118_v5 = vld [vmem:[%s2303_s1 + $0x348] sm:$0xff] }
  0x23   :  { %957 = vmatprep.subr.bf16.mxu0 %v1766_v7  ;;  %998 = vmatprep.subr.bf16.mxu1 %v1768_v8  ;;  %v134_v6 = vld [vmem:[%s2303_s1 + $0x3c8] sm:$0xff]  ;;  %v1673_v7 = vcombine.low %v19_v58, %v35_v59  ;;  %v1675_v8 = vcombine.low %v20_v60, %v36_v61  ;;  %v1714_v58 = vcombine.high %v55_v52, %v71_v53  ;;  %v23_v60 = vld [vmem:[%s2303_s1 + $0x50] sm:$0xff] }
  0x24   :  { %v1776_v10 = vcombine.high %v118_v5, %v134_v6  ;;  %v39_v61 = vld [vmem:[%s2303_s1 + $0xd0] sm:$0xff] }
  0x25   :  { %1791 = vmatmul.mubr.msk.bf16.vlgmr.msra.gmra.mxu0 %vm781_vm0, %v1901_v43  ;;  %1792 = vmatmul.mubr.msk.bf16.vlgmr.msra.gmra.mxu1 %vm781_vm0, %v1901_v43 }
  0x26   :  { %958 = vmatpush1.bf16.msra.mxu0 %v1765_v13  ;;  %999 = vmatpush1.bf16.msra.mxu1 %v1767_v14  ;;  %v86_v13 = vld [vmem:[%s2303_s1 + $0x248] sm:$0xff] }
  0x27   :  { %959 = vmatprep.subr.bf16.mxu0 %v1734_v15  ;;  %1000 = vmatprep.subr.bf16.mxu1 %v1736_v16  ;;  %v102_v14 = vld [vmem:[%s2303_s1 + $0x2c8] sm:$0xff]  ;;  %v1773_v15 = vcombine.low %v117_v2, %v133_v4  ;;  %v1775_v16 = vcombine.low %v118_v5, %v134_v6  ;;  %v1682_v2 = vcombine.high %v23_v60, %v39_v61  ;;  %v121_v5 = vld [vmem:[%s2303_s1 + $0x360] sm:$0xff] }
  0x28   :  { %981 = vmatprep.mubr.bf16.mxu0 %v1807_v3  ;;  %1022 = vmatprep.mubr.bf16.mxu1 %v1807_v3  ;;  %v1744_v18 = vcombine.high %v86_v13, %v102_v14  ;;  %v137_v6 = vld [vmem:[%s2303_s1 + $0x3e0] sm:$0xff] }
  0x2a   :  { %960 = vmatpush1.bf16.msra.mxu0 %v1733_v21  ;;  %1001 = vmatpush1.bf16.msra.mxu1 %v1735_v22  ;;  %v54_v21 = vld [vmem:[%s2303_s1 + $0x148] sm:$0xff] }
  0x2b   :  { %961 = vmatprep.subr.bf16.mxu0 %v1702_v23  ;;  %1002 = vmatprep.subr.bf16.mxu1 %v1704_v24  ;;  %v70_v22 = vld [vmem:[%s2303_s1 + $0x1c8] sm:$0xff]  ;;  %v1741_v23 = vcombine.low %v85_v11, %v101_v12  ;;  %v1743_v24 = vcombine.low %v86_v13, %v102_v14  ;;  %v1782_v11 = vcombine.high %v121_v5, %v137_v6  ;;  %v89_v13 = vld [vmem:[%s2303_s1 + $0x260] sm:$0xff] }
  0x2c   :  { %v1712_v26 = vcombine.high %v54_v21, %v70_v22  ;;  %v105_v14 = vld [vmem:[%s2303_s1 + $0x2e0] sm:$0xff] }
  0x2e   :  { %962 = vmatpush1.bf16.msra.mxu0 %v1701_v29  ;;  %1003 = vmatpush1.bf16.msra.mxu1 %v1703_v30  ;;  %v22_v29 = vld [vmem:[%s2303_s1 + $0x48] sm:$0xff] }
  0x2f   :  { %963 = vmatprep.subr.bf16.mxu0 %v1670_v31  ;;  %1004 = vmatprep.subr.bf16.mxu1 %v1672_v32  ;;  %v38_v30 = vld [vmem:[%s2303_s1 + $0xc8] sm:$0xff]  ;;  %v1709_v31 = vcombine.low %v53_v19, %v69_v20  ;;  %v1711_v32 = vcombine.low %v54_v21, %v70_v22  ;;  %v1750_v19 = vcombine.high %v89_v13, %v105_v14  ;;  %v57_v21 = vld [vmem:[%s2303_s1 + $0x160] sm:$0xff] }
  0x30   :  { %v1680_v34 = vcombine.high %v22_v29, %v38_v30  ;;  %v73_v22 = vld [vmem:[%s2303_s1 + $0x1e0] sm:$0xff] }
  0x32   :  { %964 = vmatpush1.bf16.msra.mxu0 %v1669_v37  ;;  %1005 = vmatpush1.bf16.msra.mxu1 %v1671_v38  ;;  %v120_v37 = vld [vmem:[%s2303_s1 + $0x358] sm:$0xff] }
  0x33   :  { %1039 = vmatprep.subr.bf16.mxu0 %v1770_v39  ;;  %1080 = vmatprep.subr.bf16.mxu1 %v1772_v40  ;;  %v136_v38 = vld [vmem:[%s2303_s1 + $0x3d8] sm:$0xff]  ;;  %v1677_v39 = vcombine.low %v21_v27, %v37_v28  ;;  %v1679_v40 = vcombine.low %v22_v29, %v38_v30  ;;  %v1718_v27 = vcombine.high %v57_v21, %v73_v22  ;;  %v25_v29 = vld [vmem:[%s2303_s1 + $0x60] sm:$0xff] }
  0x34   :  { %v1780_v42 = vcombine.high %v120_v37, %v136_v38  ;;  %v41_v30 = vld [vmem:[%s2303_s1 + $0xe0] sm:$0xff] }
  0x35   :  { %1793 = vmatmul.mubr.msk.bf16.vlgmr.msra.gmra.mxu0 %vm781_vm0, %v1901_v43  ;;  %1794 = vmatmul.mubr.msk.bf16.vlgmr.msra.gmra.mxu1 %vm781_vm0, %v1901_v43 }
  0x36   :  { %1040 = vmatpush1.bf16.msra.mxu0 %v1769_v46  ;;  %1081 = vmatpush1.bf16.msra.mxu1 %v1771_v47  ;;  %v88_v46 = vld [vmem:[%s2303_s1 + $0x258] sm:$0xff] }
  0x37   :  { %1041 = vmatprep.subr.bf16.mxu0 %v1738_v48  ;;  %1082 = vmatprep.subr.bf16.mxu1 %v1740_v49  ;;  %v104_v47 = vld [vmem:[%s2303_s1 + $0x2d8] sm:$0xff]  ;;  %v1777_v48 = vcombine.low %v119_v35, %v135_v36  ;;  %v1779_v49 = vcombine.low %v120_v37, %v136_v38  ;;  %v1686_v35 = vcombine.high %v25_v29, %v41_v30  ;;  %v123_v37 = vld [vmem:[%s2303_s1 + $0x370] sm:$0xff] }
  0x38   :  { %1063 = vmatprep.mubr.bf16.mxu0 %v1807_v3  ;;  %1104 = vmatprep.mubr.bf16.mxu1 %v1807_v3  ;;  %v1748_v51 = vcombine.high %v88_v46, %v104_v47  ;;  %v139_v38 = vld [vmem:[%s2303_s1 + $0x3f0] sm:$0xff] }
  0x3a   :  { %1042 = vmatpush1.bf16.msra.mxu0 %v1737_v54  ;;  %1083 = vmatpush1.bf16.msra.mxu1 %v1739_v55  ;;  %v56_v54 = vld [vmem:[%s2303_s1 + $0x158] sm:$0xff] }
  0x3b   :  { %1043 = vmatprep.subr.bf16.mxu0 %v1706_v56  ;;  %1084 = vmatprep.subr.bf16.mxu1 %v1708_v57  ;;  %v72_v55 = vld [vmem:[%s2303_s1 + $0x1d8] sm:$0xff]  ;;  %v1745_v56 = vcombine.low %v87_v44, %v103_v45  ;;  %v1747_v57 = vcombine.low %v88_v46, %v104_v47  ;;  %v1786_v44 = vcombine.high %v123_v37, %v139_v38  ;;  %v91_v46 = vld [vmem:[%s2303_s1 + $0x270] sm:$0xff] }
  0x3c   :  { %v1716_v59 = vcombine.high %v56_v54, %v72_v55  ;;  %v107_v47 = vld [vmem:[%s2303_s1 + $0x2f0] sm:$0xff] }
  0x3e   :  { %1044 = vmatpush1.bf16.msra.mxu0 %v1705_v62  ;;  %1085 = vmatpush1.bf16.msra.mxu1 %v1707_v63  ;;  %v24_v62 = vld [vmem:[%s2303_s1 + $0x58] sm:$0xff] }
  0x3f   :  { %1045 = vmatprep.subr.bf16.mxu0 %v1674_v0  ;;  %1086 = vmatprep.subr.bf16.mxu1 %v1676_v1  ;;  %v40_v63 = vld [vmem:[%s2303_s1 + $0xd8] sm:$0xff]  ;;  %v1713_v0 = vcombine.low %v55_v52, %v71_v53  ;;  %v1715_v1 = vcombine.low %v56_v54, %v72_v55  ;;  %v1754_v52 = vcombine.high %v91_v46, %v107_v47  ;;  %v59_v54 = vld [vmem:[%s2303_s1 + $0x170] sm:$0xff] }
  0x40   :  { %v1684_v4 = vcombine.high %v24_v62, %v40_v63  ;;  %v75_v55 = vld [vmem:[%s2303_s1 + $0x1f0] sm:$0xff] }
  0x42   :  { %1046 = vmatpush1.bf16.msra.mxu0 %v1673_v7  ;;  %1087 = vmatpush1.bf16.msra.mxu1 %v1675_v8  ;;  %v122_v7 = vld [vmem:[%s2303_s1 + $0x368] sm:$0xff] }
  0x43   :  { %1121 = vmatprep.subr.bf16.mxu0 %v1774_v9  ;;  %1162 = vmatprep.subr.bf16.mxu1 %v1776_v10  ;;  %v138_v8 = vld [vmem:[%s2303_s1 + $0x3e8] sm:$0xff]  ;;  %v1681_v9 = vcombine.low %v23_v60, %v39_v61  ;;  %v1683_v10 = vcombine.low %v24_v62, %v40_v63  ;;  %v1722_v60 = vcombine.high %v59_v54, %v75_v55  ;;  %v27_v62 = vld [vmem:[%s2303_s1 + $0x70] sm:$0xff] }
  0x44   :  { %v1784_v12 = vcombine.high %v122_v7, %v138_v8  ;;  %v43_v63 = vld [vmem:[%s2303_s1 + $0xf0] sm:$0xff] }
  0x45   :  { %1795 = vmatmul.mubr.msk.bf16.vlgmr.msra.gmra.mxu0 %vm781_vm0, %v1901_v43  ;;  %1796 = vmatmul.mubr.msk.bf16.vlgmr.msra.gmra.mxu1 %vm781_vm0, %v1901_v43 }
  0x46   :  { %1122 = vmatpush1.bf16.msra.mxu0 %v1773_v15  ;;  %1163 = vmatpush1.bf16.msra.mxu1 %v1775_v16  ;;  %v90_v15 = vld [vmem:[%s2303_s1 + $0x268] sm:$0xff] }
  0x47   :  { %1123 = vmatprep.subr.bf16.mxu0 %v1742_v17  ;;  %1164 = vmatprep.subr.bf16.mxu1 %v1744_v18  ;;  %v106_v16 = vld [vmem:[%s2303_s1 + $0x2e8] sm:$0xff]  ;;  %v1781_v17 = vcombine.low %v121_v5, %v137_v6  ;;  %v1783_v18 = vcombine.low %v122_v7, %v138_v8  ;;  %v1690_v5 = vcombine.high %v27_v62, %v43_v63 }
  0x48   :  { %1145 = vmatprep.mubr.bf16.mxu0 %v1807_v3  ;;  %1186 = vmatprep.mubr.bf16.mxu1 %v1807_v3  ;;  %v1752_v20 = vcombine.high %v90_v15, %v106_v16  ;;  %v1689_v7 = vcombine.low %v27_v62, %v43_v63 }
  0x4a   :  { %1124 = vmatpush1.bf16.msra.mxu0 %v1741_v23  ;;  %1165 = vmatpush1.bf16.msra.mxu1 %v1743_v24  ;;  %v58_v23 = vld [vmem:[%s2303_s1 + $0x168] sm:$0xff] }
  0x4b   :  { %1125 = vmatprep.subr.bf16.mxu0 %v1710_v25  ;;  %1166 = vmatprep.subr.bf16.mxu1 %v1712_v26  ;;  %v74_v24 = vld [vmem:[%s2303_s1 + $0x1e8] sm:$0xff]  ;;  %v1749_v25 = vcombine.low %v89_v13, %v105_v14  ;;  %v1751_v26 = vcombine.low %v90_v15, %v106_v16 }
  0x4c   :  { %v1720_v28 = vcombine.high %v58_v23, %v74_v24 }
  0x4e   :  { %1126 = vmatpush1.bf16.msra.mxu0 %v1709_v31  ;;  %1167 = vmatpush1.bf16.msra.mxu1 %v1711_v32  ;;  %v26_v31 = vld [vmem:[%s2303_s1 + $0x68] sm:$0xff] }
  0x4f   :  { %1127 = vmatprep.subr.bf16.mxu0 %v1678_v33  ;;  %1168 = vmatprep.subr.bf16.mxu1 %v1680_v34  ;;  %v42_v32 = vld [vmem:[%s2303_s1 + $0xe8] sm:$0xff]  ;;  %v1717_v33 = vcombine.low %v57_v21, %v73_v22  ;;  %v1719_v34 = vcombine.low %v58_v23, %v74_v24 }
  0x50   :  { %v1688_v36 = vcombine.high %v26_v31, %v42_v32 }
  0x52   :  { %1128 = vmatpush1.bf16.msra.mxu0 %v1677_v39  ;;  %1169 = vmatpush1.bf16.msra.mxu1 %v1679_v40  ;;  %v124_v39 = vld [vmem:[%s2303_s1 + $0x378] sm:$0xff] }
  0x53   :  { %1203 = vmatprep.subr.bf16.mxu0 %v1778_v41  ;;  %1244 = vmatprep.subr.bf16.mxu1 %v1780_v42  ;;  %v140_v40 = vld [vmem:[%s2303_s1 + $0x3f8] sm:$0xff]  ;;  %v1685_v41 = vcombine.low %v25_v29, %v41_v30  ;;  %v1687_v42 = vcombine.low %v26_v31, %v42_v32 }
  0x54   :  { %v1788_v45 = vcombine.high %v124_v39, %v140_v40 }
  0x55   :  { %1797 = vmatmul.mubr.msk.bf16.vlgmr.msra.gmra.mxu0 %vm781_vm0, %v1901_v43  ;;  %1798 = vmatmul.mubr.msk.bf16.vlgmr.msra.gmra.mxu1 %vm781_vm0, %v1901_v43 }
  0x56   :  { %1204 = vmatpush1.bf16.msra.mxu0 %v1777_v48  ;;  %1245 = vmatpush1.bf16.msra.mxu1 %v1779_v49  ;;  %v92_v48 = vld [vmem:[%s2303_s1 + $0x278] sm:$0xff] }
  0x57   :  { %1205 = vmatprep.subr.bf16.mxu0 %v1746_v50  ;;  %1246 = vmatprep.subr.bf16.mxu1 %v1748_v51  ;;  %v108_v49 = vld [vmem:[%s2303_s1 + $0x2f8] sm:$0xff]  ;;  %v1785_v50 = vcombine.low %v123_v37, %v139_v38  ;;  %v1787_v51 = vcombine.low %v124_v39, %v140_v40 }
  0x58   :  { %1227 = vmatprep.mubr.bf16.mxu0 %v1807_v3  ;;  %1268 = vmatprep.mubr.bf16.mxu1 %v1807_v3  ;;  %v1756_v53 = vcombine.high %v92_v48, %v108_v49 }
  0x5a   :  { %1206 = vmatpush1.bf16.msra.mxu0 %v1745_v56  ;;  %1247 = vmatpush1.bf16.msra.mxu1 %v1747_v57  ;;  %v60_v56 = vld [vmem:[%s2303_s1 + $0x178] sm:$0xff] }
  0x5b   :  { %1207 = vmatprep.subr.bf16.mxu0 %v1714_v58  ;;  %1248 = vmatprep.subr.bf16.mxu1 %v1716_v59  ;;  %v76_v57 = vld [vmem:[%s2303_s1 + $0x1f8] sm:$0xff]  ;;  %v1753_v58 = vcombine.low %v91_v46, %v107_v47  ;;  %v1755_v59 = vcombine.low %v92_v48, %v108_v49 }
  0x5c   :  { %v1724_v61 = vcombine.high %v60_v56, %v76_v57 }
  0x5e   :  { %1208 = vmatpush1.bf16.msra.mxu0 %v1713_v0  ;;  %1249 = vmatpush1.bf16.msra.mxu1 %v1715_v1  ;;  %v28_v0 = vld [vmem:[%s2303_s1 + $0x78] sm:$0xff] }
  0x5f   :  { %1209 = vmatprep.subr.bf16.mxu0 %v1682_v2  ;;  %1250 = vmatprep.subr.bf16.mxu1 %v1684_v4  ;;  %v44_v1 = vld [vmem:[%s2303_s1 + $0xf8] sm:$0xff]  ;;  %v1721_v2 = vcombine.low %v59_v54, %v75_v55  ;;  %v1723_v4 = vcombine.low %v60_v56, %v76_v57 }
  0x60   :  { %v1692_v6 = vcombine.high %v28_v0, %v44_v1  ;;  %v1691_v8 = vcombine.low %v28_v0, %v44_v1 }
  0x62   :  { %1210 = vmatpush1.bf16.msra.mxu0 %v1681_v9  ;;  %1251 = vmatpush1.bf16.msra.mxu1 %v1683_v10  ;;  %v1510_v10 = vlaneseq }
  0x63   :  { %1285 = vmatprep.subr.bf16.mxu0 %v1782_v11  ;;  %1326 = vmatprep.subr.bf16.mxu1 %v1784_v12 }
  0x64   :  { %v1511_v12 = vshrl.u32 %v1510_v10, 7 }
  0x65   :  { %1799 = vmatmul.mubr.msk.bf16.vlgmr.msra.gmra.mxu0 %vm781_vm0, %v1901_v43  ;;  %1800 = vmatmul.mubr.msk.bf16.vlgmr.msra.gmra.mxu1 %vm781_vm0, %v1901_v43 }
  0x66   :  { %1286 = vmatpush1.bf16.msra.mxu0 %v1781_v17  ;;  %1327 = vmatpush1.bf16.msra.mxu1 %v1783_v18 }
  0x67   :  { %1287 = vmatprep.subr.bf16.mxu0 %v1750_v19  ;;  %1328 = vmatprep.subr.bf16.mxu1 %v1752_v20 }
  0x68   :  { %1309 = vmatprep.mubr.bf16.mxu0 %v1807_v3  ;;  %1350 = vmatprep.mubr.bf16.mxu1 %v1807_v3 }
  0x6a   :  { %1288 = vmatpush1.bf16.msra.mxu0 %v1749_v25  ;;  %1329 = vmatpush1.bf16.msra.mxu1 %v1751_v26 }
  0x6b   :  { %1289 = vmatprep.subr.bf16.mxu0 %v1718_v27  ;;  %1330 = vmatprep.subr.bf16.mxu1 %v1720_v28 }
  0x6e   :  { %1290 = vmatpush1.bf16.msra.mxu0 %v1717_v33  ;;  %1331 = vmatpush1.bf16.msra.mxu1 %v1719_v34 }
  0x6f   :  { %1291 = vmatprep.subr.bf16.mxu0 %v1686_v35  ;;  %1332 = vmatprep.subr.bf16.mxu1 %v1688_v36 }
  0x72   :  { %1292 = vmatpush1.bf16.msra.mxu0 %v1685_v41  ;;  %1333 = vmatpush1.bf16.msra.mxu1 %v1687_v42 }
  0x73   :  { %1367 = vmatprep.subr.bf16.mxu0 %v1786_v44  ;;  %1408 = vmatprep.subr.bf16.mxu1 %v1788_v45 }
  0x75   :  { %1801 = vmatmul.mubr.msk.bf16.vlgmr.msra.gmra.mxu0 %vm781_vm0, %v1901_v43  ;;  %1802 = vmatmul.mubr.msk.bf16.vlgmr.msra.gmra.mxu1 %vm781_vm0, %v1901_v43 }
  0x76   :  { %1368 = vmatpush1.bf16.msra.mxu0 %v1785_v50  ;;  %1409 = vmatpush1.bf16.msra.mxu1 %v1787_v51 }
  0x77   :  { %1369 = vmatprep.subr.bf16.mxu0 %v1754_v52  ;;  %1410 = vmatprep.subr.bf16.mxu1 %v1756_v53 }
  0x78   :  { %1391 = vmatprep.mubr.bf16.mxu0 %v1807_v3  ;;  %1432 = vmatprep.mubr.bf16.mxu1 %v1807_v3  ;;  %v1808_v3 = vmov 1983009808  }
  0x79   :  { %v1508_v9 = vunpack.c.l.s4 %v1808_v3 }
  0x7a   :  { %1370 = vmatpush1.bf16.msra.mxu0 %v1753_v58  ;;  %1411 = vmatpush1.bf16.msra.mxu1 %v1755_v59 }
  0x7b   :  { %1371 = vmatprep.subr.bf16.mxu0 %v1722_v60  ;;  %1412 = vmatprep.subr.bf16.mxu1 %v1724_v61  ;;  %v1509_v11 = vunpack.c.0.s8 %v1508_v9 }
  0x7d   :  { %v2261_v19 = vsub.s32 %v1509_v11, %v1511_v12 }
  0x7e   :  { %1372 = vmatpush1.bf16.msra.mxu0 %v1721_v2  ;;  %1413 = vmatpush1.bf16.msra.mxu1 %v1723_v4 }
  0x7f   :  { %1373 = vmatprep.subr.bf16.mxu0 %v1690_v5  ;;  %1414 = vmatprep.subr.bf16.mxu1 %v1692_v6 }
  0x82   :  { %1374 = vmatpush1.bf16.msra.mxu0 %v1689_v7  ;;  %1415 = vmatpush1.bf16.msra.mxu1 %v1691_v8 }
  0x85   :  { %1803 = vmatmul.mubr.msk.bf16.vlgmr.msra.gmra.mxu0 %vm781_vm0, %v1901_v43  ;;  %1804 = vmatmul.mubr.msk.bf16.vlgmr.msra.gmra.mxu1 %vm781_vm0, %v1901_v43 }
  0xd5   :  { %v819_v13 = vpop.f32.mrf.mxu0  ;;  %v860_v15 = vpop.f32.mrf.mxu1 }
  0xd6   :  { %v1441_v14 = vmax.f32 %v819_v13, 0.0  ;;  %v1443_v16 = vmax.f32 %v860_v15, 0.0 }
  0xd7   :  { %v821_v17 = vpop.f32.mrf.mxu0  ;;  %v862_v20 = vpop.f32.mrf.mxu1 }
  0xd8   :  { %v1442_v18 = vmax.f32 %v821_v17, 0.0  ;;  %v1444_v21 = vmax.f32 %v862_v20, 0.0 }
  0xd9   :  { %v823_v22 = vpop.f32.mrf.mxu0  ;;  %v864_v24 = vpop.f32.mrf.mxu1 }
  0xda   :  { %v1505_v23 = vcombine.low %v1441_v14, %v1442_v18  ;;  %v1506_v25 = vcombine.low %v1443_v16, %v1444_v21 }
  0xdb   :  { %v824_v43 = vpop.f32.mrf.mxu0  ;;  %v865_v27 = vpop.f32.mrf.mxu1 }
  0xdc   :  { %v1513_v26 = vrot.slane %v1505_v23, %v2261_v19  ;;  %v1520_v28 = vrot.slane %v1506_v25, %v2261_v19 }
  0xde   :  { %v1521_v29 = vcombine.low %v1513_v26, %v1520_v28 }
  0xe0   :  { %1649 = vst [vmem:[%s2305_s2] sm:$0xff] %v1521_v29 }
  0xe5   :  { %v901_v30 = vpop.f32.mrf.mxu0  ;;  %v942_v32 = vpop.f32.mrf.mxu1 }
  0xe6   :  { %v1445_v31 = vmax.f32 %v901_v30, 0.0  ;;  %v1447_v33 = vmax.f32 %v942_v32, 0.0 }
  0xe7   :  { %v903_v34 = vpop.f32.mrf.mxu0  ;;  %v944_v36 = vpop.f32.mrf.mxu1 }
  0xe8   :  { %v1446_v35 = vmax.f32 %v903_v34, 0.0  ;;  %v1448_v37 = vmax.f32 %v944_v36, 0.0 }
  0xe9   :  { %v905_v38 = vpop.f32.mrf.mxu0  ;;  %v946_v40 = vpop.f32.mrf.mxu1 }
  0xea   :  { %v1522_v39 = vcombine.low %v1445_v31, %v1446_v35  ;;  %v1523_v41 = vcombine.low %v1447_v33, %v1448_v37 }
  0xeb   :  { %v906_v42 = vpop.f32.mrf.mxu0  ;;  %v947_v45 = vpop.f32.mrf.mxu1 }
  0xec   :  { %v1530_v44 = vrot.slane %v1522_v39, %v2261_v19  ;;  %v1537_v46 = vrot.slane %v1523_v41, %v2261_v19 }
  0xee   :  { %v1538_v47 = vcombine.low %v1530_v44, %v1537_v46 }
  0xf0   :  { %1650 = vst [vmem:[%s2305_s2 + $0x8] sm:$0xff] %v1538_v47 }
  0xf5   :  { %v983_v48 = vpop.f32.mrf.mxu0  ;;  %v1024_v50 = vpop.f32.mrf.mxu1 }
  0xf6   :  { %v1449_v49 = vmax.f32 %v983_v48, 0.0  ;;  %v1451_v51 = vmax.f32 %v1024_v50, 0.0 }
  0xf7   :  { %v985_v52 = vpop.f32.mrf.mxu0  ;;  %v1026_v54 = vpop.f32.mrf.mxu1 }
  0xf8   :  { %v1450_v53 = vmax.f32 %v985_v52, 0.0  ;;  %v1452_v55 = vmax.f32 %v1026_v54, 0.0 }
  0xf9   :  { %v987_v56 = vpop.f32.mrf.mxu0  ;;  %v1028_v58 = vpop.f32.mrf.mxu1 }
  0xfa   :  { %v1539_v57 = vcombine.low %v1449_v49, %v1450_v53  ;;  %v1540_v59 = vcombine.low %v1451_v51, %v1452_v55 }
  0xfb   :  { %v988_v60 = vpop.f32.mrf.mxu0  ;;  %v1029_v62 = vpop.f32.mrf.mxu1 }
  0xfc   :  { %v1547_v61 = vrot.slane %v1539_v57, %v2261_v19  ;;  %v1554_v63 = vrot.slane %v1540_v59, %v2261_v19 }
  0xfe   :  { %v1555_v0 = vcombine.low %v1547_v61, %v1554_v63 }
 0x100   :  { %1651 = vst [vmem:[%s2305_s2 + $0x10] sm:$0xff] %v1555_v0 }
 0x105   :  { %v1065_v1 = vpop.f32.mrf.mxu0  ;;  %v1106_v4 = vpop.f32.mrf.mxu1 }
 0x106   :  { %v1453_v2 = vmax.f32 %v1065_v1, 0.0  ;;  %v1455_v5 = vmax.f32 %v1106_v4, 0.0 }
 0x107   :  { %v1067_v6 = vpop.f32.mrf.mxu0  ;;  %v1108_v8 = vpop.f32.mrf.mxu1 }
 0x108   :  { %v1454_v7 = vmax.f32 %v1067_v6, 0.0  ;;  %v1456_v3 = vmax.f32 %v1108_v8, 0.0 }
 0x109   :  { %v1069_v9 = vpop.f32.mrf.mxu0  ;;  %v1110_v11 = vpop.f32.mrf.mxu1 }
 0x10a   :  { %v1556_v10 = vcombine.low %v1453_v2, %v1454_v7  ;;  %v1557_v12 = vcombine.low %v1455_v5, %v1456_v3 }
 0x10b   :  { %v1070_v13 = vpop.f32.mrf.mxu0  ;;  %v1111_v15 = vpop.f32.mrf.mxu1 }
 0x10c   :  { %v1564_v14 = vrot.slane %v1556_v10, %v2261_v19  ;;  %v1571_v16 = vrot.slane %v1557_v12, %v2261_v19 }
 0x10e   :  { %v1572_v17 = vcombine.low %v1564_v14, %v1571_v16 }
 0x110   :  { %1652 = vst [vmem:[%s2305_s2 + $0x18] sm:$0xff] %v1572_v17 }
 0x115   :  { %v1147_v18 = vpop.f32.mrf.mxu0  ;;  %v1188_v21 = vpop.f32.mrf.mxu1 }
 0x116   :  { %v1457_v20 = vmax.f32 %v1147_v18, 0.0  ;;  %v1459_v22 = vmax.f32 %v1188_v21, 0.0 }
 0x117   :  { %v1149_v23 = vpop.f32.mrf.mxu0  ;;  %v1190_v25 = vpop.f32.mrf.mxu1 }
 0x118   :  { %v1458_v24 = vmax.f32 %v1149_v23, 0.0  ;;  %v1460_v43 = vmax.f32 %v1190_v25, 0.0 }
 0x119   :  { %v1151_v26 = vpop.f32.mrf.mxu0  ;;  %v1192_v28 = vpop.f32.mrf.mxu1 }
 0x11a   :  { %v1573_v27 = vcombine.low %v1457_v20, %v1458_v24  ;;  %v1574_v29 = vcombine.low %v1459_v22, %v1460_v43 }
 0x11b   :  { %v1152_v30 = vpop.f32.mrf.mxu0  ;;  %v1193_v32 = vpop.f32.mrf.mxu1 }
 0x11c   :  { %v1581_v31 = vrot.slane %v1573_v27, %v2261_v19  ;;  %v1588_v33 = vrot.slane %v1574_v29, %v2261_v19 }
 0x11e   :  { %v1589_v34 = vcombine.low %v1581_v31, %v1588_v33 }
 0x120   :  { %1653 = vst [vmem:[%s2305_s2 + $0x20] sm:$0xff] %v1589_v34 }
 0x125   :  { %v1229_v35 = vpop.f32.mrf.mxu0  ;;  %v1270_v37 = vpop.f32.mrf.mxu1 }
 0x126   :  { %v1461_v36 = vmax.f32 %v1229_v35, 0.0  ;;  %v1463_v38 = vmax.f32 %v1270_v37, 0.0 }
 0x127   :  { %v1231_v39 = vpop.f32.mrf.mxu0  ;;  %v1272_v41 = vpop.f32.mrf.mxu1 }
 0x128   :  { %v1462_v40 = vmax.f32 %v1231_v39, 0.0  ;;  %v1464_v42 = vmax.f32 %v1272_v41, 0.0 }
 0x129   :  { %v1233_v44 = vpop.f32.mrf.mxu0  ;;  %v1274_v46 = vpop.f32.mrf.mxu1 }
 0x12a   :  { %v1590_v45 = vcombine.low %v1461_v36, %v1462_v40  ;;  %v1591_v47 = vcombine.low %v1463_v38, %v1464_v42 }
 0x12b   :  { %v1234_v48 = vpop.f32.mrf.mxu0  ;;  %v1275_v50 = vpop.f32.mrf.mxu1 }
 0x12c   :  { %v1598_v49 = vrot.slane %v1590_v45, %v2261_v19  ;;  %v1605_v51 = vrot.slane %v1591_v47, %v2261_v19 }
 0x12e   :  { %v1606_v52 = vcombine.low %v1598_v49, %v1605_v51 }
 0x130   :  { %1654 = vst [vmem:[%s2305_s2 + $0x28] sm:$0xff] %v1606_v52 }
 0x135   :  { %v1311_v53 = vpop.f32.mrf.mxu0  ;;  %v1352_v55 = vpop.f32.mrf.mxu1 }
 0x136   :  { %v1465_v54 = vmax.f32 %v1311_v53, 0.0  ;;  %v1467_v56 = vmax.f32 %v1352_v55, 0.0 }
 0x137   :  { %v1313_v57 = vpop.f32.mrf.mxu0  ;;  %v1354_v59 = vpop.f32.mrf.mxu1 }
 0x138   :  { %v1466_v58 = vmax.f32 %v1313_v57, 0.0  ;;  %v1468_v60 = vmax.f32 %v1354_v59, 0.0 }
 0x139   :  { %v1315_v61 = vpop.f32.mrf.mxu0  ;;  %v1356_v63 = vpop.f32.mrf.mxu1 }
 0x13a   :  { %v1607_v62 = vcombine.low %v1465_v54, %v1466_v58  ;;  %v1608_v0 = vcombine.low %v1467_v56, %v1468_v60 }
 0x13b   :  { %v1316_v1 = vpop.f32.mrf.mxu0  ;;  %v1357_v4 = vpop.f32.mrf.mxu1 }
 0x13c   :  { %v1615_v2 = vrot.slane %v1607_v62, %v2261_v19  ;;  %v1622_v5 = vrot.slane %v1608_v0, %v2261_v19 }
 0x13e   :  { %v1623_v6 = vcombine.low %v1615_v2, %v1622_v5 }
 0x140   :  { %1655 = vst [vmem:[%s2305_s2 + $0x30] sm:$0xff] %v1623_v6 }
 0x145   :  { %v1393_v7 = vpop.f32.mrf.mxu0  ;;  %v1434_v8 = vpop.f32.mrf.mxu1 }
 0x146   :  { %v1469_v9 = vmax.f32 %v1393_v7, 0.0  ;;  %v1471_v12 = vmax.f32 %v1434_v8, 0.0 }
 0x147   :  { %v1395_v3 = vpop.f32.mrf.mxu0  ;;  %v1436_v11 = vpop.f32.mrf.mxu1 }
 0x148   :  { %v1470_v10 = vmax.f32 %v1395_v3, 0.0  ;;  %v1472_v13 = vmax.f32 %v1436_v11, 0.0 }
 0x149   :  { %v1397_v14 = vpop.f32.mrf.mxu0  ;;  %v1438_v16 = vpop.f32.mrf.mxu1 }
 0x14a   :  { %v1624_v15 = vcombine.low %v1469_v9, %v1470_v10  ;;  %v1625_v17 = vcombine.low %v1471_v12, %v1472_v13 }
 0x14b   :  { %v1398_v18 = vpop.f32.mrf.mxu0  ;;  %v1439_v21 = vpop.f32.mrf.mxu1 }
 0x14c   :  { %v1632_v20 = vrot.slane %v1624_v15, %v2261_v19  ;;  %v1639_v22 = vrot.slane %v1625_v17, %v2261_v19 }
 0x14e   :  { %v1640_v23 = vcombine.low %v1632_v20, %v1639_v22 }
 0x150   :  { %1656 = vst [vmem:[%s2305_s2 + $0x38] sm:$0xff] %v1640_v23 }

// kernel: generator_forward.5
= control target key start
LH: loop header
LB: loop body
LE: loop exit
PB: predicated region body
PF: predicated region fallthrough
CT: control target
= control target key end

     0   :  { %s1456_s9 = smov 0   ;;  %s1458_s10 = smov 0   ;;  %s1587_s0 = inlined_call_operand.vmem [shape: bf16[4,32,1024], index: 0, kind: input, shape index: {}]   ;;  %s1588_s1 = inlined_call_operand.vmem [shape: bf16[4,1024,128], index: 1, kind: input, shape index: {}]   ;;  %s1589_s2 = inlined_call_operand.vmem [shape: f32[4,32,128], index: 2, kind: output, shape index: {}]  }
   0x1   :  { %s1460_s11 = smov 0  }
   0x2 LB: > { %s24_s12 = sadd.s32 1, %s1435_s10  ;;  %p1125_p0 = scmp.ge.s32.totalorder %s1439_s11, 1  ;;  %s1439_s11 = sphi %s1460_s11, %s12_s11   ;;  %s1435_s10 = sphi %s1458_s10, %s1591_s10   ;;  %s1431_s9 = sphi %s1456_s9, %s1590_s9  }
   0x3   : > { %p26_p1 = scmp.ge.s32.totalorder %s24_s12, 4  ;;  %p144_p2 = scmp.lt.s32.totalorder %s1439_s11, 5 }
   0x5   : > { %s1593_s12 = smov (%p26_p1, %s24_s12), 0  ;;  %p145_p3 = pnand %p1125_p0, %p144_p2 }
   0x6   : > { %p181_p4 = scmp.lt.s32.totalorder (!%p145_p3), %s1431_s9, 3 }
   0x7   : > { %148 = sbr.rel (%p145_p3) target bundleno = 297 (0x129), region = 28 }
   0xc   : > { %s1595_s9 = smov (!%p181_p4, %s1431_s9), 3 }
   0xd   : > { %s1215_s13 = sshll.u32 %s1595_s9, 9  ;;  %s1214_s17 = sshll.u32 %s1595_s9, 7 }
   0xe   : > { %s1480_s16 = scalar_lea.vmem %s1588_s1, %s1215_s13  ;;  %s1516_s20 = scalar_lea.vmem %s1587_s0, %s1214_s17 }
   0xf   : > { %v1353_v0 = vld [vmem:[%s1480_s16 + $0x78] sm:$0xff]   ;;  %v1357_v4 = vld [vmem:[%s1480_s16 + $0x70] sm:$0xff]   ;;  %v1361_v8 = vld [vmem:[%s1480_s16 + $0x68] sm:$0xff]   ;;  %s1216_s21 = sshll.u32 %s1595_s9, 5 }
  0x10   : > { %v1354_v1 = vld [vmem:[%s1480_s16 + $0xf8] sm:$0xff]   ;;  %1217 = vmatprep.subr.bf16.mxu0 %v1353_v0  ;;  %v1358_v5 = vld [vmem:[%s1480_s16 + $0xf0] sm:$0xff]   ;;  %v1362_v9 = vld [vmem:[%s1480_s16 + $0xe8] sm:$0xff]   ;;  %s1572_s24 = scalar_lea.vmem %s1589_s2, %s1216_s21 }
  0x11   : > { %v1355_v2 = vld [vmem:[%s1480_s16 + $0x38] sm:$0xff]   ;;  %1245 = vmatprep.subr.bf16.mxu1 %v1354_v1  ;;  %v1359_v6 = vld [vmem:[%s1480_s16 + $0x30] sm:$0xff]   ;;  %v1363_v10 = vld [vmem:[%s1480_s16 + $0x28] sm:$0xff]  }
  0x12   : > { %v1356_v3 = vld [vmem:[%s1480_s16 + $0xb8] sm:$0xff]   ;;  %1218 = vmatpush3.bf16.msra.mxu0 %v1355_v2  ;;  %v1360_v7 = vld [vmem:[%s1480_s16 + $0xb0] sm:$0xff]   ;;  %v1364_v11 = vld [vmem:[%s1480_s16 + $0xa8] sm:$0xff]  }
  0x13   : > { %1246 = vmatpush3.bf16.msra.mxu1 %v1356_v3  ;;  %1219 = vmatprep.subr.bf16.mxu0 %v1357_v4  ;;  %v1365_v12 = vld [vmem:[%s1480_s16 + $0x60] sm:$0xff]   ;;  %v1369_v16 = vld [vmem:[%s1480_s16 + $0x58] sm:$0xff]   ;;  %v1373_v20 = vld [vmem:[%s1480_s16 + $0x50] sm:$0xff]  }
  0x14   : > { %1247 = vmatprep.subr.bf16.mxu1 %v1358_v5  ;;  %v1366_v13 = vld [vmem:[%s1480_s16 + $0xe0] sm:$0xff]   ;;  %v1370_v17 = vld [vmem:[%s1480_s16 + $0xd8] sm:$0xff]   ;;  %v1374_v21 = vld [vmem:[%s1480_s16 + $0xd0] sm:$0xff]  }
  0x15   : > { %v1367_v14 = vld [vmem:[%s1480_s16 + $0x20] sm:$0xff]   ;;  %v1371_v18 = vld [vmem:[%s1480_s16 + $0x18] sm:$0xff]   ;;  %v1375_v22 = vld [vmem:[%s1480_s16 + $0x10] sm:$0xff]  }
  0x16   : > { %1220 = vmatpush3.bf16.msra.mxu0 %v1359_v6  ;;  %v1368_v15 = vld [vmem:[%s1480_s16 + $0xa0] sm:$0xff]   ;;  %v1372_v19 = vld [vmem:[%s1480_s16 + $0x98] sm:$0xff]   ;;  %v1376_v23 = vld [vmem:[%s1480_s16 + $0x90] sm:$0xff]  }
  0x17   : > { %1248 = vmatpush3.bf16.msra.mxu1 %v1360_v7  ;;  %1221 = vmatprep.subr.bf16.mxu0 %v1361_v8  ;;  %v1377_v24 = vld [vmem:[%s1480_s16 + $0x48] sm:$0xff]   ;;  %v1381_v28 = vld [vmem:[%s1480_s16 + $0x40] sm:$0xff]   ;;  %v1385_v40 = vld [vmem:[%s1480_s16 + $0x178] sm:$0xff]  }
  0x18   : > { %1249 = vmatprep.subr.bf16.mxu1 %v1362_v9  ;;  %v1378_v25 = vld [vmem:[%s1480_s16 + $0xc8] sm:$0xff]   ;;  %v1382_v29 = vld [vmem:[%s1480_s16 + $0xc0] sm:$0xff]   ;;  %v1386_v41 = vld [vmem:[%s1480_s16 + $0x1f8] sm:$0xff]  }
  0x19   : > { %v1379_v26 = vld [vmem:[%s1480_s16 + $0x8] sm:$0xff]   ;;  %v1383_v30 = vld [vmem:[%s1480_s16] sm:$0xff]   ;;  %v1387_v42 = vld [vmem:[%s1480_s16 + $0x138] sm:$0xff]  }
  0x1a   : > { %1222 = vmatpush3.bf16.msra.mxu0 %v1363_v10  ;;  %v1380_v27 = vld [vmem:[%s1480_s16 + $0x88] sm:$0xff]   ;;  %v1384_v31 = vld [vmem:[%s1480_s16 + $0x80] sm:$0xff]   ;;  %v1388_v43 = vld [vmem:[%s1480_s16 + $0x1b8] sm:$0xff]  }
  0x1b   : > { %1250 = vmatpush3.bf16.msra.mxu1 %v1364_v11  ;;  %1223 = vmatprep.subr.bf16.mxu0 %v1365_v12  ;;  %v207_v32 = vld [vmem:[%s1516_s20] sm:$0xff]  ;;  %v208_v34 = vld [vmem:[%s1516_s20 + $0x8] sm:$0xff]  ;;  %v1389_v44 = vld [vmem:[%s1480_s16 + $0x170] sm:$0xff]  }
  0x1c   : > { %1251 = vmatprep.subr.bf16.mxu1 %v1366_v13  ;;  %v211_v33 = vld [vmem:[%s1516_s20 + $0x20] sm:$0xff]  ;;  %v212_v37 = vld [vmem:[%s1516_s20 + $0x28] sm:$0xff]  ;;  %v1390_v45 = vld [vmem:[%s1480_s16 + $0x1f0] sm:$0xff]  }
  0x1d   : > { %v1132_v35 = vcombine.low %v207_v32, %v211_v33  ;;  %v1133_v36 = vcombine.high %v207_v32, %v211_v33  ;;  %v1134_v38 = vcombine.low %v208_v34, %v212_v37  ;;  %v1135_v39 = vcombine.high %v208_v34, %v212_v37  ;;  %v1391_v46 = vld [vmem:[%s1480_s16 + $0x130] sm:$0xff]   ;;  %v1393_v48 = vld [vmem:[%s1480_s16 + $0x168] sm:$0xff]   ;;  %v1397_v52 = vld [vmem:[%s1480_s16 + $0x160] sm:$0xff]  }
  0x1e   : > { %1224 = vmatpush3.bf16.msra.mxu0 %v1367_v14  ;;  %v1392_v47 = vld [vmem:[%s1480_s16 + $0x1b0] sm:$0xff]   ;;  %v1394_v49 = vld [vmem:[%s1480_s16 + $0x1e8] sm:$0xff]   ;;  %v1398_v53 = vld [vmem:[%s1480_s16 + $0x1e0] sm:$0xff]  }
  0x1f   : > { %1252 = vmatpush3.bf16.msra.mxu1 %v1368_v15  ;;  %1225 = vmatprep.subr.bf16.mxu0 %v1369_v16  ;;  %v1395_v50 = vld [vmem:[%s1480_s16 + $0x128] sm:$0xff]   ;;  %v1399_v54 = vld [vmem:[%s1480_s16 + $0x120] sm:$0xff]   ;;  %v1401_v56 = vld [vmem:[%s1480_s16 + $0x158] sm:$0xff]  }
  0x20   : > { %1253 = vmatprep.subr.bf16.mxu1 %v1370_v17  ;;  %847 = vmatprep.mubr.bf16.mxu0 %v1133_v36  ;;  %v1396_v51 = vld [vmem:[%s1480_s16 + $0x1a8] sm:$0xff]   ;;  %v1400_v55 = vld [vmem:[%s1480_s16 + $0x1a0] sm:$0xff]   ;;  %v1402_v57 = vld [vmem:[%s1480_s16 + $0x1d8] sm:$0xff]  }
  0x21   : > { %896 = vmatprep.mubr.bf16.mxu1 %v1135_v39  ;;  %v215_v58 = vld [vmem:[%s1516_s20 + $0x40] sm:$0xff]  ;;  %v216_v61 = vld [vmem:[%s1516_s20 + $0x48] sm:$0xff]  ;;  %v1403_v1 = vld [vmem:[%s1480_s16 + $0x118] sm:$0xff]  }
  0x22   : > { %1226 = vmatpush3.bf16.msra.mxu0 %v1371_v18  ;;  %v219_v59 = vld [vmem:[%s1516_s20 + $0x60] sm:$0xff]  ;;  %v220_v62 = vld [vmem:[%s1516_s20 + $0x68] sm:$0xff]  ;;  %v1404_v3 = vld [vmem:[%s1480_s16 + $0x198] sm:$0xff]  }
  0x23   : > { %1254 = vmatpush3.bf16.msra.mxu1 %v1372_v19  ;;  %1227 = vmatprep.subr.bf16.mxu0 %v1373_v20  ;;  %v1141_v60 = vcombine.high %v215_v58, %v219_v59  ;;  %v1140_v63 = vcombine.low %v215_v58, %v219_v59  ;;  %v1143_v0 = vcombine.high %v216_v61, %v220_v62  ;;  %v1405_v4 = vld [vmem:[%s1480_s16 + $0x150] sm:$0xff]   ;;  %v1409_v8 = vld [vmem:[%s1480_s16 + $0x148] sm:$0xff]   ;;  %v1413_v12 = vld [vmem:[%s1480_s16 + $0x140] sm:$0xff]  }
  0x24   : > { %1255 = vmatprep.subr.bf16.mxu1 %v1374_v21  ;;  %v1142_v2 = vcombine.low %v216_v61, %v220_v62  ;;  %v1406_v5 = vld [vmem:[%s1480_s16 + $0x1d0] sm:$0xff]   ;;  %v1410_v9 = vld [vmem:[%s1480_s16 + $0x1c8] sm:$0xff]   ;;  %v1414_v13 = vld [vmem:[%s1480_s16 + $0x1c0] sm:$0xff]  }
  0x25   : > { %v1407_v6 = vld [vmem:[%s1480_s16 + $0x110] sm:$0xff]   ;;  %v1411_v10 = vld [vmem:[%s1480_s16 + $0x108] sm:$0xff]   ;;  %v1415_v14 = vld [vmem:[%s1480_s16 + $0x100] sm:$0xff]  }
  0x26   : > { %1228 = vmatpush3.bf16.msra.mxu0 %v1375_v22  ;;  %v1408_v7 = vld [vmem:[%s1480_s16 + $0x190] sm:$0xff]   ;;  %v1412_v11 = vld [vmem:[%s1480_s16 + $0x188] sm:$0xff]   ;;  %v1416_v15 = vld [vmem:[%s1480_s16 + $0x180] sm:$0xff]  }
  0x27   : > { %1256 = vmatpush3.bf16.msra.mxu1 %v1376_v23  ;;  %1229 = vmatprep.subr.bf16.mxu0 %v1377_v24  ;;  %v209_v16 = vld [vmem:[%s1516_s20 + $0x10] sm:$0xff]  ;;  %v210_v18 = vld [vmem:[%s1516_s20 + $0x18] sm:$0xff] }
  0x28   : > { %1257 = vmatprep.subr.bf16.mxu1 %v1378_v25  ;;  %v213_v17 = vld [vmem:[%s1516_s20 + $0x30] sm:$0xff]  ;;  %v214_v19 = vld [vmem:[%s1516_s20 + $0x38] sm:$0xff] }
  0x29   : > { %v1136_v20 = vcombine.low %v209_v16, %v213_v17  ;;  %v1137_v21 = vcombine.high %v209_v16, %v213_v17  ;;  %v1138_v22 = vcombine.low %v210_v18, %v214_v19  ;;  %v1139_v23 = vcombine.high %v210_v18, %v214_v19  ;;  %v217_v24 = vld [vmem:[%s1516_s20 + $0x50] sm:$0xff] }
  0x2a   : > { %1230 = vmatpush3.bf16.msra.mxu0 %v1379_v26  ;;  %v221_v25 = vld [vmem:[%s1516_s20 + $0x70] sm:$0xff]  ;;  %v218_v26 = vld [vmem:[%s1516_s20 + $0x58] sm:$0xff] }
  0x2b   : > { %1258 = vmatpush3.bf16.msra.mxu1 %v1380_v27  ;;  %1231 = vmatprep.subr.bf16.mxu0 %v1381_v28  ;;  %v1145_v27 = vcombine.high %v217_v24, %v221_v25  ;;  %v222_v28 = vld [vmem:[%s1516_s20 + $0x78] sm:$0xff] }
  0x2c   : > { %1259 = vmatprep.subr.bf16.mxu1 %v1382_v29  ;;  %v1147_v29 = vcombine.high %v218_v26, %v222_v28 }
  0x2e   : > { %1232 = vmatpush3.bf16.msra.mxu0 %v1383_v30  ;;  %v1144_v30 = vcombine.low %v217_v24, %v221_v25 }
  0x2f   : > { %1260 = vmatpush3.bf16.msra.mxu1 %v1384_v31  ;;  %1273 = vmatprep.subr.bf16.mxu0 %v1385_v40  ;;  %v1146_v31 = vcombine.low %v218_v26, %v222_v28 }
  0x30   : > { %1301 = vmatprep.subr.bf16.mxu1 %v1386_v41 }
  0x31   : > { %848 = vmatmul.mubr.bf16.vlgmr.msra.gmra.mxu0 %v1132_v35 }
  0x32   : > { %897 = vmatmul.mubr.bf16.vlgmr.msra.gmra.mxu1 %v1134_v38  ;;  %1274 = vmatpush3.bf16.msra.mxu0 %v1387_v42 }
  0x33   : > { %1302 = vmatpush3.bf16.msra.mxu1 %v1388_v43  ;;  %1275 = vmatprep.subr.bf16.mxu0 %v1389_v44 }
  0x34   : > { %1303 = vmatprep.subr.bf16.mxu1 %v1390_v45  ;;  %855 = vmatprep.mubr.bf16.mxu0 %v1141_v60 }
  0x35   : > { %904 = vmatprep.mubr.bf16.mxu1 %v1143_v0 }
  0x36   : > { %1276 = vmatpush3.bf16.msra.mxu0 %v1391_v46 }
  0x37   : > { %1304 = vmatpush3.bf16.msra.mxu1 %v1392_v47  ;;  %1277 = vmatprep.subr.bf16.mxu0 %v1393_v48 }
  0x38   : > { %1305 = vmatprep.subr.bf16.mxu1 %v1394_v49 }
  0x39   : > { %856 = vmatmul.mubr.bf16.gmra.mxu0 %v1140_v63 }
  0x3a   : > { %1278 = vmatpush3.bf16.msra.mxu0 %v1395_v50  ;;  %905 = vmatmul.mubr.bf16.gmra.mxu1 %v1142_v2 }
  0x3b   : > { %1306 = vmatpush3.bf16.msra.mxu1 %v1396_v51  ;;  %1279 = vmatprep.subr.bf16.mxu0 %v1397_v52 }
  0x3c   : > { %1307 = vmatprep.subr.bf16.mxu1 %v1398_v53  ;;  %945 = vmatprep.mubr.bf16.mxu0 %v1137_v21 }
  0x3d   : > { %994 = vmatprep.mubr.bf16.mxu1 %v1139_v23 }
  0x3e   : > { %1280 = vmatpush3.bf16.msra.mxu0 %v1399_v54 }
  0x3f   : > { %1308 = vmatpush3.bf16.msra.mxu1 %v1400_v55  ;;  %1281 = vmatprep.subr.bf16.mxu0 %v1401_v56 }
  0x40   : > { %1309 = vmatprep.subr.bf16.mxu1 %v1402_v57 }
  0x42   : > { %1282 = vmatpush3.bf16.msra.mxu0 %v1403_v1 }
  0x43   : > { %1310 = vmatpush3.bf16.msra.mxu1 %v1404_v3  ;;  %1283 = vmatprep.subr.bf16.mxu0 %v1405_v4 }
  0x44   : > { %1311 = vmatprep.subr.bf16.mxu1 %v1406_v5 }
  0x46   : > { %1284 = vmatpush3.bf16.msra.mxu0 %v1407_v6 }
  0x47   : > { %1312 = vmatpush3.bf16.msra.mxu1 %v1408_v7  ;;  %1285 = vmatprep.subr.bf16.mxu0 %v1409_v8 }
  0x48   : > { %1313 = vmatprep.subr.bf16.mxu1 %v1410_v9 }
  0x4a   : > { %1286 = vmatpush3.bf16.msra.mxu0 %v1411_v10 }
  0x4b   : > { %1314 = vmatpush3.bf16.msra.mxu1 %v1412_v11  ;;  %1287 = vmatprep.subr.bf16.mxu0 %v1413_v12 }
  0x4c   : > { %1315 = vmatprep.subr.bf16.mxu1 %v1414_v13 }
  0x4e   : > { %1288 = vmatpush3.bf16.msra.mxu0 %v1415_v14 }
  0x4f   : > { %1316 = vmatpush3.bf16.msra.mxu1 %v1416_v15 }
  0x51   : > { %946 = vmatmul.mubr.bf16.vlgmr.msra.gmra.mxu0 %v1136_v20 }
  0x52   : > { %995 = vmatmul.mubr.bf16.vlgmr.msra.gmra.mxu1 %v1138_v22  ;;  %953 = vmatprep.mubr.bf16.mxu0 %v1145_v27 }
  0x53   : > { %1002 = vmatprep.mubr.bf16.mxu1 %v1147_v29 }
  0x59   : > { %954 = vmatmul.mubr.bf16.gmra.mxu0 %v1144_v30 }
  0x5a   : > { %1003 = vmatmul.mubr.bf16.gmra.mxu1 %v1146_v31 }
  0xf1   : > { %v1233_v32 = vpop.f32.mrf.mxu0 }
  0xf2   : > { %v1261_v33 = vpop.f32.mrf.mxu1 }
  0xf3   : > { %v1234_v34 = vpop.f32.mrf.mxu0 }
  0xf4   : > { %v1262_v35 = vpop.f32.mrf.mxu1  ;;  %v1235_v48 = vadd.f32 %v1234_v34, %v1233_v32 }
  0xf5   : > { %v1236_v36 = vpop.f32.mrf.mxu0  ;;  %v1263_v49 = vadd.f32 %v1262_v35, %v1261_v33 }
  0xf6   : > { %v1264_v37 = vpop.f32.mrf.mxu1 }
  0xf7   : > { %v1237_v38 = vpop.f32.mrf.mxu0  ;;  %v899_v54 = vadd.f32 %v1263_v49, %v1235_v48 }
  0xf8   : > { %v1265_v39 = vpop.f32.mrf.mxu1  ;;  %v1238_v55 = vadd.f32 %v1237_v38, %v1236_v36 }
  0xf9   : > { %v1239_v40 = vpop.f32.mrf.mxu0  ;;  %v1266_v56 = vadd.f32 %v1265_v39, %v1264_v37 }
  0xfa   : > { %v1267_v41 = vpop.f32.mrf.mxu1 }
  0xfb   : > { %v1240_v42 = vpop.f32.mrf.mxu0  ;;  %v902_v2 = vadd.f32 %v1266_v56, %v1238_v55 }
  0xfc   : > { %v1268_v43 = vpop.f32.mrf.mxu1  ;;  %v1241_v62 = vadd.f32 %v1240_v42, %v1239_v40 }
  0xfd   : > { %v1242_v44 = vpop.f32.mrf.mxu0  ;;  %v1269_v63 = vadd.f32 %v1268_v43, %v1267_v41 }
  0xfe   : > { %v1270_v45 = vpop.f32.mrf.mxu1 }
  0xff   : > { %v1243_v46 = vpop.f32.mrf.mxu0  ;;  %v907_v10 = vadd.f32 %v1269_v63, %v1241_v62 }
 0x100   : > { %v1271_v47 = vpop.f32.mrf.mxu1  ;;  %v1244_v13 = vadd.f32 %v1243_v46, %v1242_v44 }
 0x101   : > { %v1272_v14 = vadd.f32 %v1271_v47, %v1270_v45 }
 0x103   : > { %v910_v24 = vadd.f32 %v1272_v14, %v1244_v13 }
 0x111   : > { %v1289_v50 = vpop.f32.mrf.mxu0 }
 0x112   : > { %v1317_v51 = vpop.f32.mrf.mxu1 }
 0x113   : > { %v1290_v52 = vpop.f32.mrf.mxu0 }
 0x114   : > { %v1318_v53 = vpop.f32.mrf.mxu1  ;;  %v1291_v57 = vadd.f32 %v1290_v52, %v1289_v50 }
 0x115   : > { %v1292_v58 = vpop.f32.mrf.mxu0  ;;  %v1319_v61 = vadd.f32 %v1318_v53, %v1317_v51 }
 0x116   : > { %v1320_v59 = vpop.f32.mrf.mxu1  ;;  %v948_v60 = vadd.f32 %v1291_v57, %v899_v54 }
 0x117   : > { %v1293_v0 = vpop.f32.mrf.mxu0 }
 0x118   : > { %v1321_v1 = vpop.f32.mrf.mxu1  ;;  %v997_v3 = vadd.f32 %v1319_v61, %v948_v60  ;;  %v1294_v4 = vadd.f32 %v1293_v0, %v1292_v58 }
 0x119   : > { %v1295_v5 = vpop.f32.mrf.mxu0  ;;  %v1322_v9 = vadd.f32 %v1321_v1, %v1320_v59 }
 0x11a   : > { %v1323_v6 = vpop.f32.mrf.mxu1  ;;  %v1011_v7 = vmax.f32 %v997_v3, 0.0  ;;  %v951_v8 = vadd.f32 %v1294_v4, %v902_v2 }
 0x11b   : > { %v1296_v11 = vpop.f32.mrf.mxu0 }
 0x11c   : > { %v1324_v12 = vpop.f32.mrf.mxu1  ;;  %1015 = vst [vmem:[%s1572_s24] sm:$0xff] %v1011_v7  ;;  %v1000_v15 = vadd.f32 %v1322_v9, %v951_v8  ;;  %v1297_v16 = vadd.f32 %v1296_v11, %v1295_v5 }
 0x11d   : > { %v1298_v17 = vpop.f32.mrf.mxu0  ;;  %v1325_v21 = vadd.f32 %v1324_v12, %v1323_v6 }
 0x11e   : > { %v1326_v18 = vpop.f32.mrf.mxu1  ;;  %v1012_v19 = vmax.f32 %v1000_v15, 0.0  ;;  %v956_v20 = vadd.f32 %v1297_v16, %v907_v10 }
 0x11f   : > { %v1299_v22 = vpop.f32.mrf.mxu0 }
 0x120   : > { %v1327_v23 = vpop.f32.mrf.mxu1  ;;  %1016 = vst [vmem:[%s1572_s24 + $0x8] sm:$0xff] %v1012_v19  ;;  %v1005_v25 = vadd.f32 %v1325_v21, %v956_v20  ;;  %v1300_v26 = vadd.f32 %v1299_v22, %v1298_v17 }
 0x121   : > { %v1328_v29 = vadd.f32 %v1327_v23, %v1326_v18 }
 0x122   : > { %v1013_v27 = vmax.f32 %v1005_v25, 0.0  ;;  %v959_v28 = vadd.f32 %v1300_v26, %v910_v24 }
 0x124   : > { %1017 = vst [vmem:[%s1572_s24 + $0x10] sm:$0xff] %v1013_v27  ;;  %v1008_v30 = vadd.f32 %v1328_v29, %v959_v28 }
 0x126   : > { %v1014_v31 = vmax.f32 %v1008_v30, 0.0 }
 0x128   : > { %1018 = vst [vmem:[%s1572_s24 + $0x18] sm:$0xff] %v1014_v31 }
 0x129 PF: > { %s12_s11 = sadd.s32 1, %s1439_s11   ;;  %s1590_s9 = smov %s1435_s10 }
 0x12a   : > { %p9_p5 = scmp.ge.s32.totalorder %s12_s11, 6   ;;  %s1591_s10 = smov %s1593_s12 }
 0x12c   :  { %11 = sbr.rel (!%p9_p5) target bundleno = 2 (0x2), region = 61 }

// kernel: generator_forward.6
= control target key start
LH: loop header
LB: loop body
LE: loop exit
PB: predicated region body
PF: predicated region fallthrough
CT: control target
= control target key end

     0   :  { %s1335_s9 = smov 0   ;;  %s1337_s10 = smov 0   ;;  %s1481_s0 = inlined_call_operand.vmem [shape: bf16[4,128,512], index: 0, kind: input, shape index: {}]   ;;  %s1482_s1 = inlined_call_operand.vmem [shape: bf16[4,512,64], index: 1, kind: input, shape index: {}]   ;;  %s1483_s2 = inlined_call_operand.vmem [shape: f32[4,128,64], index: 2, kind: output, shape index: {}]  }
   0x1   :  { %s1339_s11 = smov 0  }
   0x2 LB: > { %s24_s12 = sadd.s32 1, %s1314_s10  ;;  %p988_p0 = scmp.ge.s32.totalorder %s1318_s11, 1  ;;  %s1318_s11 = sphi %s1339_s11, %s12_s11   ;;  %s1314_s10 = sphi %s1337_s10, %s1485_s10   ;;  %s1310_s9 = sphi %s1335_s9, %s1484_s9  }
   0x3   : > { %p26_p1 = scmp.ge.s32.totalorder %s24_s12, 4  ;;  %p144_p2 = scmp.lt.s32.totalorder %s1318_s11, 5 }
   0x5   : > { %s1487_s12 = smov (%p26_p1, %s24_s12), 0  ;;  %p145_p3 = pnand %p988_p0, %p144_p2 }
   0x6   : > { %p181_p4 = scmp.lt.s32.totalorder (!%p145_p3), %s1310_s9, 3 }
   0x7   : > { %148 = sbr.rel (%p145_p3) target bundleno = 312 (0x138), region = 28 }
   0xc   : > { %s1489_s9 = smov (!%p181_p4, %s1310_s9), 3  ;;  %vm865_vm0 = vcmask 523264  }
   0xd   : > { %s1061_s13 = sshll.u32 %s1489_s9, 8  ;;  %s1063_s20 = sshll.u32 %s1489_s9, 7 }
   0xe   : > { %s1361_s16 = scalar_lea.vmem %s1482_s1, %s1061_s13  ;;  %s1398_s19 = scalar_lea.vmem %s1481_s0, %s1061_s13 }
   0xf   : > { %v1216_v0 = vld [vmem:[%s1361_s16 + $0x78] sm:$0xff]   ;;  %v1220_v4 = vld [vmem:[%s1361_s16 + $0x70] sm:$0xff]   ;;  %v1224_v8 = vld [vmem:[%s1361_s16 + $0x68] sm:$0xff]   ;;  %s1438_s23 = scalar_lea.vmem %s1483_s2, %s1063_s20 }
  0x10   : > { %v1217_v1 = vld [vmem:[%s1361_s16 + $0xf8] sm:$0xff]   ;;  %1064 = vmatprep.subr.bf16.mxu0 %v1216_v0  ;;  %v1221_v5 = vld [vmem:[%s1361_s16 + $0xf0] sm:$0xff]   ;;  %v1225_v9 = vld [vmem:[%s1361_s16 + $0xe8] sm:$0xff]  }
  0x11   : > { %v1218_v2 = vld [vmem:[%s1361_s16 + $0x38] sm:$0xff]   ;;  %1128 = vmatprep.subr.bf16.mxu1 %v1217_v1  ;;  %v1222_v6 = vld [vmem:[%s1361_s16 + $0x30] sm:$0xff]   ;;  %v1226_v10 = vld [vmem:[%s1361_s16 + $0x28] sm:$0xff]  }
  0x12   : > { %v1219_v3 = vld [vmem:[%s1361_s16 + $0xb8] sm:$0xff]   ;;  %1065 = vmatpush3.bf16.msra.mxu0 %v1218_v2  ;;  %v1223_v7 = vld [vmem:[%s1361_s16 + $0xb0] sm:$0xff]   ;;  %v1227_v11 = vld [vmem:[%s1361_s16 + $0xa8] sm:$0xff]  }
  0x13   : > { %1129 = vmatpush3.bf16.msra.mxu1 %v1219_v3  ;;  %1066 = vmatprep.subr.bf16.mxu0 %v1220_v4  ;;  %v1228_v12 = vld [vmem:[%s1361_s16 + $0x60] sm:$0xff]   ;;  %v1232_v16 = vld [vmem:[%s1361_s16 + $0x58] sm:$0xff]   ;;  %v1236_v20 = vld [vmem:[%s1361_s16 + $0x50] sm:$0xff]  }
  0x14   : > { %1130 = vmatprep.subr.bf16.mxu1 %v1221_v5  ;;  %v1229_v13 = vld [vmem:[%s1361_s16 + $0xe0] sm:$0xff]   ;;  %v1233_v17 = vld [vmem:[%s1361_s16 + $0xd8] sm:$0xff]   ;;  %v1237_v21 = vld [vmem:[%s1361_s16 + $0xd0] sm:$0xff]  }
  0x15   : > { %v1230_v14 = vld [vmem:[%s1361_s16 + $0x20] sm:$0xff]   ;;  %v1234_v18 = vld [vmem:[%s1361_s16 + $0x18] sm:$0xff]   ;;  %v1238_v22 = vld [vmem:[%s1361_s16 + $0x10] sm:$0xff]  }
  0x16   : > { %1067 = vmatpush3.bf16.msra.mxu0 %v1222_v6  ;;  %v1231_v15 = vld [vmem:[%s1361_s16 + $0xa0] sm:$0xff]   ;;  %v1235_v19 = vld [vmem:[%s1361_s16 + $0x98] sm:$0xff]   ;;  %v1239_v23 = vld [vmem:[%s1361_s16 + $0x90] sm:$0xff]  }
  0x17   : > { %1131 = vmatpush3.bf16.msra.mxu1 %v1223_v7  ;;  %1068 = vmatprep.subr.bf16.mxu0 %v1224_v8  ;;  %v1240_v24 = vld [vmem:[%s1361_s16 + $0x48] sm:$0xff]   ;;  %v1244_v28 = vld [vmem:[%s1361_s16 + $0x40] sm:$0xff]  }
  0x18   : > { %1132 = vmatprep.subr.bf16.mxu1 %v1225_v9  ;;  %v1241_v25 = vld [vmem:[%s1361_s16 + $0xc8] sm:$0xff]   ;;  %v1245_v29 = vld [vmem:[%s1361_s16 + $0xc0] sm:$0xff]  }
  0x19   : > { %v1242_v26 = vld [vmem:[%s1361_s16 + $0x8] sm:$0xff]   ;;  %v1246_v30 = vld [vmem:[%s1361_s16] sm:$0xff]  }
  0x1a   : > { %1069 = vmatpush3.bf16.msra.mxu0 %v1226_v10  ;;  %v1243_v27 = vld [vmem:[%s1361_s16 + $0x88] sm:$0xff]   ;;  %v1247_v31 = vld [vmem:[%s1361_s16 + $0x80] sm:$0xff]  }
  0x1b   : > { %1133 = vmatpush3.bf16.msra.mxu1 %v1227_v11  ;;  %1070 = vmatprep.subr.bf16.mxu0 %v1228_v12  ;;  %v1248_v32 = vld [vmem:[%s1398_s19] ss:$16 sps:$4 sm:$0xff]   ;;  %v1250_v33 = vld [vmem:[%s1398_s19 + $0x4] ss:$16 sps:$4 sm:$0xff]   ;;  %v1251_v34 = vld [vmem:[%s1398_s19 + $0x8] ss:$16 sps:$4 sm:$0xff]  }
  0x1c   : > { %1134 = vmatprep.subr.bf16.mxu1 %v1229_v13  ;;  %v1253_v35 = vld [vmem:[%s1398_s19 + $0xc] ss:$16 sps:$4 sm:$0xff]   ;;  %687 = vmatprep.mubr.bf16.mxu0 %v1250_v33  ;;  %v1254_v36 = vld [vmem:[%s1398_s19 + $0x24] ss:$16 sps:$4 sm:$0xff]   ;;  %v1258_v38 = vld [vmem:[%s1398_s19 + $0x20] ss:$16 sps:$4 sm:$0xff]  }
  0x1d   : > { %784 = vmatprep.mubr.bf16.mxu1 %v1253_v35  ;;  %v1256_v37 = vld [vmem:[%s1398_s19 + $0x2c] ss:$16 sps:$4 sm:$0xff]   ;;  %v1259_v39 = vld [vmem:[%s1398_s19 + $0x28] ss:$16 sps:$4 sm:$0xff]   ;;  %v1260_v40 = vld [vmem:[%s1398_s19 + $0x44] ss:$16 sps:$4 sm:$0xff]  }
  0x1e   : > { %1071 = vmatpush3.bf16.msra.mxu0 %v1230_v14  ;;  %v1262_v41 = vld [vmem:[%s1398_s19 + $0x4c] ss:$16 sps:$4 sm:$0xff]   ;;  %v1264_v42 = vld [vmem:[%s1398_s19 + $0x40] ss:$16 sps:$4 sm:$0xff]   ;;  %v1265_v43 = vld [vmem:[%s1398_s19 + $0x48] ss:$16 sps:$4 sm:$0xff]  }
  0x1f   : > { %1135 = vmatpush3.bf16.msra.mxu1 %v1231_v15  ;;  %1072 = vmatprep.subr.bf16.mxu0 %v1232_v16  ;;  %v1266_v44 = vld [vmem:[%s1398_s19 + $0x64] ss:$16 sps:$4 sm:$0xff]   ;;  %v1268_v45 = vld [vmem:[%s1398_s19 + $0x6c] ss:$16 sps:$4 sm:$0xff]   ;;  %v1270_v46 = vld [vmem:[%s1398_s19 + $0x60] ss:$16 sps:$4 sm:$0xff]  }
  0x20   : > { %1136 = vmatprep.subr.bf16.mxu1 %v1233_v17  ;;  %v1271_v47 = vld [vmem:[%s1398_s19 + $0x68] ss:$16 sps:$4 sm:$0xff]   ;;  %v1272_v48 = vld [vmem:[%s1398_s19 + $0x84] ss:$16 sps:$4 sm:$0xff]   ;;  %v1274_v49 = vld [vmem:[%s1398_s19 + $0x8c] ss:$16 sps:$4 sm:$0xff]  }
  0x21   : > { %v1276_v50 = vld [vmem:[%s1398_s19 + $0x80] ss:$16 sps:$4 sm:$0xff]   ;;  %v1277_v51 = vld [vmem:[%s1398_s19 + $0x88] ss:$16 sps:$4 sm:$0xff]   ;;  %v1278_v52 = vld [vmem:[%s1398_s19 + $0xa4] ss:$16 sps:$4 sm:$0xff]  }
  0x22   : > { %1073 = vmatpush3.bf16.msra.mxu0 %v1234_v18  ;;  %v1280_v53 = vld [vmem:[%s1398_s19 + $0xac] ss:$16 sps:$4 sm:$0xff]   ;;  %v1282_v54 = vld [vmem:[%s1398_s19 + $0xa0] ss:$16 sps:$4 sm:$0xff]   ;;  %v1283_v55 = vld [vmem:[%s1398_s19 + $0xa8] ss:$16 sps:$4 sm:$0xff]  }
  0x23   : > { %1137 = vmatpush3.bf16.msra.mxu1 %v1235_v19  ;;  %1074 = vmatprep.subr.bf16.mxu0 %v1236_v20  ;;  %v1284_v56 = vld [vmem:[%s1398_s19 + $0xc4] ss:$16 sps:$4 sm:$0xff]   ;;  %v1286_v57 = vld [vmem:[%s1398_s19 + $0xcc] ss:$16 sps:$4 sm:$0xff]   ;;  %v1288_v58 = vld [vmem:[%s1398_s19 + $0xc0] ss:$16 sps:$4 sm:$0xff]  }
  0x24   : > { %1138 = vmatprep.subr.bf16.mxu1 %v1237_v21  ;;  %v1289_v59 = vld [vmem:[%s1398_s19 + $0xc8] ss:$16 sps:$4 sm:$0xff]   ;;  %v1290_v60 = vld [vmem:[%s1398_s19 + $0xe4] ss:$16 sps:$4 sm:$0xff]   ;;  %v1292_v61 = vld [vmem:[%s1398_s19 + $0xec] ss:$16 sps:$4 sm:$0xff]  }
  0x25   : > { %v1294_v62 = vld [vmem:[%s1398_s19 + $0xe0] ss:$16 sps:$4 sm:$0xff]   ;;  %v1295_v63 = vld [vmem:[%s1398_s19 + $0xe8] ss:$16 sps:$4 sm:$0xff]  }
  0x26   : > { %1075 = vmatpush3.bf16.msra.mxu0 %v1238_v22 }
  0x27   : > { %1139 = vmatpush3.bf16.msra.mxu1 %v1239_v23  ;;  %1076 = vmatprep.subr.bf16.mxu0 %v1240_v24 }
  0x28   : > { %1140 = vmatprep.subr.bf16.mxu1 %v1241_v25 }
  0x2a   : > { %1077 = vmatpush3.bf16.msra.mxu0 %v1242_v26 }
  0x2b   : > { %1141 = vmatpush3.bf16.msra.mxu1 %v1243_v27  ;;  %1078 = vmatprep.subr.bf16.mxu0 %v1244_v28 }
  0x2c   : > { %1142 = vmatprep.subr.bf16.mxu1 %v1245_v29 }
  0x2e   : > { %1079 = vmatpush3.bf16.msra.mxu0 %v1246_v30 }
  0x2f   : > { %1143 = vmatpush3.bf16.msra.mxu1 %v1247_v31 }
  0x31   : > { %688 = vmatmul.mubr.bf16.vlgmr.msra.gmra.mxu0 %v1248_v32 }
  0x32   : > { %785 = vmatmul.mubr.bf16.vlgmr.msra.gmra.mxu1 %v1251_v34  ;;  %695 = vmatprep.mubr.bf16.mxu0 %v1254_v36 }
  0x33   : > { %792 = vmatprep.mubr.bf16.mxu1 %v1256_v37 }
  0x39   : > { %696 = vmatmul.mubr.bf16.gmra.mxu0 %v1258_v38 }
  0x3a   : > { %793 = vmatmul.mubr.bf16.gmra.mxu1 %v1259_v39  ;;  %703 = vmatprep.mubr.bf16.mxu0 %v1260_v40 }
  0x3b   : > { %800 = vmatprep.mubr.bf16.mxu1 %v1262_v41 }
  0x41   : > { %704 = vmatmul.mubr.bf16.gmra.mxu0 %v1264_v42 }
  0x42   : > { %801 = vmatmul.mubr.bf16.gmra.mxu1 %v1265_v43  ;;  %711 = vmatprep.mubr.bf16.mxu0 %v1266_v44 }
  0x43   : > { %808 = vmatprep.mubr.bf16.mxu1 %v1268_v45 }
  0x49   : > { %712 = vmatmul.mubr.bf16.gmra.mxu0 %v1270_v46 }
  0x4a   : > { %809 = vmatmul.mubr.bf16.gmra.mxu1 %v1271_v47  ;;  %719 = vmatprep.mubr.bf16.mxu0 %v1272_v48 }
  0x4b   : > { %816 = vmatprep.mubr.bf16.mxu1 %v1274_v49 }
  0x51   : > { %720 = vmatmul.mubr.bf16.gmra.mxu0 %v1276_v50 }
  0x52   : > { %817 = vmatmul.mubr.bf16.gmra.mxu1 %v1277_v51  ;;  %727 = vmatprep.mubr.bf16.mxu0 %v1278_v52 }
  0x53   : > { %824 = vmatprep.mubr.bf16.mxu1 %v1280_v53 }
  0x59   : > { %728 = vmatmul.mubr.bf16.gmra.mxu0 %v1282_v54 }
  0x5a   : > { %825 = vmatmul.mubr.bf16.gmra.mxu1 %v1283_v55  ;;  %735 = vmatprep.mubr.bf16.mxu0 %v1284_v56 }
  0x5b   : > { %832 = vmatprep.mubr.bf16.mxu1 %v1286_v57 }
  0x61   : > { %736 = vmatmul.mubr.bf16.gmra.mxu0 %v1288_v58 }
  0x62   : > { %833 = vmatmul.mubr.bf16.gmra.mxu1 %v1289_v59  ;;  %743 = vmatprep.mubr.bf16.mxu0 %v1290_v60 }
  0x63   : > { %840 = vmatprep.mubr.bf16.mxu1 %v1292_v61 }
  0x69   : > { %744 = vmatmul.mubr.bf16.gmra.mxu0 %v1294_v62 }
  0x6a   : > { %841 = vmatmul.mubr.bf16.gmra.mxu1 %v1295_v63 }
  0xf1   : > { %v1080_v0 = vpop.f32.mrf.mxu0 }
  0xf2   : > { %v1144_v1 = vpop.f32.mrf.mxu1 }
  0xf3   : > { %v1081_v2 = vpop.f32.mrf.mxu0 }
  0xf4   : > { %v1082_v3 = vadd.f32 %v1081_v2, %v1080_v0  ;;  %v1145_v4 = vpop.f32.mrf.mxu1 }
  0xf5   : > { %v1146_v5 = vadd.f32 %v1145_v4, %v1144_v1  ;;  %v1083_v6 = vpop.f32.mrf.mxu0 }
  0xf6   : > { %v1147_v7 = vpop.f32.mrf.mxu1 }
  0xf7   : > { %v787_v8 = vadd.f32 %v1146_v5, %v1082_v3  ;;  %v1084_v9 = vpop.f32.mrf.mxu0 }
  0xf8   : > { %v1085_v10 = vadd.f32 %v1084_v9, %v1083_v6  ;;  %v1148_v11 = vpop.f32.mrf.mxu1 }
  0xf9   : > { %v849_v12 = vmax.f32 %v787_v8, 0.0  ;;  %v1149_v13 = vadd.f32 %v1148_v11, %v1147_v7  ;;  %v1086_v14 = vpop.f32.mrf.mxu0 }
  0xfa   : > { %v1150_v15 = vpop.f32.mrf.mxu1 }
  0xfb   : > { %866 = vst.msk [vmem:[%s1438_s23] sm:$0xff] %vm865_vm0, %v849_v12  ;;  %v790_v16 = vadd.f32 %v1149_v13, %v1085_v10  ;;  %v1087_v17 = vpop.f32.mrf.mxu0 }
  0xfc   : > { %v1088_v18 = vadd.f32 %v1087_v17, %v1086_v14  ;;  %v1151_v19 = vpop.f32.mrf.mxu1 }
  0xfd   : > { %v850_v20 = vmax.f32 %v790_v16, 0.0  ;;  %v1152_v21 = vadd.f32 %v1151_v19, %v1150_v15  ;;  %v1089_v22 = vpop.f32.mrf.mxu0 }
  0xfe   : > { %v1153_v23 = vpop.f32.mrf.mxu1 }
  0xff   : > { %867 = vst.msk [vmem:[%s1438_s23 + $0x8] sm:$0xff] %vm865_vm0, %v850_v20  ;;  %v795_v24 = vadd.f32 %v1152_v21, %v1088_v18  ;;  %v1090_v25 = vpop.f32.mrf.mxu0 }
 0x100   : > { %v1091_v26 = vadd.f32 %v1090_v25, %v1089_v22  ;;  %v1154_v27 = vpop.f32.mrf.mxu1 }
 0x101   : > { %v851_v28 = vmax.f32 %v795_v24, 0.0  ;;  %v1155_v29 = vadd.f32 %v1154_v27, %v1153_v23  ;;  %v1092_v30 = vpop.f32.mrf.mxu0 }
 0x102   : > { %v1156_v31 = vpop.f32.mrf.mxu1 }
 0x103   : > { %868 = vst.msk [vmem:[%s1438_s23 + $0x10] sm:$0xff] %vm865_vm0, %v851_v28  ;;  %v798_v32 = vadd.f32 %v1155_v29, %v1091_v26  ;;  %v1093_v33 = vpop.f32.mrf.mxu0 }
 0x104   : > { %v1094_v34 = vadd.f32 %v1093_v33, %v1092_v30  ;;  %v1157_v35 = vpop.f32.mrf.mxu1 }
 0x105   : > { %v852_v36 = vmax.f32 %v798_v32, 0.0  ;;  %v1158_v37 = vadd.f32 %v1157_v35, %v1156_v31  ;;  %v1095_v38 = vpop.f32.mrf.mxu0 }
 0x106   : > { %v1159_v39 = vpop.f32.mrf.mxu1 }
 0x107   : > { %869 = vst.msk [vmem:[%s1438_s23 + $0x18] sm:$0xff] %vm865_vm0, %v852_v36  ;;  %v803_v40 = vadd.f32 %v1158_v37, %v1094_v34  ;;  %v1096_v41 = vpop.f32.mrf.mxu0 }
 0x108   : > { %v1097_v42 = vadd.f32 %v1096_v41, %v1095_v38  ;;  %v1160_v43 = vpop.f32.mrf.mxu1 }
 0x109   : > { %v853_v44 = vmax.f32 %v803_v40, 0.0  ;;  %v1161_v45 = vadd.f32 %v1160_v43, %v1159_v39  ;;  %v1098_v46 = vpop.f32.mrf.mxu0 }
 0x10a   : > { %v1162_v47 = vpop.f32.mrf.mxu1 }
 0x10b   : > { %870 = vst.msk [vmem:[%s1438_s23 + $0x20] sm:$0xff] %vm865_vm0, %v853_v44  ;;  %v806_v48 = vadd.f32 %v1161_v45, %v1097_v42  ;;  %v1099_v49 = vpop.f32.mrf.mxu0 }
 0x10c   : > { %v1100_v50 = vadd.f32 %v1099_v49, %v1098_v46  ;;  %v1163_v51 = vpop.f32.mrf.mxu1 }
 0x10d   : > { %v854_v52 = vmax.f32 %v806_v48, 0.0  ;;  %v1164_v53 = vadd.f32 %v1163_v51, %v1162_v47  ;;  %v1101_v54 = vpop.f32.mrf.mxu0 }
 0x10e   : > { %v1165_v55 = vpop.f32.mrf.mxu1 }
 0x10f   : > { %871 = vst.msk [vmem:[%s1438_s23 + $0x28] sm:$0xff] %vm865_vm0, %v854_v52  ;;  %v811_v56 = vadd.f32 %v1164_v53, %v1100_v50  ;;  %v1102_v57 = vpop.f32.mrf.mxu0 }
 0x110   : > { %v1103_v58 = vadd.f32 %v1102_v57, %v1101_v54  ;;  %v1166_v59 = vpop.f32.mrf.mxu1 }
 0x111   : > { %v855_v60 = vmax.f32 %v811_v56, 0.0  ;;  %v1167_v61 = vadd.f32 %v1166_v59, %v1165_v55  ;;  %v1104_v62 = vpop.f32.mrf.mxu0 }
 0x112   : > { %v1168_v63 = vpop.f32.mrf.mxu1 }
 0x113   : > { %872 = vst.msk [vmem:[%s1438_s23 + $0x30] sm:$0xff] %vm865_vm0, %v855_v60  ;;  %v814_v0 = vadd.f32 %v1167_v61, %v1103_v58  ;;  %v1105_v1 = vpop.f32.mrf.mxu0 }
 0x114   : > { %v1106_v2 = vadd.f32 %v1105_v1, %v1104_v62  ;;  %v1169_v3 = vpop.f32.mrf.mxu1 }
 0x115   : > { %v856_v4 = vmax.f32 %v814_v0, 0.0  ;;  %v1170_v5 = vadd.f32 %v1169_v3, %v1168_v63  ;;  %v1107_v6 = vpop.f32.mrf.mxu0 }
 0x116   : > { %v1171_v7 = vpop.f32.mrf.mxu1 }
 0x117   : > { %873 = vst.msk [vmem:[%s1438_s23 + $0x38] sm:$0xff] %vm865_vm0, %v856_v4  ;;  %v819_v8 = vadd.f32 %v1170_v5, %v1106_v2  ;;  %v1108_v9 = vpop.f32.mrf.mxu0 }
 0x118   : > { %v1109_v10 = vadd.f32 %v1108_v9, %v1107_v6  ;;  %v1172_v11 = vpop.f32.mrf.mxu1 }
 0x119   : > { %v857_v12 = vmax.f32 %v819_v8, 0.0  ;;  %v1173_v13 = vadd.f32 %v1172_v11, %v1171_v7  ;;  %v1110_v14 = vpop.f32.mrf.mxu0 }
 0x11a   : > { %v1174_v15 = vpop.f32.mrf.mxu1 }
 0x11b   : > { %874 = vst.msk [vmem:[%s1438_s23 + $0x40] sm:$0xff] %vm865_vm0, %v857_v12  ;;  %v822_v16 = vadd.f32 %v1173_v13, %v1109_v10  ;;  %v1111_v17 = vpop.f32.mrf.mxu0 }
 0x11c   : > { %v1112_v18 = vadd.f32 %v1111_v17, %v1110_v14  ;;  %v1175_v19 = vpop.f32.mrf.mxu1 }
 0x11d   : > { %v858_v20 = vmax.f32 %v822_v16, 0.0  ;;  %v1176_v21 = vadd.f32 %v1175_v19, %v1174_v15  ;;  %v1113_v22 = vpop.f32.mrf.mxu0 }
 0x11e   : > { %v1177_v23 = vpop.f32.mrf.mxu1 }
 0x11f   : > { %875 = vst.msk [vmem:[%s1438_s23 + $0x48] sm:$0xff] %vm865_vm0, %v858_v20  ;;  %v827_v24 = vadd.f32 %v1176_v21, %v1112_v18  ;;  %v1114_v25 = vpop.f32.mrf.mxu0 }
 0x120   : > { %v1115_v26 = vadd.f32 %v1114_v25, %v1113_v22  ;;  %v1178_v27 = vpop.f32.mrf.mxu1 }
 0x121   : > { %v859_v28 = vmax.f32 %v827_v24, 0.0  ;;  %v1179_v29 = vadd.f32 %v1178_v27, %v1177_v23  ;;  %v1116_v30 = vpop.f32.mrf.mxu0 }
 0x122   : > { %v1180_v31 = vpop.f32.mrf.mxu1 }
 0x123   : > { %876 = vst.msk [vmem:[%s1438_s23 + $0x50] sm:$0xff] %vm865_vm0, %v859_v28  ;;  %v830_v32 = vadd.f32 %v1179_v29, %v1115_v26  ;;  %v1117_v33 = vpop.f32.mrf.mxu0 }
 0x124   : > { %v1118_v34 = vadd.f32 %v1117_v33, %v1116_v30  ;;  %v1181_v35 = vpop.f32.mrf.mxu1 }
 0x125   : > { %v860_v36 = vmax.f32 %v830_v32, 0.0  ;;  %v1182_v37 = vadd.f32 %v1181_v35, %v1180_v31  ;;  %v1119_v38 = vpop.f32.mrf.mxu0 }
 0x126   : > { %v1183_v39 = vpop.f32.mrf.mxu1 }
 0x127   : > { %877 = vst.msk [vmem:[%s1438_s23 + $0x58] sm:$0xff] %vm865_vm0, %v860_v36  ;;  %v835_v40 = vadd.f32 %v1182_v37, %v1118_v34  ;;  %v1120_v41 = vpop.f32.mrf.mxu0 }
 0x128   : > { %v1121_v42 = vadd.f32 %v1120_v41, %v1119_v38  ;;  %v1184_v43 = vpop.f32.mrf.mxu1 }
 0x129   : > { %v861_v44 = vmax.f32 %v835_v40, 0.0  ;;  %v1185_v45 = vadd.f32 %v1184_v43, %v1183_v39  ;;  %v1122_v46 = vpop.f32.mrf.mxu0 }
 0x12a   : > { %v1186_v47 = vpop.f32.mrf.mxu1 }
 0x12b   : > { %878 = vst.msk [vmem:[%s1438_s23 + $0x60] sm:$0xff] %vm865_vm0, %v861_v44  ;;  %v838_v48 = vadd.f32 %v1185_v45, %v1121_v42  ;;  %v1123_v49 = vpop.f32.mrf.mxu0 }
 0x12c   : > { %v1124_v50 = vadd.f32 %v1123_v49, %v1122_v46  ;;  %v1187_v51 = vpop.f32.mrf.mxu1 }
 0x12d   : > { %v862_v52 = vmax.f32 %v838_v48, 0.0  ;;  %v1188_v53 = vadd.f32 %v1187_v51, %v1186_v47  ;;  %v1125_v54 = vpop.f32.mrf.mxu0 }
 0x12e   : > { %v1189_v55 = vpop.f32.mrf.mxu1 }
 0x12f   : > { %879 = vst.msk [vmem:[%s1438_s23 + $0x68] sm:$0xff] %vm865_vm0, %v862_v52  ;;  %v843_v56 = vadd.f32 %v1188_v53, %v1124_v50  ;;  %v1126_v57 = vpop.f32.mrf.mxu0 }
 0x130   : > { %v1127_v58 = vadd.f32 %v1126_v57, %v1125_v54  ;;  %v1190_v59 = vpop.f32.mrf.mxu1 }
 0x131   : > { %v863_v60 = vmax.f32 %v843_v56, 0.0  ;;  %v1191_v61 = vadd.f32 %v1190_v59, %v1189_v55 }
 0x133   : > { %880 = vst.msk [vmem:[%s1438_s23 + $0x70] sm:$0xff] %vm865_vm0, %v863_v60  ;;  %v846_v62 = vadd.f32 %v1191_v61, %v1127_v58 }
 0x135   : > { %v864_v63 = vmax.f32 %v846_v62, 0.0 }
 0x137   : > { %881 = vst.msk [vmem:[%s1438_s23 + $0x78] sm:$0xff] %vm865_vm0, %v864_v63 }
 0x138 PF: > { %s12_s11 = sadd.s32 1, %s1318_s11   ;;  %s1484_s9 = smov %s1314_s10 }
 0x139   : > { %p9_p5 = scmp.ge.s32.totalorder %s12_s11, 6   ;;  %s1485_s10 = smov %s1487_s12 }
 0x13b   :  { %11 = sbr.rel (!%p9_p5) target bundleno = 2 (0x2), region = 61 }

// kernel: generator_forward.7
= control target key start
LH: loop header
LB: loop body
LE: loop exit
PB: predicated region body
PF: predicated region fallthrough
CT: control target
= control target key end

     0   :  { %s1711_s12 = smov 0   ;;  %s1713_s13 = smov 0   ;;  %s2006_s0 = inlined_call_operand.vmem [shape: bf16[4,512,256], index: 0, kind: input, shape index: {}]   ;;  %s2007_s1 = inlined_call_operand.vmem [shape: bf16[4,256,128], index: 1, kind: input, shape index: {}]   ;;  %s2008_s2 = inlined_call_operand.vmem [shape: f32[1,1,128], index: 2, kind: input, shape index: {}]   ;;  %s2009_s3 = inlined_call_operand.vmem [shape: f32[4,512,128], index: 3, kind: output, shape index: {}]  }
   0x1   :  { %s1715_s14 = smov 0  }
   0x2 LB: > { %s25_s15 = sadd.s32 1, %s1684_s13  ;;  %p1276_p0 = scmp.ge.s32.totalorder %s1688_s14, 1  ;;  %s1688_s14 = sphi %s1715_s14, %s13_s14   ;;  %s1684_s13 = sphi %s1713_s13, %s2011_s13   ;;  %s1680_s12 = sphi %s1711_s12, %s2010_s12  }
   0x3   : > { %p27_p1 = scmp.ge.s32.totalorder %s25_s15, 4  ;;  %p169_p2 = scmp.lt.s32.totalorder %s1688_s14, 5 }
   0x5   : > { %s2013_s15 = smov (%p27_p1, %s25_s15), 0  ;;  %p170_p3 = pnand %p1276_p0, %p169_p2 }
   0x6   : > { %p208_p4 = scmp.lt.s32.totalorder (!%p170_p3), %s1680_s12, 3 }
   0x7   : > { %173 = sbr.rel (%p170_p3) target bundleno = 414 (0x19e), region = 32 }
   0xc   : > { %v1690_v0 = vmov 0   ;;  %s2015_s12 = smov (!%p208_p4, %s1680_s12), 3 }
   0xd   : > { %753 = vmatprep.subr.bf16.mxu0 %v1690_v0  ;;  %1369 = vmatprep.subr.bf16.mxu1 %v1690_v0  ;;  %s1367_s16 = sshll.u32 %s2015_s12, 7  ;;  %s1366_s20 = sshll.u32 %s2015_s12, 9 }
   0xe   : > { %s1737_s19 = scalar_lea.vmem %s2007_s1, %s1367_s16  ;;  %s1756_s23 = scalar_lea.vmem %s2006_s0, %s1366_s20 }
   0xf   : > { %v1426_v1 = vld [vmem:[%s1737_s19 + $0x38] sm:$0xff]   ;;  %v1427_v2 = vld [vmem:[%s1737_s19 + $0x30] sm:$0xff]   ;;  %v1428_v3 = vld [vmem:[%s1737_s19 + $0x28] sm:$0xff]   ;;  %s1875_s28 = scalar_lea.vmem %s2009_s3, %s1366_s20 }
  0x10   : > { %754 = vmatpush1.bf16.msra.mxu0 %v1426_v1  ;;  %1385 = vmatpush1.bf16.msra.mxu1 %v1426_v1  ;;  %v1429_v4 = vld [vmem:[%s1737_s19 + $0x20] sm:$0xff]   ;;  %v1430_v5 = vld [vmem:[%s1737_s19 + $0x18] sm:$0xff]   ;;  %v1431_v7 = vld [vmem:[%s1737_s19 + $0x10] sm:$0xff]  }
  0x11   : > { %755 = vmatprep.subr.bf16.mxu0 %v1690_v0  ;;  %1370 = vmatprep.subr.bf16.mxu1 %v1690_v0  ;;  %v1444_v6 = vld [vmem:[%s1756_s23 + $0x4] ss:$8 sps:$4 sm:$0xff]   ;;  %v1434_v11 = vld [vmem:[%s1737_s19 + $0x78] sm:$0xff]   ;;  %v1435_v12 = vld [vmem:[%s1737_s19 + $0x70] sm:$0xff]  }
  0x12   : > { %v1447_v8 = vld [vmem:[%s1756_s23 + $0x104] ss:$8 sps:$4 sm:$0xff]   ;;  %785 = vmatprep.mubr.bf16.mxu0 %v1444_v6  ;;  %v1438_v15 = vld [vmem:[%s1737_s19 + $0x58] sm:$0xff]   ;;  %v1439_v16 = vld [vmem:[%s1737_s19 + $0x50] sm:$0xff]  }
  0x13   : > { %913 = vmatprep.mubr.bf16.mxu1 %v1447_v8  ;;  %v1432_v9 = vld [vmem:[%s1737_s19 + $0x8] sm:$0xff]   ;;  %v1433_v10 = vld [vmem:[%s1737_s19] sm:$0xff]   ;;  %v1448_v21 = vld [vmem:[%s1756_s23 + $0x14] ss:$8 sps:$4 sm:$0xff]  }
  0x14   : > { %756 = vmatpush1.bf16.msra.mxu0 %v1427_v2  ;;  %1386 = vmatpush1.bf16.msra.mxu1 %v1427_v2  ;;  %v1436_v13 = vld [vmem:[%s1737_s19 + $0x68] sm:$0xff]   ;;  %v1437_v14 = vld [vmem:[%s1737_s19 + $0x60] sm:$0xff]   ;;  %v1450_v22 = vld [vmem:[%s1756_s23 + $0x114] ss:$8 sps:$4 sm:$0xff]  }
  0x15   : > { %757 = vmatprep.subr.bf16.mxu0 %v1690_v0  ;;  %1371 = vmatprep.subr.bf16.mxu1 %v1690_v0  ;;  %v1440_v17 = vld [vmem:[%s1737_s19 + $0x48] sm:$0xff]   ;;  %v1441_v18 = vld [vmem:[%s1737_s19 + $0x40] sm:$0xff]   ;;  %v1452_v23 = vld [vmem:[%s1756_s23 + $0x10] ss:$8 sps:$4 sm:$0xff]  }
  0x16   : > { %v1442_v19 = vld [vmem:[%s1756_s23] ss:$8 sps:$4 sm:$0xff]   ;;  %v1453_v24 = vld [vmem:[%s1756_s23 + $0x110] ss:$8 sps:$4 sm:$0xff]   ;;  %v1454_v25 = vld [vmem:[%s1756_s23 + $0x24] ss:$8 sps:$4 sm:$0xff]  }
  0x17   : > { %v1445_v20 = vld [vmem:[%s1756_s23 + $0x100] ss:$8 sps:$4 sm:$0xff]   ;;  %v1456_v26 = vld [vmem:[%s1756_s23 + $0x124] ss:$8 sps:$4 sm:$0xff]   ;;  %v1460_v29 = vld [vmem:[%s1756_s23 + $0x34] ss:$8 sps:$4 sm:$0xff]  }
  0x18   : > { %758 = vmatpush1.bf16.msra.mxu0 %v1428_v3  ;;  %1387 = vmatpush1.bf16.msra.mxu1 %v1428_v3  ;;  %v1458_v27 = vld [vmem:[%s1756_s23 + $0x20] ss:$8 sps:$4 sm:$0xff]   ;;  %v1462_v30 = vld [vmem:[%s1756_s23 + $0x134] ss:$8 sps:$4 sm:$0xff]   ;;  %v1464_v31 = vld [vmem:[%s1756_s23 + $0x30] ss:$8 sps:$4 sm:$0xff]  }
  0x19   : > { %759 = vmatprep.subr.bf16.mxu0 %v1690_v0  ;;  %1372 = vmatprep.subr.bf16.mxu1 %v1690_v0  ;;  %v1459_v28 = vld [vmem:[%s1756_s23 + $0x120] ss:$8 sps:$4 sm:$0xff]   ;;  %v1465_v32 = vld [vmem:[%s1756_s23 + $0x130] ss:$8 sps:$4 sm:$0xff]   ;;  %v1466_v33 = vld [vmem:[%s1756_s23 + $0x44] ss:$8 sps:$4 sm:$0xff]  }
  0x1a   : > { %v1468_v34 = vld [vmem:[%s1756_s23 + $0x144] ss:$8 sps:$4 sm:$0xff]   ;;  %v1470_v35 = vld [vmem:[%s1756_s23 + $0x40] ss:$8 sps:$4 sm:$0xff]   ;;  %v1472_v37 = vld [vmem:[%s1756_s23 + $0x54] ss:$8 sps:$4 sm:$0xff]  }
  0x1b   : > { %v1471_v36 = vld [vmem:[%s1756_s23 + $0x140] ss:$8 sps:$4 sm:$0xff]   ;;  %v1474_v38 = vld [vmem:[%s1756_s23 + $0x154] ss:$8 sps:$4 sm:$0xff]   ;;  %v1476_v39 = vld [vmem:[%s1756_s23 + $0x50] ss:$8 sps:$4 sm:$0xff]  }
  0x1c   : > { %760 = vmatpush1.bf16.msra.mxu0 %v1429_v4  ;;  %1388 = vmatpush1.bf16.msra.mxu1 %v1429_v4  ;;  %v1477_v40 = vld [vmem:[%s1756_s23 + $0x150] ss:$8 sps:$4 sm:$0xff]   ;;  %v1478_v41 = vld [vmem:[%s1756_s23 + $0x64] ss:$8 sps:$4 sm:$0xff]   ;;  %v1482_v43 = vld [vmem:[%s1756_s23 + $0x60] ss:$8 sps:$4 sm:$0xff]  }
  0x1d   : > { %761 = vmatprep.subr.bf16.mxu0 %v1690_v0  ;;  %1373 = vmatprep.subr.bf16.mxu1 %v1690_v0  ;;  %v1480_v42 = vld [vmem:[%s1756_s23 + $0x164] ss:$8 sps:$4 sm:$0xff]   ;;  %v1483_v44 = vld [vmem:[%s1756_s23 + $0x160] ss:$8 sps:$4 sm:$0xff]   ;;  %v1484_v45 = vld [vmem:[%s1756_s23 + $0x74] ss:$8 sps:$4 sm:$0xff]  }
  0x1e   : > { %v1486_v46 = vld [vmem:[%s1756_s23 + $0x174] ss:$8 sps:$4 sm:$0xff]   ;;  %v1488_v47 = vld [vmem:[%s1756_s23 + $0x70] ss:$8 sps:$4 sm:$0xff]   ;;  %v1490_v49 = vld [vmem:[%s1756_s23 + $0x84] ss:$8 sps:$4 sm:$0xff]  }
  0x1f   : > { %v1489_v48 = vld [vmem:[%s1756_s23 + $0x170] ss:$8 sps:$4 sm:$0xff]   ;;  %v1492_v50 = vld [vmem:[%s1756_s23 + $0x184] ss:$8 sps:$4 sm:$0xff]   ;;  %v1494_v51 = vld [vmem:[%s1756_s23 + $0x80] ss:$8 sps:$4 sm:$0xff]  }
  0x20   : > { %762 = vmatpush1.bf16.msra.mxu0 %v1430_v5  ;;  %1389 = vmatpush1.bf16.msra.mxu1 %v1430_v5  ;;  %v1495_v52 = vld [vmem:[%s1756_s23 + $0x180] ss:$8 sps:$4 sm:$0xff]   ;;  %v1496_v53 = vld [vmem:[%s1756_s23 + $0x94] ss:$8 sps:$4 sm:$0xff]   ;;  %v1500_v55 = vld [vmem:[%s1756_s23 + $0x90] ss:$8 sps:$4 sm:$0xff]  }
  0x21   : > { %763 = vmatprep.subr.bf16.mxu0 %v1690_v0  ;;  %1374 = vmatprep.subr.bf16.mxu1 %v1690_v0  ;;  %v1498_v54 = vld [vmem:[%s1756_s23 + $0x194] ss:$8 sps:$4 sm:$0xff]   ;;  %v1501_v56 = vld [vmem:[%s1756_s23 + $0x190] ss:$8 sps:$4 sm:$0xff]   ;;  %v1502_v57 = vld [vmem:[%s1756_s23 + $0xa4] ss:$8 sps:$4 sm:$0xff]  }
  0x22   : > { %v1504_v58 = vld [vmem:[%s1756_s23 + $0x1a4] ss:$8 sps:$4 sm:$0xff]   ;;  %v1506_v59 = vld [vmem:[%s1756_s23 + $0xa0] ss:$8 sps:$4 sm:$0xff]   ;;  %v1508_v61 = vld [vmem:[%s1756_s23 + $0xb4] ss:$8 sps:$4 sm:$0xff]  }
  0x23   : > { %v1507_v60 = vld [vmem:[%s1756_s23 + $0x1a0] ss:$8 sps:$4 sm:$0xff]   ;;  %v1510_v62 = vld [vmem:[%s1756_s23 + $0x1b4] ss:$8 sps:$4 sm:$0xff]   ;;  %v1512_v63 = vld [vmem:[%s1756_s23 + $0xb0] ss:$8 sps:$4 sm:$0xff]  }
  0x24   : > { %764 = vmatpush1.bf16.msra.mxu0 %v1431_v7  ;;  %1390 = vmatpush1.bf16.msra.mxu1 %v1431_v7  ;;  %v1514_v1 = vld [vmem:[%s1756_s23 + $0xc4] ss:$8 sps:$4 sm:$0xff]   ;;  %v1518_v3 = vld [vmem:[%s1756_s23 + $0xc0] ss:$8 sps:$4 sm:$0xff]   ;;  %v1520_v5 = vld [vmem:[%s1756_s23 + $0xd4] ss:$8 sps:$4 sm:$0xff]  }
  0x25   : > { %765 = vmatprep.subr.bf16.mxu0 %v1690_v0  ;;  %1375 = vmatprep.subr.bf16.mxu1 %v1690_v0  ;;  %v1516_v2 = vld [vmem:[%s1756_s23 + $0x1c4] ss:$8 sps:$4 sm:$0xff]   ;;  %v1519_v4 = vld [vmem:[%s1756_s23 + $0x1c0] ss:$8 sps:$4 sm:$0xff]   ;;  %v1522_v6 = vld [vmem:[%s1756_s23 + $0x1d4] ss:$8 sps:$4 sm:$0xff]  }
  0x26   : > { %v1524_v7 = vld [vmem:[%s1756_s23 + $0xd0] ss:$8 sps:$4 sm:$0xff]  }
  0x27   : > { %v1525_v8 = vld [vmem:[%s1756_s23 + $0x1d0] ss:$8 sps:$4 sm:$0xff]  }
  0x28   : > { %766 = vmatpush1.bf16.msra.mxu0 %v1432_v9  ;;  %1391 = vmatpush1.bf16.msra.mxu1 %v1432_v9  ;;  %v1526_v9 = vld [vmem:[%s1756_s23 + $0xe4] ss:$8 sps:$4 sm:$0xff]  }
  0x29   : > { %767 = vmatprep.subr.bf16.mxu0 %v1690_v0  ;;  %1376 = vmatprep.subr.bf16.mxu1 %v1690_v0 }
  0x2c   : > { %768 = vmatpush1.bf16.msra.mxu0 %v1433_v10  ;;  %1392 = vmatpush1.bf16.msra.mxu1 %v1433_v10  ;;  %v1528_v10 = vld [vmem:[%s1756_s23 + $0x1e4] ss:$8 sps:$4 sm:$0xff]  }
  0x2d   : > { %769 = vmatprep.subr.bf16.mxu0 %v1690_v0  ;;  %1377 = vmatprep.subr.bf16.mxu1 %v1690_v0 }
  0x30   : > { %770 = vmatpush2.bf16.msra.mxu0 %v1434_v11  ;;  %1393 = vmatpush2.bf16.msra.mxu1 %v1434_v11  ;;  %v1530_v11 = vld [vmem:[%s1756_s23 + $0xe0] ss:$8 sps:$4 sm:$0xff]  }
  0x31   : > { %771 = vmatprep.subr.bf16.mxu0 %v1690_v0  ;;  %1378 = vmatprep.subr.bf16.mxu1 %v1690_v0 }
  0x34   : > { %772 = vmatpush2.bf16.msra.mxu0 %v1435_v12  ;;  %1394 = vmatpush2.bf16.msra.mxu1 %v1435_v12  ;;  %v1531_v12 = vld [vmem:[%s1756_s23 + $0x1e0] ss:$8 sps:$4 sm:$0xff]  }
  0x35   : > { %773 = vmatprep.subr.bf16.mxu0 %v1690_v0  ;;  %1379 = vmatprep.subr.bf16.mxu1 %v1690_v0 }
  0x38   : > { %774 = vmatpush2.bf16.msra.mxu0 %v1436_v13  ;;  %1395 = vmatpush2.bf16.msra.mxu1 %v1436_v13  ;;  %v1532_v13 = vld [vmem:[%s1756_s23 + $0xf4] ss:$8 sps:$4 sm:$0xff]  }
  0x39   : > { %775 = vmatprep.subr.bf16.mxu0 %v1690_v0  ;;  %1380 = vmatprep.subr.bf16.mxu1 %v1690_v0 }
  0x3c   : > { %776 = vmatpush2.bf16.msra.mxu0 %v1437_v14  ;;  %1396 = vmatpush2.bf16.msra.mxu1 %v1437_v14  ;;  %v1534_v14 = vld [vmem:[%s1756_s23 + $0x1f4] ss:$8 sps:$4 sm:$0xff]  }
  0x3d   : > { %777 = vmatprep.subr.bf16.mxu0 %v1690_v0  ;;  %1381 = vmatprep.subr.bf16.mxu1 %v1690_v0 }
  0x40   : > { %778 = vmatpush2.bf16.msra.mxu0 %v1438_v15  ;;  %1397 = vmatpush2.bf16.msra.mxu1 %v1438_v15  ;;  %v1536_v15 = vld [vmem:[%s1756_s23 + $0xf0] ss:$8 sps:$4 sm:$0xff]  }
  0x41   : > { %779 = vmatprep.subr.bf16.mxu0 %v1690_v0  ;;  %1382 = vmatprep.subr.bf16.mxu1 %v1690_v0 }
  0x44   : > { %780 = vmatpush2.bf16.msra.mxu0 %v1439_v16  ;;  %1398 = vmatpush2.bf16.msra.mxu1 %v1439_v16  ;;  %v1537_v16 = vld [vmem:[%s1756_s23 + $0x1f0] ss:$8 sps:$4 sm:$0xff]  }
  0x45   : > { %781 = vmatprep.subr.bf16.mxu0 %v1690_v0  ;;  %1383 = vmatprep.subr.bf16.mxu1 %v1690_v0 }
  0x48   : > { %782 = vmatpush2.bf16.msra.mxu0 %v1440_v17  ;;  %1399 = vmatpush2.bf16.msra.mxu1 %v1440_v17  ;;  %v1860_v17 = vld [vmem:[%s2008_s2] ss:$0 sm:$0xff] }
  0x49   : > { %783 = vmatprep.subr.bf16.mxu0 %v1690_v0  ;;  %1384 = vmatprep.subr.bf16.mxu1 %v1690_v0  ;;  %v1513_v0 = vld [vmem:[%s1756_s23 + $0x1b0] ss:$8 sps:$4 sm:$0xff]  }
  0x4c   : > { %784 = vmatpush2.bf16.msra.mxu0 %v1441_v18  ;;  %1400 = vmatpush2.bf16.msra.mxu1 %v1441_v18 }
  0x4f   : > { %786 = vmatmul.mubr.bf16.vlgmr.msra.gmra.mxu0 %v1442_v19  ;;  %914 = vmatmul.mubr.bf16.vlgmr.msra.gmra.mxu1 %v1445_v20 }
  0x50   : > { %793 = vmatprep.mubr.bf16.mxu0 %v1448_v21  ;;  %921 = vmatprep.mubr.bf16.mxu1 %v1450_v22 }
  0x57   : > { %794 = vmatmul.mubr.bf16.gmra.mxu0 %v1452_v23  ;;  %922 = vmatmul.mubr.bf16.gmra.mxu1 %v1453_v24 }
  0x58   : > { %801 = vmatprep.mubr.bf16.mxu0 %v1454_v25  ;;  %929 = vmatprep.mubr.bf16.mxu1 %v1456_v26 }
  0x5f   : > { %802 = vmatmul.mubr.bf16.gmra.mxu0 %v1458_v27  ;;  %930 = vmatmul.mubr.bf16.gmra.mxu1 %v1459_v28 }
  0x60   : > { %809 = vmatprep.mubr.bf16.mxu0 %v1460_v29  ;;  %937 = vmatprep.mubr.bf16.mxu1 %v1462_v30 }
  0x67   : > { %810 = vmatmul.mubr.bf16.gmra.mxu0 %v1464_v31  ;;  %938 = vmatmul.mubr.bf16.gmra.mxu1 %v1465_v32 }
  0x68   : > { %817 = vmatprep.mubr.bf16.mxu0 %v1466_v33  ;;  %945 = vmatprep.mubr.bf16.mxu1 %v1468_v34 }
  0x6f   : > { %818 = vmatmul.mubr.bf16.gmra.mxu0 %v1470_v35  ;;  %946 = vmatmul.mubr.bf16.gmra.mxu1 %v1471_v36 }
  0x70   : > { %825 = vmatprep.mubr.bf16.mxu0 %v1472_v37  ;;  %953 = vmatprep.mubr.bf16.mxu1 %v1474_v38 }
  0x77   : > { %826 = vmatmul.mubr.bf16.gmra.mxu0 %v1476_v39  ;;  %954 = vmatmul.mubr.bf16.gmra.mxu1 %v1477_v40 }
  0x78   : > { %833 = vmatprep.mubr.bf16.mxu0 %v1478_v41  ;;  %961 = vmatprep.mubr.bf16.mxu1 %v1480_v42 }
  0x7f   : > { %834 = vmatmul.mubr.bf16.gmra.mxu0 %v1482_v43  ;;  %962 = vmatmul.mubr.bf16.gmra.mxu1 %v1483_v44 }
  0x80   : > { %841 = vmatprep.mubr.bf16.mxu0 %v1484_v45  ;;  %969 = vmatprep.mubr.bf16.mxu1 %v1486_v46 }
  0x87   : > { %842 = vmatmul.mubr.bf16.gmra.mxu0 %v1488_v47  ;;  %970 = vmatmul.mubr.bf16.gmra.mxu1 %v1489_v48 }
  0x88   : > { %849 = vmatprep.mubr.bf16.mxu0 %v1490_v49  ;;  %977 = vmatprep.mubr.bf16.mxu1 %v1492_v50 }
  0x8f   : > { %850 = vmatmul.mubr.bf16.gmra.mxu0 %v1494_v51  ;;  %978 = vmatmul.mubr.bf16.gmra.mxu1 %v1495_v52 }
  0x90   : > { %857 = vmatprep.mubr.bf16.mxu0 %v1496_v53  ;;  %985 = vmatprep.mubr.bf16.mxu1 %v1498_v54 }
  0x97   : > { %858 = vmatmul.mubr.bf16.gmra.mxu0 %v1500_v55  ;;  %986 = vmatmul.mubr.bf16.gmra.mxu1 %v1501_v56 }
  0x98   : > { %865 = vmatprep.mubr.bf16.mxu0 %v1502_v57  ;;  %993 = vmatprep.mubr.bf16.mxu1 %v1504_v58 }
  0x9f   : > { %866 = vmatmul.mubr.bf16.gmra.mxu0 %v1506_v59  ;;  %994 = vmatmul.mubr.bf16.gmra.mxu1 %v1507_v60 }
  0xa0   : > { %873 = vmatprep.mubr.bf16.mxu0 %v1508_v61  ;;  %1001 = vmatprep.mubr.bf16.mxu1 %v1510_v62 }
  0xa7   : > { %874 = vmatmul.mubr.bf16.gmra.mxu0 %v1512_v63  ;;  %1002 = vmatmul.mubr.bf16.gmra.mxu1 %v1513_v0 }
  0xa8   : > { %881 = vmatprep.mubr.bf16.mxu0 %v1514_v1  ;;  %1009 = vmatprep.mubr.bf16.mxu1 %v1516_v2 }
  0xaf   : > { %882 = vmatmul.mubr.bf16.gmra.mxu0 %v1518_v3  ;;  %1010 = vmatmul.mubr.bf16.gmra.mxu1 %v1519_v4 }
  0xb0   : > { %889 = vmatprep.mubr.bf16.mxu0 %v1520_v5  ;;  %1017 = vmatprep.mubr.bf16.mxu1 %v1522_v6 }
  0xb7   : > { %890 = vmatmul.mubr.bf16.gmra.mxu0 %v1524_v7  ;;  %1018 = vmatmul.mubr.bf16.gmra.mxu1 %v1525_v8 }
  0xb8   : > { %897 = vmatprep.mubr.bf16.mxu0 %v1526_v9  ;;  %1025 = vmatprep.mubr.bf16.mxu1 %v1528_v10 }
  0xbf   : > { %898 = vmatmul.mubr.bf16.gmra.mxu0 %v1530_v11  ;;  %1026 = vmatmul.mubr.bf16.gmra.mxu1 %v1531_v12 }
  0xc0   : > { %905 = vmatprep.mubr.bf16.mxu0 %v1532_v13  ;;  %1033 = vmatprep.mubr.bf16.mxu1 %v1534_v14 }
  0xc7   : > { %906 = vmatmul.mubr.bf16.gmra.mxu0 %v1536_v15  ;;  %1034 = vmatmul.mubr.bf16.gmra.mxu1 %v1537_v16 }
 0x10f   : > { %v787_v18 = vpop.f32.mrf.mxu0  ;;  %v915_v19 = vpop.f32.mrf.mxu1 }
 0x110   : > { %v788_v20 = vadd.f32 %v1860_v17, %v787_v18  ;;  %v916_v21 = vadd.f32 %v1860_v17, %v915_v19 }
 0x111   : > { %v789_v22 = vpop.f32.mrf.mxu0  ;;  %v917_v23 = vpop.f32.mrf.mxu1 }
 0x112   : > { %1538 = vtanh.f32 %v788_v20 }
 0x113   : > { %1540 = vtanh.f32 %v916_v21  ;;  %v790_v24 = vpop.f32.mrf.mxu0  ;;  %v918_v25 = vpop.f32.mrf.mxu1 }
 0x114   : > { %v791_v26 = vadd.f32 %v1860_v17, %v790_v24  ;;  %v919_v27 = vadd.f32 %v1860_v17, %v918_v25 }
 0x115   : > { %v792_v28 = vpop.f32.mrf.mxu0  ;;  %v920_v29 = vpop.f32.mrf.mxu1 }
 0x116   : > { %1542 = vtanh.f32 %v791_v26 }
 0x117   : > { %1544 = vtanh.f32 %v919_v27  ;;  %v795_v30 = vpop.f32.mrf.mxu0  ;;  %v923_v31 = vpop.f32.mrf.mxu1 }
 0x118   : > { %v796_v32 = vadd.f32 %v1860_v17, %v795_v30  ;;  %v924_v33 = vadd.f32 %v1860_v17, %v923_v31 }
 0x119   : > { %v797_v34 = vpop.f32.mrf.mxu0  ;;  %v925_v35 = vpop.f32.mrf.mxu1 }
 0x11a   : > { %1546 = vtanh.f32 %v796_v32 }
 0x11b   : > { %1548 = vtanh.f32 %v924_v33  ;;  %v798_v36 = vpop.f32.mrf.mxu0  ;;  %v926_v37 = vpop.f32.mrf.mxu1 }
 0x11c   : > { %v799_v38 = vadd.f32 %v1860_v17, %v798_v36  ;;  %v927_v39 = vadd.f32 %v1860_v17, %v926_v37 }
 0x11d   : > { %v800_v40 = vpop.f32.mrf.mxu0  ;;  %v928_v41 = vpop.f32.mrf.mxu1 }
 0x11e   : > { %1550 = vtanh.f32 %v799_v38 }
 0x11f   : > { %v1539_v42 = vpop.eup %1538  ;;  %1552 = vtanh.f32 %v927_v39  ;;  %v803_v43 = vpop.f32.mrf.mxu0 }
 0x120   : > { %v931_v44 = vpop.f32.mrf.mxu1  ;;  %v1541_v45 = vpop.eup %1540  ;;  %1106 = vst [vmem:[%s1875_s28] sm:$0xff] %v1539_v42  ;;  %v804_v46 = vadd.f32 %v1860_v17, %v803_v43 }
 0x121   : > { %v932_v47 = vadd.f32 %v1860_v17, %v931_v44  ;;  %1138 = vst [vmem:[%s1875_s28 + $0x100] sm:$0xff] %v1541_v45  ;;  %v805_v48 = vpop.f32.mrf.mxu0 }
 0x122   : > { %v933_v49 = vpop.f32.mrf.mxu1  ;;  %1554 = vtanh.f32 %v804_v46 }
 0x123   : > { %v1543_v50 = vpop.eup %1542  ;;  %1556 = vtanh.f32 %v932_v47  ;;  %v806_v51 = vpop.f32.mrf.mxu0 }
 0x124   : > { %v934_v52 = vpop.f32.mrf.mxu1  ;;  %v1545_v53 = vpop.eup %1544  ;;  %1107 = vst [vmem:[%s1875_s28 + $0x8] sm:$0xff] %v1543_v50  ;;  %v807_v54 = vadd.f32 %v1860_v17, %v806_v51 }
 0x125   : > { %v935_v55 = vadd.f32 %v1860_v17, %v934_v52  ;;  %1139 = vst [vmem:[%s1875_s28 + $0x108] sm:$0xff] %v1545_v53  ;;  %v808_v56 = vpop.f32.mrf.mxu0 }
 0x126   : > { %v936_v57 = vpop.f32.mrf.mxu1  ;;  %1558 = vtanh.f32 %v807_v54 }
 0x127   : > { %v1547_v58 = vpop.eup %1546  ;;  %1560 = vtanh.f32 %v935_v55  ;;  %v811_v59 = vpop.f32.mrf.mxu0 }
 0x128   : > { %v939_v60 = vpop.f32.mrf.mxu1  ;;  %v1549_v61 = vpop.eup %1548  ;;  %1108 = vst [vmem:[%s1875_s28 + $0x10] sm:$0xff] %v1547_v58  ;;  %v812_v62 = vadd.f32 %v1860_v17, %v811_v59 }
 0x129   : > { %v940_v63 = vadd.f32 %v1860_v17, %v939_v60  ;;  %1140 = vst [vmem:[%s1875_s28 + $0x110] sm:$0xff] %v1549_v61  ;;  %v813_v0 = vpop.f32.mrf.mxu0 }
 0x12a   : > { %v941_v1 = vpop.f32.mrf.mxu1  ;;  %1562 = vtanh.f32 %v812_v62 }
 0x12b   : > { %v1551_v2 = vpop.eup %1550  ;;  %1564 = vtanh.f32 %v940_v63  ;;  %v814_v3 = vpop.f32.mrf.mxu0 }
 0x12c   : > { %v942_v4 = vpop.f32.mrf.mxu1  ;;  %v1553_v5 = vpop.eup %1552  ;;  %1109 = vst [vmem:[%s1875_s28 + $0x18] sm:$0xff] %v1551_v2  ;;  %v815_v6 = vadd.f32 %v1860_v17, %v814_v3 }
 0x12d   : > { %v943_v7 = vadd.f32 %v1860_v17, %v942_v4  ;;  %1141 = vst [vmem:[%s1875_s28 + $0x118] sm:$0xff] %v1553_v5  ;;  %v816_v8 = vpop.f32.mrf.mxu0 }
 0x12e   : > { %v944_v9 = vpop.f32.mrf.mxu1  ;;  %1566 = vtanh.f32 %v815_v6 }
 0x12f   : > { %v1555_v10 = vpop.eup %1554  ;;  %1568 = vtanh.f32 %v943_v7  ;;  %v819_v11 = vpop.f32.mrf.mxu0 }
 0x130   : > { %v947_v12 = vpop.f32.mrf.mxu1  ;;  %v1557_v13 = vpop.eup %1556  ;;  %1110 = vst [vmem:[%s1875_s28 + $0x20] sm:$0xff] %v1555_v10  ;;  %v820_v14 = vadd.f32 %v1860_v17, %v819_v11 }
 0x131   : > { %v948_v15 = vadd.f32 %v1860_v17, %v947_v12  ;;  %1142 = vst [vmem:[%s1875_s28 + $0x120] sm:$0xff] %v1557_v13  ;;  %v821_v16 = vpop.f32.mrf.mxu0 }
 0x132   : > { %v949_v18 = vpop.f32.mrf.mxu1  ;;  %1570 = vtanh.f32 %v820_v14 }
 0x133   : > { %v1559_v19 = vpop.eup %1558  ;;  %1572 = vtanh.f32 %v948_v15  ;;  %v822_v20 = vpop.f32.mrf.mxu0 }
 0x134   : > { %v950_v21 = vpop.f32.mrf.mxu1  ;;  %v1561_v22 = vpop.eup %1560  ;;  %1111 = vst [vmem:[%s1875_s28 + $0x28] sm:$0xff] %v1559_v19  ;;  %v823_v23 = vadd.f32 %v1860_v17, %v822_v20 }
 0x135   : > { %v951_v24 = vadd.f32 %v1860_v17, %v950_v21  ;;  %1143 = vst [vmem:[%s1875_s28 + $0x128] sm:$0xff] %v1561_v22  ;;  %v824_v25 = vpop.f32.mrf.mxu0 }
 0x136   : > { %v952_v26 = vpop.f32.mrf.mxu1  ;;  %1574 = vtanh.f32 %v823_v23 }
 0x137   : > { %v1563_v27 = vpop.eup %1562  ;;  %1576 = vtanh.f32 %v951_v24  ;;  %v827_v28 = vpop.f32.mrf.mxu0 }
 0x138   : > { %v955_v29 = vpop.f32.mrf.mxu1  ;;  %v1565_v30 = vpop.eup %1564  ;;  %1112 = vst [vmem:[%s1875_s28 + $0x30] sm:$0xff] %v1563_v27  ;;  %v828_v31 = vadd.f32 %v1860_v17, %v827_v28 }
 0x139   : > { %v956_v32 = vadd.f32 %v1860_v17, %v955_v29  ;;  %1144 = vst [vmem:[%s1875_s28 + $0x130] sm:$0xff] %v1565_v30  ;;  %v829_v33 = vpop.f32.mrf.mxu0 }
 0x13a   : > { %v957_v34 = vpop.f32.mrf.mxu1  ;;  %1578 = vtanh.f32 %v828_v31 }
 0x13b   : > { %v1567_v35 = vpop.eup %1566  ;;  %1580 = vtanh.f32 %v956_v32  ;;  %v830_v36 = vpop.f32.mrf.mxu0 }
 0x13c   : > { %v958_v37 = vpop.f32.mrf.mxu1  ;;  %v1569_v38 = vpop.eup %1568  ;;  %1113 = vst [vmem:[%s1875_s28 + $0x38] sm:$0xff] %v1567_v35  ;;  %v831_v39 = vadd.f32 %v1860_v17, %v830_v36 }
 0x13d   : > { %v959_v40 = vadd.f32 %v1860_v17, %v958_v37  ;;  %1145 = vst [vmem:[%s1875_s28 + $0x138] sm:$0xff] %v1569_v38  ;;  %v832_v41 = vpop.f32.mrf.mxu0 }
 0x13e   : > { %v960_v42 = vpop.f32.mrf.mxu1  ;;  %1582 = vtanh.f32 %v831_v39 }
 0x13f   : > { %v1571_v43 = vpop.eup %1570  ;;  %1584 = vtanh.f32 %v959_v40  ;;  %v835_v44 = vpop.f32.mrf.mxu0 }
 0x140   : > { %v963_v45 = vpop.f32.mrf.mxu1  ;;  %v1573_v46 = vpop.eup %1572  ;;  %1114 = vst [vmem:[%s1875_s28 + $0x40] sm:$0xff] %v1571_v43  ;;  %v836_v47 = vadd.f32 %v1860_v17, %v835_v44 }
 0x141   : > { %v964_v48 = vadd.f32 %v1860_v17, %v963_v45  ;;  %1146 = vst [vmem:[%s1875_s28 + $0x140] sm:$0xff] %v1573_v46  ;;  %v837_v49 = vpop.f32.mrf.mxu0 }
 0x142   : > { %v965_v50 = vpop.f32.mrf.mxu1  ;;  %1586 = vtanh.f32 %v836_v47 }
 0x143   : > { %v1575_v51 = vpop.eup %1574  ;;  %1588 = vtanh.f32 %v964_v48  ;;  %v838_v52 = vpop.f32.mrf.mxu0 }
 0x144   : > { %v966_v53 = vpop.f32.mrf.mxu1  ;;  %v1577_v54 = vpop.eup %1576  ;;  %1115 = vst [vmem:[%s1875_s28 + $0x48] sm:$0xff] %v1575_v51  ;;  %v839_v55 = vadd.f32 %v1860_v17, %v838_v52 }
 0x145   : > { %v967_v56 = vadd.f32 %v1860_v17, %v966_v53  ;;  %1147 = vst [vmem:[%s1875_s28 + $0x148] sm:$0xff] %v1577_v54  ;;  %v840_v57 = vpop.f32.mrf.mxu0 }
 0x146   : > { %v968_v58 = vpop.f32.mrf.mxu1  ;;  %1590 = vtanh.f32 %v839_v55 }
 0x147   : > { %v1579_v59 = vpop.eup %1578  ;;  %1592 = vtanh.f32 %v967_v56  ;;  %v843_v60 = vpop.f32.mrf.mxu0 }
 0x148   : > { %v971_v61 = vpop.f32.mrf.mxu1  ;;  %v1581_v62 = vpop.eup %1580  ;;  %1116 = vst [vmem:[%s1875_s28 + $0x50] sm:$0xff] %v1579_v59  ;;  %v844_v63 = vadd.f32 %v1860_v17, %v843_v60 }
 0x149   : > { %v972_v0 = vadd.f32 %v1860_v17, %v971_v61  ;;  %1148 = vst [vmem:[%s1875_s28 + $0x150] sm:$0xff] %v1581_v62  ;;  %v845_v1 = vpop.f32.mrf.mxu0 }
 0x14a   : > { %v973_v2 = vpop.f32.mrf.mxu1  ;;  %1594 = vtanh.f32 %v844_v63 }
 0x14b   : > { %v1583_v3 = vpop.eup %1582  ;;  %1596 = vtanh.f32 %v972_v0  ;;  %v846_v4 = vpop.f32.mrf.mxu0 }
 0x14c   : > { %v974_v5 = vpop.f32.mrf.mxu1  ;;  %v1585_v6 = vpop.eup %1584  ;;  %1117 = vst [vmem:[%s1875_s28 + $0x58] sm:$0xff] %v1583_v3  ;;  %v847_v7 = vadd.f32 %v1860_v17, %v846_v4 }
 0x14d   : > { %v975_v8 = vadd.f32 %v1860_v17, %v974_v5  ;;  %1149 = vst [vmem:[%s1875_s28 + $0x158] sm:$0xff] %v1585_v6  ;;  %v848_v9 = vpop.f32.mrf.mxu0 }
 0x14e   : > { %v976_v10 = vpop.f32.mrf.mxu1  ;;  %1598 = vtanh.f32 %v847_v7 }
 0x14f   : > { %v1587_v11 = vpop.eup %1586  ;;  %1600 = vtanh.f32 %v975_v8  ;;  %v851_v12 = vpop.f32.mrf.mxu0 }
 0x150   : > { %v979_v13 = vpop.f32.mrf.mxu1  ;;  %v1589_v14 = vpop.eup %1588  ;;  %1118 = vst [vmem:[%s1875_s28 + $0x60] sm:$0xff] %v1587_v11  ;;  %v852_v15 = vadd.f32 %v1860_v17, %v851_v12 }
 0x151   : > { %v980_v16 = vadd.f32 %v1860_v17, %v979_v13  ;;  %1150 = vst [vmem:[%s1875_s28 + $0x160] sm:$0xff] %v1589_v14  ;;  %v853_v18 = vpop.f32.mrf.mxu0 }
 0x152   : > { %v981_v19 = vpop.f32.mrf.mxu1  ;;  %1602 = vtanh.f32 %v852_v15 }
 0x153   : > { %v1591_v20 = vpop.eup %1590  ;;  %1604 = vtanh.f32 %v980_v16  ;;  %v854_v21 = vpop.f32.mrf.mxu0 }
 0x154   : > { %v982_v22 = vpop.f32.mrf.mxu1  ;;  %v1593_v23 = vpop.eup %1592  ;;  %1119 = vst [vmem:[%s1875_s28 + $0x68] sm:$0xff] %v1591_v20  ;;  %v855_v24 = vadd.f32 %v1860_v17, %v854_v21 }
 0x155   : > { %v983_v25 = vadd.f32 %v1860_v17, %v982_v22  ;;  %1151 = vst [vmem:[%s1875_s28 + $0x168] sm:$0xff] %v1593_v23  ;;  %v856_v26 = vpop.f32.mrf.mxu0 }
 0x156   : > { %v984_v27 = vpop.f32.mrf.mxu1  ;;  %1606 = vtanh.f32 %v855_v24 }
 0x157   : > { %v1595_v28 = vpop.eup %1594  ;;  %1608 = vtanh.f32 %v983_v25  ;;  %v859_v29 = vpop.f32.mrf.mxu0 }
 0x158   : > { %v987_v30 = vpop.f32.mrf.mxu1  ;;  %v1597_v31 = vpop.eup %1596  ;;  %1120 = vst [vmem:[%s1875_s28 + $0x70] sm:$0xff] %v1595_v28  ;;  %v860_v32 = vadd.f32 %v1860_v17, %v859_v29 }
 0x159   : > { %v988_v33 = vadd.f32 %v1860_v17, %v987_v30  ;;  %1152 = vst [vmem:[%s1875_s28 + $0x170] sm:$0xff] %v1597_v31  ;;  %v861_v34 = vpop.f32.mrf.mxu0 }
 0x15a   : > { %v989_v35 = vpop.f32.mrf.mxu1  ;;  %1610 = vtanh.f32 %v860_v32 }
 0x15b   : > { %v1599_v36 = vpop.eup %1598  ;;  %1612 = vtanh.f32 %v988_v33  ;;  %v862_v37 = vpop.f32.mrf.mxu0 }
 0x15c   : > { %v990_v38 = vpop.f32.mrf.mxu1  ;;  %v1601_v39 = vpop.eup %1600  ;;  %1121 = vst [vmem:[%s1875_s28 + $0x78] sm:$0xff] %v1599_v36  ;;  %v863_v40 = vadd.f32 %v1860_v17, %v862_v37 }
 0x15d   : > { %v991_v41 = vadd.f32 %v1860_v17, %v990_v38  ;;  %1153 = vst [vmem:[%s1875_s28 + $0x178] sm:$0xff] %v1601_v39  ;;  %v864_v42 = vpop.f32.mrf.mxu0 }
 0x15e   : > { %v992_v43 = vpop.f32.mrf.mxu1  ;;  %1614 = vtanh.f32 %v863_v40 }
 0x15f   : > { %v1603_v44 = vpop.eup %1602  ;;  %1616 = vtanh.f32 %v991_v41  ;;  %v867_v45 = vpop.f32.mrf.mxu0 }
 0x160   : > { %v995_v46 = vpop.f32.mrf.mxu1  ;;  %v1605_v47 = vpop.eup %1604  ;;  %1122 = vst [vmem:[%s1875_s28 + $0x80] sm:$0xff] %v1603_v44  ;;  %v868_v48 = vadd.f32 %v1860_v17, %v867_v45 }
 0x161   : > { %v996_v49 = vadd.f32 %v1860_v17, %v995_v46  ;;  %1154 = vst [vmem:[%s1875_s28 + $0x180] sm:$0xff] %v1605_v47  ;;  %v869_v50 = vpop.f32.mrf.mxu0 }
 0x162   : > { %v997_v51 = vpop.f32.mrf.mxu1  ;;  %1618 = vtanh.f32 %v868_v48 }
 0x163   : > { %v1607_v52 = vpop.eup %1606  ;;  %1620 = vtanh.f32 %v996_v49  ;;  %v870_v53 = vpop.f32.mrf.mxu0 }
 0x164   : > { %v998_v54 = vpop.f32.mrf.mxu1  ;;  %v1609_v55 = vpop.eup %1608  ;;  %1123 = vst [vmem:[%s1875_s28 + $0x88] sm:$0xff] %v1607_v52  ;;  %v871_v56 = vadd.f32 %v1860_v17, %v870_v53 }
 0x165   : > { %v999_v57 = vadd.f32 %v1860_v17, %v998_v54  ;;  %1155 = vst [vmem:[%s1875_s28 + $0x188] sm:$0xff] %v1609_v55  ;;  %v872_v58 = vpop.f32.mrf.mxu0 }
 0x166   : > { %v1000_v59 = vpop.f32.mrf.mxu1  ;;  %1622 = vtanh.f32 %v871_v56 }
 0x167   : > { %v1611_v60 = vpop.eup %1610  ;;  %1624 = vtanh.f32 %v999_v57  ;;  %v875_v61 = vpop.f32.mrf.mxu0 }
 0x168   : > { %v1003_v62 = vpop.f32.mrf.mxu1  ;;  %v1613_v63 = vpop.eup %1612  ;;  %1124 = vst [vmem:[%s1875_s28 + $0x90] sm:$0xff] %v1611_v60  ;;  %v876_v0 = vadd.f32 %v1860_v17, %v875_v61 }
 0x169   : > { %v1004_v1 = vadd.f32 %v1860_v17, %v1003_v62  ;;  %1156 = vst [vmem:[%s1875_s28 + $0x190] sm:$0xff] %v1613_v63  ;;  %v877_v2 = vpop.f32.mrf.mxu0 }
 0x16a   : > { %v1005_v3 = vpop.f32.mrf.mxu1  ;;  %1626 = vtanh.f32 %v876_v0 }
 0x16b   : > { %v1615_v4 = vpop.eup %1614  ;;  %1628 = vtanh.f32 %v1004_v1  ;;  %v878_v5 = vpop.f32.mrf.mxu0 }
 0x16c   : > { %v1006_v6 = vpop.f32.mrf.mxu1  ;;  %v1617_v7 = vpop.eup %1616  ;;  %1125 = vst [vmem:[%s1875_s28 + $0x98] sm:$0xff] %v1615_v4  ;;  %v879_v8 = vadd.f32 %v1860_v17, %v878_v5 }
 0x16d   : > { %v1007_v9 = vadd.f32 %v1860_v17, %v1006_v6  ;;  %1157 = vst [vmem:[%s1875_s28 + $0x198] sm:$0xff] %v1617_v7  ;;  %v880_v10 = vpop.f32.mrf.mxu0 }
 0x16e   : > { %v1008_v11 = vpop.f32.mrf.mxu1  ;;  %1630 = vtanh.f32 %v879_v8 }
 0x16f   : > { %v1619_v12 = vpop.eup %1618  ;;  %1632 = vtanh.f32 %v1007_v9  ;;  %v883_v13 = vpop.f32.mrf.mxu0 }
 0x170   : > { %v1011_v14 = vpop.f32.mrf.mxu1  ;;  %v1621_v15 = vpop.eup %1620  ;;  %1126 = vst [vmem:[%s1875_s28 + $0xa0] sm:$0xff] %v1619_v12  ;;  %v884_v16 = vadd.f32 %v1860_v17, %v883_v13 }
 0x171   : > { %v1012_v18 = vadd.f32 %v1860_v17, %v1011_v14  ;;  %1158 = vst [vmem:[%s1875_s28 + $0x1a0] sm:$0xff] %v1621_v15  ;;  %v885_v19 = vpop.f32.mrf.mxu0 }
 0x172   : > { %v1013_v20 = vpop.f32.mrf.mxu1  ;;  %1634 = vtanh.f32 %v884_v16 }
 0x173   : > { %v1623_v21 = vpop.eup %1622  ;;  %1636 = vtanh.f32 %v1012_v18  ;;  %v886_v22 = vpop.f32.mrf.mxu0 }
 0x174   : > { %v1014_v23 = vpop.f32.mrf.mxu1  ;;  %v1625_v24 = vpop.eup %1624  ;;  %1127 = vst [vmem:[%s1875_s28 + $0xa8] sm:$0xff] %v1623_v21  ;;  %v887_v25 = vadd.f32 %v1860_v17, %v886_v22 }
 0x175   : > { %v1015_v26 = vadd.f32 %v1860_v17, %v1014_v23  ;;  %1159 = vst [vmem:[%s1875_s28 + $0x1a8] sm:$0xff] %v1625_v24  ;;  %v888_v27 = vpop.f32.mrf.mxu0 }
 0x176   : > { %v1016_v28 = vpop.f32.mrf.mxu1  ;;  %1638 = vtanh.f32 %v887_v25 }
 0x177   : > { %v1627_v29 = vpop.eup %1626  ;;  %1640 = vtanh.f32 %v1015_v26  ;;  %v891_v30 = vpop.f32.mrf.mxu0 }
 0x178   : > { %v1019_v31 = vpop.f32.mrf.mxu1  ;;  %v1629_v32 = vpop.eup %1628  ;;  %1128 = vst [vmem:[%s1875_s28 + $0xb0] sm:$0xff] %v1627_v29  ;;  %v892_v33 = vadd.f32 %v1860_v17, %v891_v30 }
 0x179   : > { %v1020_v34 = vadd.f32 %v1860_v17, %v1019_v31  ;;  %1160 = vst [vmem:[%s1875_s28 + $0x1b0] sm:$0xff] %v1629_v32  ;;  %v893_v35 = vpop.f32.mrf.mxu0 }
 0x17a   : > { %v1021_v36 = vpop.f32.mrf.mxu1  ;;  %1642 = vtanh.f32 %v892_v33 }
 0x17b   : > { %v1631_v37 = vpop.eup %1630  ;;  %1644 = vtanh.f32 %v1020_v34  ;;  %v894_v38 = vpop.f32.mrf.mxu0 }
 0x17c   : > { %v1022_v39 = vpop.f32.mrf.mxu1  ;;  %v1633_v40 = vpop.eup %1632  ;;  %1129 = vst [vmem:[%s1875_s28 + $0xb8] sm:$0xff] %v1631_v37  ;;  %v895_v41 = vadd.f32 %v1860_v17, %v894_v38 }
 0x17d   : > { %v1023_v42 = vadd.f32 %v1860_v17, %v1022_v39  ;;  %1161 = vst [vmem:[%s1875_s28 + $0x1b8] sm:$0xff] %v1633_v40  ;;  %v896_v43 = vpop.f32.mrf.mxu0 }
 0x17e   : > { %v1024_v44 = vpop.f32.mrf.mxu1  ;;  %1646 = vtanh.f32 %v895_v41 }
 0x17f   : > { %v1635_v45 = vpop.eup %1634  ;;  %1648 = vtanh.f32 %v1023_v42  ;;  %v899_v46 = vpop.f32.mrf.mxu0 }
 0x180   : > { %v1027_v47 = vpop.f32.mrf.mxu1  ;;  %v1637_v48 = vpop.eup %1636  ;;  %1130 = vst [vmem:[%s1875_s28 + $0xc0] sm:$0xff] %v1635_v45  ;;  %v900_v49 = vadd.f32 %v1860_v17, %v899_v46 }
 0x181   : > { %v1028_v50 = vadd.f32 %v1860_v17, %v1027_v47  ;;  %1162 = vst [vmem:[%s1875_s28 + $0x1c0] sm:$0xff] %v1637_v48  ;;  %v901_v51 = vpop.f32.mrf.mxu0 }
 0x182   : > { %v1029_v52 = vpop.f32.mrf.mxu1  ;;  %1650 = vtanh.f32 %v900_v49 }
 0x183   : > { %v1639_v53 = vpop.eup %1638  ;;  %1652 = vtanh.f32 %v1028_v50  ;;  %v902_v54 = vpop.f32.mrf.mxu0 }
 0x184   : > { %v1030_v55 = vpop.f32.mrf.mxu1  ;;  %v1641_v56 = vpop.eup %1640  ;;  %1131 = vst [vmem:[%s1875_s28 + $0xc8] sm:$0xff] %v1639_v53  ;;  %v903_v57 = vadd.f32 %v1860_v17, %v902_v54 }
 0x185   : > { %v1031_v58 = vadd.f32 %v1860_v17, %v1030_v55  ;;  %1163 = vst [vmem:[%s1875_s28 + $0x1c8] sm:$0xff] %v1641_v56  ;;  %v904_v59 = vpop.f32.mrf.mxu0 }
 0x186   : > { %v1032_v60 = vpop.f32.mrf.mxu1  ;;  %1654 = vtanh.f32 %v903_v57 }
 0x187   : > { %v1643_v61 = vpop.eup %1642  ;;  %1656 = vtanh.f32 %v1031_v58  ;;  %v907_v62 = vpop.f32.mrf.mxu0 }
 0x188   : > { %v1035_v63 = vpop.f32.mrf.mxu1  ;;  %v1645_v0 = vpop.eup %1644  ;;  %1132 = vst [vmem:[%s1875_s28 + $0xd0] sm:$0xff] %v1643_v61  ;;  %v908_v1 = vadd.f32 %v1860_v17, %v907_v62 }
 0x189   : > { %v1036_v2 = vadd.f32 %v1860_v17, %v1035_v63  ;;  %1164 = vst [vmem:[%s1875_s28 + $0x1d0] sm:$0xff] %v1645_v0  ;;  %v909_v3 = vpop.f32.mrf.mxu0 }
 0x18a   : > { %v1037_v4 = vpop.f32.mrf.mxu1  ;;  %1658 = vtanh.f32 %v908_v1 }
 0x18b   : > { %v1647_v5 = vpop.eup %1646  ;;  %1660 = vtanh.f32 %v1036_v2  ;;  %v910_v6 = vpop.f32.mrf.mxu0 }
 0x18c   : > { %v1038_v7 = vpop.f32.mrf.mxu1  ;;  %v1649_v8 = vpop.eup %1648  ;;  %1133 = vst [vmem:[%s1875_s28 + $0xd8] sm:$0xff] %v1647_v5  ;;  %v911_v9 = vadd.f32 %v1860_v17, %v910_v6 }
 0x18d   : > { %v1039_v10 = vadd.f32 %v1860_v17, %v1038_v7  ;;  %1165 = vst [vmem:[%s1875_s28 + $0x1d8] sm:$0xff] %v1649_v8  ;;  %v912_v11 = vpop.f32.mrf.mxu0 }
 0x18e   : > { %v1040_v12 = vpop.f32.mrf.mxu1  ;;  %1662 = vtanh.f32 %v911_v9 }
 0x18f   : > { %v1651_v13 = vpop.eup %1650  ;;  %1664 = vtanh.f32 %v1039_v10 }
 0x190   : > { %v1653_v14 = vpop.eup %1652  ;;  %1134 = vst [vmem:[%s1875_s28 + $0xe0] sm:$0xff] %v1651_v13 }
 0x191   : > { %1166 = vst [vmem:[%s1875_s28 + $0x1e0] sm:$0xff] %v1653_v14 }
 0x193   : > { %v1655_v15 = vpop.eup %1654 }
 0x194   : > { %v1657_v16 = vpop.eup %1656  ;;  %1135 = vst [vmem:[%s1875_s28 + $0xe8] sm:$0xff] %v1655_v15 }
 0x195   : > { %1167 = vst [vmem:[%s1875_s28 + $0x1e8] sm:$0xff] %v1657_v16 }
 0x197   : > { %v1659_v18 = vpop.eup %1658 }
 0x198   : > { %v1661_v19 = vpop.eup %1660  ;;  %1136 = vst [vmem:[%s1875_s28 + $0xf0] sm:$0xff] %v1659_v18 }
 0x199   : > { %1168 = vst [vmem:[%s1875_s28 + $0x1f0] sm:$0xff] %v1661_v19 }
 0x19b   : > { %v1663_v17 = vpop.eup %1662 }
 0x19c   : > { %v1665_v20 = vpop.eup %1664  ;;  %1137 = vst [vmem:[%s1875_s28 + $0xf8] sm:$0xff] %v1663_v17 }
 0x19d   : > { %1169 = vst [vmem:[%s1875_s28 + $0x1f8] sm:$0xff] %v1665_v20 }
 0x19e PF: > { %s13_s14 = sadd.s32 1, %s1688_s14   ;;  %s2010_s12 = smov %s1684_s13 }
 0x19f   : > { %p10_p5 = scmp.ge.s32.totalorder %s13_s14, 6   ;;  %s2011_s13 = smov %s2013_s15 }
 0x1a1   :  { %12 = sbr.rel (!%p10_p5) target bundleno = 2 (0x2), region = 65 }

</bundles_post_ra>
